<compile_context>
chip_gen: v5e
topology: v5e:2x2
jax: 0.10.0
libtpu: 0.0.40
codegen_flags: <defaults>
</compile_context>

<pallas_src>
import functools

import jax
import jax.numpy as jnp
from jax import lax
from jax.experimental import pallas as pl
from jax.experimental.pallas import tpu as pltpu

_BN_EPS = 1e-5


# -----------------------------------------------------------------------------
# Hardware-aware sizing
# -----------------------------------------------------------------------------
def _tpu_vmem_capacity_bytes():
    try:
        return int(pltpu.get_tpu_info().vmem_capacity_bytes)
    except Exception:
        return 64 * 1024 * 1024          # conservative (v7x per-TC VMEM)


def _vmem_step_budget_bytes():
    # ~1/4 of VMEM for one grid step's working set:
    #   v5e/v6e (128 MiB) -> ~32 MiB,  v7x (64 MiB) -> ~16 MiB.
    return _tpu_vmem_capacity_bytes() // 4


def _vmem_limit_bytes():
    return int(min((_tpu_vmem_capacity_bytes() * 3) // 4, 96 * 1024 * 1024))


# -----------------------------------------------------------------------------
# Conv kernel: 3x3 / stride 1 / pad 1 + bias, with
#   - optional fused BatchNorm+ReLU applied to the *input* tile (so the
#     previous conv's raw output is consumed directly), and
#   - fused per-(batch, row-tile) channel sum / sum-of-squares of the raw
#     conv output (partial batch statistics for this layer's own BN).
# Grid: (batch, row_tiles), both "parallel".  Inputs: the main row tile plus
# two clamped 1-row halo blocks, all auto-pipelined by BlockSpec.
# -----------------------------------------------------------------------------
def _conv3x3_kernel(xm_ref, xt_ref, xb_ref, scale_ref, shift_ref, w_ref, b_ref,
                    y_ref, sum_ref, ssq_ref, *, apply_act):
    r = pl.program_id(1)
    num_r = pl.num_programs(1)

    ht = xm_ref.shape[1]
    wd = xm_ref.shape[2]
    cin = xm_ref.shape[3]
    cout = y_ref.shape[3]

    # Assemble the (ht+2)-row tile from the main block and the two halo rows.
    top = xt_ref[0]                                    # (1, wd, cin)
    mid = xm_ref[0]                                    # (ht, wd, cin)
    bot = xb_ref[0]                                    # (1, wd, cin)
    xa = jnp.concatenate([top, mid, bot], axis=0)      # (ht+2, wd, cin)

    # Fused BatchNorm+ReLU of the previous layer (conv2 path only).
    if apply_act:
        xf = xa.astype(jnp.float32)
        xf = xf * scale_ref[0][None, None, :] + shift_ref[0][None, None, :]
        xa = jnp.maximum(xf, 0.0).astype(xa.dtype)

    # Zero the rows that lie outside the image (post-activation, so the
    # zero-padding semantics of the conv are exact).  The halo blocks are
    # clamped row loads, so no uninitialized memory is ever read.
    top_kill = -1 + (r == 0).astype(jnp.int32)                    # 0 or -1
    bot_kill = -1 + (r == num_r - 1).astype(jnp.int32) * (ht + 2)  # ht+1 or -1
    ridx = lax.broadcasted_iota(jnp.int32, (ht + 2, wd, cin), 0)
    keep = jnp.logical_and(ridx != top_kill, ridx != bot_kill)
    xa = jnp.where(keep, xa, jnp.zeros_like(xa))

    # kw shifts as value-level zero-column concats (no physical width pad,
    # no masked offset stores).
    zcol = jnp.zeros((ht + 2, 1, cin), xa.dtype)
    x_m1 = jnp.concatenate([zcol, xa[:, :wd - 1, :]], axis=1)   # x[.., w-1, ..]
    x_p1 = jnp.concatenate([xa[:, 1:, :], zcol], axis=1)        # x[.., w+1, ..]
    cols = (x_m1, xa, x_p1)

    # 9 accumulated K=Cin matmuls (no im2col lane repack).
    acc = jnp.zeros((ht * wd, cout), jnp.float32)
    for kw in range(3):
        s = cols[kw]
        for kh in range(3):
            tap = s[kh:kh + ht].reshape(ht * wd, cin)
            acc = acc + jnp.dot(tap, w_ref[kh * 3 + kw],
                                preferred_element_type=jnp.float32)
    acc = acc + b_ref[0][None, :]

    y_ref[...] = acc.reshape(1, ht, wd, cout).astype(y_ref.dtype)

    # Per-(batch, row-tile) partial BN statistics (reduced in the wrapper,
    # which keeps this grid fully "parallel" for v7x megacore).
    sum_ref[...] = jnp.sum(acc, axis=0).reshape(1, 1, 1, cout)
    ssq_ref[...] = jnp.sum(acc * acc, axis=0).reshape(1, 1, 1, cout)


def _pick_row_tile(h, w, cin, cout, block_rows):
    """Largest divisor of H whose per-step working set fits the VMEM budget."""
    if block_rows is not None and h % int(block_rows) == 0:
        return int(block_rows)
    budget = _vmem_step_budget_bytes()
    best = 1
    for d in range(1, h + 1):
        if h % d:
            continue
        # bf16 main block (dbl-buffered) + shifted temporaries + f32 act temp
        # + bf16 out block (dbl-buffered) + f32 accumulator, roughly.
        need = (d * w * (16 * cin + 12 * cout)
                + 4 * w * cin * 2 + 9 * cin * cout * 4)
        if need <= budget:
            best = d
    return best


def _conv3x3_raw(x_nhwc, w9, b, in_scale, in_shift, *, apply_act, block_rows):
    """Conv3x3(act(x)) + bias where act = optional fused scale/shift + ReLU.

    Returns the raw (pre-BN) conv output in bf16 plus per-channel sums and
    sums-of-squares (f32) of that output."""
    n, h, wd, cin = x_nhwc.shape
    cout = w9.shape[-1]
    ht = _pick_row_tile(h, wd, cin, cout, block_rows)
    num_r = h // ht

    xb = x_nhwc.astype(jnp.bfloat16)
    w2 = w9.astype(jnp.bfloat16)
    b2 = b.reshape(1, cout).astype(jnp.float32)
    sc2 = in_scale.reshape(1, cin).astype(jnp.float32)
    sh2 = in_shift.reshape(1, cin).astype(jnp.float32)

    kernel = functools.partial(_conv3x3_kernel, apply_act=apply_act)

    flops = int(2 * 9 * cin * cout * n * h * wd)
    bytes_acc = int(n * h * wd * cin * 2 + n * h * wd * cout * 2
                    + 9 * cin * cout * 2 + 2 * n * num_r * cout * 4)

    y, s, q = pl.pallas_call(
        kernel,
        out_shape=(
            jax.ShapeDtypeStruct((n, h, wd, cout), jnp.bfloat16),
            jax.ShapeDtypeStruct((n, num_r, 1, cout), jnp.float32),
            jax.ShapeDtypeStruct((n, num_r, 1, cout), jnp.float32),
        ),
        grid_spec=pltpu.PrefetchScalarGridSpec(
            num_scalar_prefetch=0,
            grid=(n, num_r),
            in_specs=[
                # main row tile (auto-pipelined)
                pl.BlockSpec((1, ht, wd, cin), lambda i, j: (i, j, 0, 0)),
                # top halo row (clamped row index; zeroed in-kernel at r==0)
                pl.BlockSpec((1, 1, wd, cin),
                             lambda i, j: (i, jnp.maximum(j * ht - 1, 0), 0, 0)),
                # bottom halo row (clamped; zeroed in-kernel at r==num_r-1)
                pl.BlockSpec((1, 1, wd, cin),
                             lambda i, j: (i, jnp.minimum((j + 1) * ht, h - 1),
                                           0, 0)),
                pl.BlockSpec((1, cin), lambda i, j: (0, 0)),     # fused scale
                pl.BlockSpec((1, cin), lambda i, j: (0, 0)),     # fused shift
                pl.BlockSpec((9, cin, cout), lambda i, j: (0, 0, 0)),
                pl.BlockSpec((1, cout), lambda i, j: (0, 0)),
            ],
            out_specs=[
                pl.BlockSpec((1, ht, wd, cout), lambda i, j: (i, j, 0, 0)),
                pl.BlockSpec((1, 1, 1, cout), lambda i, j: (i, j, 0, 0)),
                pl.BlockSpec((1, 1, 1, cout), lambda i, j: (i, j, 0, 0)),
            ],
        ),
        compiler_params=pltpu.CompilerParams(
            dimension_semantics=("parallel", "parallel"),
            vmem_limit_bytes=_vmem_limit_bytes()),
        cost_estimate=pl.CostEstimate(flops=flops, transcendentals=0,
                                      bytes_accessed=bytes_acc),
    )(xb, xb, xb, sc2, sh2, w2, b2)

    return y, jnp.sum(s, axis=(0, 1, 2)), jnp.sum(q, axis=(0, 1, 2))


def _bn_affine(ch_sum, ch_ssq, gamma, beta, count, eps=_BN_EPS):
    """Per-channel scale/shift of training-mode BatchNorm from batch stats."""
    mean = ch_sum / count
    var = ch_ssq / count - mean * mean
    var = jnp.maximum(var, 0.0)          # guard E[x^2]-E[x]^2 cancellation
    scale = gamma * lax.rsqrt(var + eps)
    shift = beta - mean * scale
    return scale, shift


# -----------------------------------------------------------------------------
# Final BatchNorm + ReLU as a lane-dense (N*H, W*C) elementwise pass; the
# per-channel scale/shift are tiled across W so lanes are fully dense even for
# C < 128.
# -----------------------------------------------------------------------------
def _bn_relu_kernel(y_ref, scale_ref, shift_ref, o_ref):
    y = y_ref[...].astype(jnp.float32)
    o_ref[...] = jnp.maximum(y * scale_ref[...] + shift_ref[...], 0.0)


def _pick_flat_rows(rows, lanes):
    budget = _vmem_step_budget_bytes()
    cands = [d for d in range(1, rows + 1)
             if rows % d == 0 and (d % 8 == 0 or d == rows)]
    fitting = [d for d in cands if d * lanes * 16 <= budget]
    if fitting:
        return max(fitting)
    return min(cands)


def _bn_relu_lane_dense(y_nhwc, scale, shift):
    n, h, w, c = y_nhwc.shape
    rows, lanes = n * h, w * c
    y2 = y_nhwc.reshape(rows, lanes)
    sc = jnp.tile(scale.astype(jnp.float32), w).reshape(1, lanes)
    sh = jnp.tile(shift.astype(jnp.float32), w).reshape(1, lanes)
    bt = _pick_flat_rows(rows, lanes)

    out = pl.pallas_call(
        _bn_relu_kernel,
        out_shape=jax.ShapeDtypeStruct((rows, lanes), jnp.float32),
        grid_spec=pltpu.PrefetchScalarGridSpec(
            num_scalar_prefetch=0,
            grid=(rows // bt,),
            in_specs=[
                pl.BlockSpec((bt, lanes), lambda i: (i, 0)),
                pl.BlockSpec((1, lanes), lambda i: (0, 0)),
                pl.BlockSpec((1, lanes), lambda i: (0, 0)),
            ],
            out_specs=pl.BlockSpec((bt, lanes), lambda i: (i, 0)),
        ),
        compiler_params=pltpu.CompilerParams(
            dimension_semantics=("parallel",),
            vmem_limit_bytes=_vmem_limit_bytes()),
        cost_estimate=pl.CostEstimate(
            flops=int(2 * rows * lanes), transcendentals=0,
            bytes_accessed=int(rows * lanes * (2 + 4) + 2 * lanes * 4)),
    )(y2, sc, sh)
    return out.reshape(n, h, w, c)


# -----------------------------------------------------------------------------
# Module forward
# -----------------------------------------------------------------------------
def _unet_conv2_core(x_nhwc, params, block_rows):
    """Returns raw (pre-BN2) conv2 output in bf16 plus BN2's (scale, shift).

    Chained UnetConv2 blocks should consume this directly (fusing BN2+ReLU
    into the next conv's input load) instead of calling the flat BN pass."""
    n, h, w, cin = x_nhwc.shape
    cout = params["w1"].shape[-1]
    count = float(n * h * w)

    ones = jnp.ones((cin,), jnp.float32)
    zeros = jnp.zeros((cin,), jnp.float32)
    w1 = params["w1"].reshape(9, cin, cout)
    w2 = params["w2"].reshape(9, cout, cout)

    # conv1: raw output + batch stats (its BN+ReLU is fused into conv2's load)
    y1, s1, q1 = _conv3x3_raw(x_nhwc, w1, params["b1"], ones, zeros,
                              apply_act=False, block_rows=block_rows)
    scale1, shift1 = _bn_affine(s1, q1, params["gamma1"], params["beta1"], count)

    # conv2: consumes raw y1, applying BN1+ReLU per tile before the matmuls
    y2, s2, q2 = _conv3x3_raw(y1, w2, params["b2"], scale1, shift1,
                              apply_act=True, block_rows=block_rows)
    scale2, shift2 = _bn_affine(s2, q2, params["gamma2"], params["beta2"], count)
    return y2, scale2, shift2


@functools.partial(jax.jit, static_argnames=("block_rows",))
def unet_conv2_forward(x_nchw, params, block_rows=None):
    """Forward of UnetConv2(in_size, out_size, is_batchnorm=True)."""
    x = jnp.transpose(x_nchw, (0, 2, 3, 1)).astype(jnp.bfloat16)   # NCHW->NHWC
    y2, scale2, shift2 = _unet_conv2_core(x, params, block_rows)
    out = _bn_relu_lane_dense(y2, scale2, shift2)                  # f32 NHWC
    return jnp.transpose(out, (0, 3, 1, 2))                        # NHWC->NCHW


def init_params(key, in_size, out_size):
    k1, k2, k3, k4 = jax.random.split(key, 4)
    # Conv weights stored as (kh, kw, Cin, Cout); PyTorch is (Cout, Cin, kh, kw).
    w1 = 0.1 * jax.random.normal(k1, (3, 3, in_size, out_size), jnp.float32)
    b1 = 0.1 * jax.random.normal(k2, (out_size,), jnp.float32)
    w2 = 0.1 * jax.random.normal(k3, (3, 3, out_size, out_size), jnp.float32)
    b2 = 0.1 * jax.random.normal(k4, (out_size,), jnp.float32)
    # BatchNorm2d default init: weight=1, bias=0.
    gamma1 = jnp.ones((out_size,), jnp.float32)
    beta1 = jnp.zeros((out_size,), jnp.float32)
    gamma2 = jnp.ones((out_size,), jnp.float32)
    beta2 = jnp.zeros((out_size,), jnp.float32)
    return dict(w1=w1, b1=b1, w2=w2, b2=b2,
                gamma1=gamma1, beta1=beta1, gamma2=gamma2, beta2=beta2)


def _reference_forward(x_nchw, params, eps=_BN_EPS):
    """Pure-JAX f32 reference (PyTorch training-mode BatchNorm semantics)."""
    x = jnp.transpose(x_nchw, (0, 2, 3, 1))

    def block(t, w, b, gamma, beta):
        y = lax.conv_general_dilated(
            t, w, window_strides=(1, 1), padding=((1, 1), (1, 1)),
            dimension_numbers=("NHWC", "HWIO", "NHWC")) + b
        mean = jnp.mean(y, axis=(0, 1, 2))
        var = jnp.var(y, axis=(0, 1, 2))          # biased, as BN uses
        yn = (y - mean) * lax.rsqrt(var + eps)
        return jnp.maximum(yn * gamma + beta, 0.0)

    x = block(x, params["w1"], params["b1"], params["gamma1"], params["beta1"])
    x = block(x, params["w2"], params["b2"], params["gamma2"], params["beta2"])
    return jnp.transpose(x, (0, 3, 1, 2))


if __name__ == "__main__":
    key = jax.random.PRNGKey(0)
    kx, kp = jax.random.split(key)

    N, in_size, out_size, H, W = 2, 4, 8, 16, 16
    x = jax.random.normal(kx, (N, in_size, H, W), jnp.float32)   # NCHW input
    params = init_params(kp, in_size, out_size)

    ref = _reference_forward(x, params)

    # block_rows=8 -> two row tiles per image: exercises real halo rows and
    # both image-border zeroing paths.  block_rows=None -> budget-derived tile.
    for br in (8, None):
        out = jax.block_until_ready(unet_conv2_forward(x, params, block_rows=br))
        assert out.shape == (N, out_size, H, W), out.shape
        assert out.dtype == jnp.float32
        assert bool(jnp.all(out >= 0.0))              # ReLU output
        max_diff = float(jnp.max(jnp.abs(out - ref)))
        assert max_diff < 0.1, f"block_rows={br}: max abs diff {max_diff}"

    print("KERNEL_OK")
</pallas_src>

<mosaic_0001>
module attributes {stable_mosaic.version = 11 : i64} {
  func.func @_conv3x3_kernel(%arg0: i32, %arg1: i32, %arg2: memref<1x8x16x4xbf16, #tpu.memory_space<vmem>>, %arg3: memref<1x1x16x4xbf16, #tpu.memory_space<vmem>>, %arg4: memref<1x1x16x4xbf16, #tpu.memory_space<vmem>>, %arg5: memref<1x4xf32, #tpu.memory_space<vmem>>, %arg6: memref<1x4xf32, #tpu.memory_space<vmem>>, %arg7: memref<9x4x8xbf16, #tpu.memory_space<vmem>>, %arg8: memref<1x8xf32, #tpu.memory_space<vmem>>, %arg9: memref<1x8x16x8xbf16, #tpu.memory_space<vmem>>, %arg10: memref<1x1x1x8xf32, #tpu.memory_space<vmem>>, %arg11: memref<1x1x1x8xf32, #tpu.memory_space<vmem>>) attributes {dimension_semantics = [#tpu.dimension_semantics<parallel>, #tpu.dimension_semantics<parallel>], iteration_bounds = array<i64: 2, 2>, scalar_prefetch = 0 : i64, scratch_operands = 0 : i64, tpu.core_type = #tpu.core_type<tc>, window_params = [{transform_indices = @transform_0, window_bounds = array<i64: 1, 8, 16, 4>}, {transform_indices = @transform_1, window_bounds = array<i64: 1, 1, 16, 4>}, {transform_indices = @transform_2, window_bounds = array<i64: 1, 1, 16, 4>}, {pipeline_mode = #tpu.pipeline_mode<synchronous>, transform_indices = @transform_3, window_bounds = array<i64: 1, 4>}, {pipeline_mode = #tpu.pipeline_mode<synchronous>, transform_indices = @transform_4, window_bounds = array<i64: 1, 4>}, {pipeline_mode = #tpu.pipeline_mode<synchronous>, transform_indices = @transform_5, window_bounds = array<i64: 9, 4, 8>}, {pipeline_mode = #tpu.pipeline_mode<synchronous>, transform_indices = @transform_6, window_bounds = array<i64: 1, 8>}, {transform_indices = @transform_7, window_bounds = array<i64: 1, 8, 16, 8>}, {transform_indices = @transform_8, window_bounds = array<i64: 1, 1, 1, 8>}, {transform_indices = @transform_9, window_bounds = array<i64: 1, 1, 1, 8>}]} {
    %c0 = arith.constant 0 : index
    %c0_0 = arith.constant 0 : index
    %c0_1 = arith.constant 0 : index
    %c0_2 = arith.constant 0 : index
    %0 = vector.load %arg3[%c0, %c0_0, %c0_1, %c0_2] : memref<1x1x16x4xbf16, #tpu.memory_space<vmem>>, vector<1x1x16x4xbf16>
    %1 = vector.shape_cast %0 : vector<1x1x16x4xbf16> to vector<1x16x4xbf16>
    %c0_3 = arith.constant 0 : index
    %c0_4 = arith.constant 0 : index
    %c0_5 = arith.constant 0 : index
    %c0_6 = arith.constant 0 : index
    %2 = vector.load %arg2[%c0_3, %c0_4, %c0_5, %c0_6] : memref<1x8x16x4xbf16, #tpu.memory_space<vmem>>, vector<1x8x16x4xbf16>
    %3 = vector.shape_cast %2 : vector<1x8x16x4xbf16> to vector<8x16x4xbf16>
    %c0_7 = arith.constant 0 : index
    %c0_8 = arith.constant 0 : index
    %c0_9 = arith.constant 0 : index
    %c0_10 = arith.constant 0 : index
    %4 = vector.load %arg4[%c0_7, %c0_8, %c0_9, %c0_10] : memref<1x1x16x4xbf16, #tpu.memory_space<vmem>>, vector<1x1x16x4xbf16>
    %5 = vector.shape_cast %4 : vector<1x1x16x4xbf16> to vector<1x16x4xbf16>
    %6 = tpu.concatenate %1, %3, %5 in 0 : vector<1x16x4xbf16>, vector<8x16x4xbf16>, vector<1x16x4xbf16> -> vector<10x16x4xbf16>
    %c0_i32 = arith.constant 0 : i32
    %7 = arith.cmpi eq, %arg1, %c0_i32 : i32
    %8 = arith.extui %7 : i1 to i32
    %c-1_i32 = arith.constant -1 : i32
    %9 = arith.addi %c-1_i32, %8 : i32
    %c1_i32 = arith.constant 1 : i32
    %10 = arith.cmpi eq, %arg1, %c1_i32 : i32
    %11 = arith.extui %10 : i1 to i32
    %c10_i32 = arith.constant 10 : i32
    %12 = arith.muli %11, %c10_i32 : i32
    %c-1_i32_11 = arith.constant -1 : i32
    %13 = arith.addi %c-1_i32_11, %12 : i32
    %14 = tpu.iota {dimensions = array<i32: 0>} : vector<10x16x4xi32>
    %15 = vector.broadcast %9 : i32 to vector<10x16x4xi32>
    %16 = arith.cmpi ne, %14, %15 : vector<10x16x4xi32>
    %17 = vector.broadcast %13 : i32 to vector<10x16x4xi32>
    %18 = arith.cmpi ne, %14, %17 : vector<10x16x4xi32>
    %19 = arith.andi %16, %18 : vector<10x16x4xi1>
    %cst = arith.constant 0.000000e+00 : bf16
    %20 = vector.broadcast %cst : bf16 to vector<10x16x4xbf16>
    %21 = arith.select %19, %6, %20 : vector<10x16x4xi1>, vector<10x16x4xbf16>
    %cst_12 = arith.constant 0.000000e+00 : bf16
    %22 = vector.broadcast %cst_12 : bf16 to vector<10x1x4xbf16>
    %23 = vector.extract_strided_slice %21 {offsets = [0, 0, 0], sizes = [10, 15, 4], strides = [1, 1, 1]} : vector<10x16x4xbf16> to vector<10x15x4xbf16>
    %24 = tpu.concatenate %22, %23 in 1 : vector<10x1x4xbf16>, vector<10x15x4xbf16> -> vector<10x16x4xbf16>
    %25 = vector.extract_strided_slice %21 {offsets = [0, 1, 0], sizes = [10, 15, 4], strides = [1, 1, 1]} : vector<10x16x4xbf16> to vector<10x15x4xbf16>
    %26 = tpu.concatenate %25, %22 in 1 : vector<10x15x4xbf16>, vector<10x1x4xbf16> -> vector<10x16x4xbf16>
    %cst_13 = arith.constant 0.000000e+00 : f32
    %27 = vector.broadcast %cst_13 : f32 to vector<128x8xf32>
    %28 = vector.extract_strided_slice %24 {offsets = [0, 0, 0], sizes = [8, 16, 4], strides = [1, 1, 1]} : vector<10x16x4xbf16> to vector<8x16x4xbf16>
    %29 = vector.shape_cast %28 : vector<8x16x4xbf16> to vector<128x4xbf16>
    %c0_14 = arith.constant 0 : index
    %c0_15 = arith.constant 0 : index
    %c0_16 = arith.constant 0 : index
    %30 = vector.load %arg7[%c0_14, %c0_15, %c0_16] : memref<9x4x8xbf16, #tpu.memory_space<vmem>>, vector<1x4x8xbf16>
    %31 = vector.shape_cast %30 : vector<1x4x8xbf16> to vector<4x8xbf16>
    %cst_17 = arith.constant dense<0.000000e+00> : vector<128x8xf32>
    %32 = tpu.matmul %29, %31, %cst_17 {dimension_numbers = #tpu.dot_dimension_numbers<[1], [0], [0], [1], [0, 0, 1, 1], [], []>} : vector<128x4xbf16>, vector<4x8xbf16>, vector<128x8xf32> -> vector<128x8xf32>
    %33 = arith.addf %27, %32 : vector<128x8xf32>
    %34 = vector.extract_strided_slice %24 {offsets = [1, 0, 0], sizes = [8, 16, 4], strides = [1, 1, 1]} : vector<10x16x4xbf16> to vector<8x16x4xbf16>
    %35 = vector.shape_cast %34 : vector<8x16x4xbf16> to vector<128x4xbf16>
    %c3 = arith.constant 3 : index
    %c0_18 = arith.constant 0 : index
    %c0_19 = arith.constant 0 : index
    %36 = vector.load %arg7[%c3, %c0_18, %c0_19] : memref<9x4x8xbf16, #tpu.memory_space<vmem>>, vector<1x4x8xbf16>
    %37 = vector.shape_cast %36 : vector<1x4x8xbf16> to vector<4x8xbf16>
    %cst_20 = arith.constant dense<0.000000e+00> : vector<128x8xf32>
    %38 = tpu.matmul %35, %37, %cst_20 {dimension_numbers = #tpu.dot_dimension_numbers<[1], [0], [0], [1], [0, 0, 1, 1], [], []>} : vector<128x4xbf16>, vector<4x8xbf16>, vector<128x8xf32> -> vector<128x8xf32>
    %39 = arith.addf %33, %38 : vector<128x8xf32>
    %40 = vector.extract_strided_slice %24 {offsets = [2, 0, 0], sizes = [8, 16, 4], strides = [1, 1, 1]} : vector<10x16x4xbf16> to vector<8x16x4xbf16>
    %41 = vector.shape_cast %40 : vector<8x16x4xbf16> to vector<128x4xbf16>
    %c6 = arith.constant 6 : index
    %c0_21 = arith.constant 0 : index
    %c0_22 = arith.constant 0 : index
    %42 = vector.load %arg7[%c6, %c0_21, %c0_22] : memref<9x4x8xbf16, #tpu.memory_space<vmem>>, vector<1x4x8xbf16>
    %43 = vector.shape_cast %42 : vector<1x4x8xbf16> to vector<4x8xbf16>
    %cst_23 = arith.constant dense<0.000000e+00> : vector<128x8xf32>
    %44 = tpu.matmul %41, %43, %cst_23 {dimension_numbers = #tpu.dot_dimension_numbers<[1], [0], [0], [1], [0, 0, 1, 1], [], []>} : vector<128x4xbf16>, vector<4x8xbf16>, vector<128x8xf32> -> vector<128x8xf32>
    %45 = arith.addf %39, %44 : vector<128x8xf32>
    %46 = vector.extract_strided_slice %21 {offsets = [0, 0, 0], sizes = [8, 16, 4], strides = [1, 1, 1]} : vector<10x16x4xbf16> to vector<8x16x4xbf16>
    %47 = vector.shape_cast %46 : vector<8x16x4xbf16> to vector<128x4xbf16>
    %c1 = arith.constant 1 : index
    %c0_24 = arith.constant 0 : index
    %c0_25 = arith.constant 0 : index
    %48 = vector.load %arg7[%c1, %c0_24, %c0_25] : memref<9x4x8xbf16, #tpu.memory_space<vmem>>, vector<1x4x8xbf16>
    %49 = vector.shape_cast %48 : vector<1x4x8xbf16> to vector<4x8xbf16>
    %cst_26 = arith.constant dense<0.000000e+00> : vector<128x8xf32>
    %50 = tpu.matmul %47, %49, %cst_26 {dimension_numbers = #tpu.dot_dimension_numbers<[1], [0], [0], [1], [0, 0, 1, 1], [], []>} : vector<128x4xbf16>, vector<4x8xbf16>, vector<128x8xf32> -> vector<128x8xf32>
    %51 = arith.addf %45, %50 : vector<128x8xf32>
    %52 = vector.extract_strided_slice %21 {offsets = [1, 0, 0], sizes = [8, 16, 4], strides = [1, 1, 1]} : vector<10x16x4xbf16> to vector<8x16x4xbf16>
    %53 = vector.shape_cast %52 : vector<8x16x4xbf16> to vector<128x4xbf16>
    %c4 = arith.constant 4 : index
    %c0_27 = arith.constant 0 : index
    %c0_28 = arith.constant 0 : index
    %54 = vector.load %arg7[%c4, %c0_27, %c0_28] : memref<9x4x8xbf16, #tpu.memory_space<vmem>>, vector<1x4x8xbf16>
    %55 = vector.shape_cast %54 : vector<1x4x8xbf16> to vector<4x8xbf16>
    %cst_29 = arith.constant dense<0.000000e+00> : vector<128x8xf32>
    %56 = tpu.matmul %53, %55, %cst_29 {dimension_numbers = #tpu.dot_dimension_numbers<[1], [0], [0], [1], [0, 0, 1, 1], [], []>} : vector<128x4xbf16>, vector<4x8xbf16>, vector<128x8xf32> -> vector<128x8xf32>
    %57 = arith.addf %51, %56 : vector<128x8xf32>
    %58 = vector.extract_strided_slice %21 {offsets = [2, 0, 0], sizes = [8, 16, 4], strides = [1, 1, 1]} : vector<10x16x4xbf16> to vector<8x16x4xbf16>
    %59 = vector.shape_cast %58 : vector<8x16x4xbf16> to vector<128x4xbf16>
    %c7 = arith.constant 7 : index
    %c0_30 = arith.constant 0 : index
    %c0_31 = arith.constant 0 : index
    %60 = vector.load %arg7[%c7, %c0_30, %c0_31] : memref<9x4x8xbf16, #tpu.memory_space<vmem>>, vector<1x4x8xbf16>
    %61 = vector.shape_cast %60 : vector<1x4x8xbf16> to vector<4x8xbf16>
    %cst_32 = arith.constant dense<0.000000e+00> : vector<128x8xf32>
    %62 = tpu.matmul %59, %61, %cst_32 {dimension_numbers = #tpu.dot_dimension_numbers<[1], [0], [0], [1], [0, 0, 1, 1], [], []>} : vector<128x4xbf16>, vector<4x8xbf16>, vector<128x8xf32> -> vector<128x8xf32>
    %63 = arith.addf %57, %62 : vector<128x8xf32>
    %64 = vector.extract_strided_slice %26 {offsets = [0, 0, 0], sizes = [8, 16, 4], strides = [1, 1, 1]} : vector<10x16x4xbf16> to vector<8x16x4xbf16>
    %65 = vector.shape_cast %64 : vector<8x16x4xbf16> to vector<128x4xbf16>
    %c2 = arith.constant 2 : index
    %c0_33 = arith.constant 0 : index
    %c0_34 = arith.constant 0 : index
    %66 = vector.load %arg7[%c2, %c0_33, %c0_34] : memref<9x4x8xbf16, #tpu.memory_space<vmem>>, vector<1x4x8xbf16>
    %67 = vector.shape_cast %66 : vector<1x4x8xbf16> to vector<4x8xbf16>
    %cst_35 = arith.constant dense<0.000000e+00> : vector<128x8xf32>
    %68 = tpu.matmul %65, %67, %cst_35 {dimension_numbers = #tpu.dot_dimension_numbers<[1], [0], [0], [1], [0, 0, 1, 1], [], []>} : vector<128x4xbf16>, vector<4x8xbf16>, vector<128x8xf32> -> vector<128x8xf32>
    %69 = arith.addf %63, %68 : vector<128x8xf32>
    %70 = vector.extract_strided_slice %26 {offsets = [1, 0, 0], sizes = [8, 16, 4], strides = [1, 1, 1]} : vector<10x16x4xbf16> to vector<8x16x4xbf16>
    %71 = vector.shape_cast %70 : vector<8x16x4xbf16> to vector<128x4xbf16>
    %c5 = arith.constant 5 : index
    %c0_36 = arith.constant 0 : index
    %c0_37 = arith.constant 0 : index
    %72 = vector.load %arg7[%c5, %c0_36, %c0_37] : memref<9x4x8xbf16, #tpu.memory_space<vmem>>, vector<1x4x8xbf16>
    %73 = vector.shape_cast %72 : vector<1x4x8xbf16> to vector<4x8xbf16>
    %cst_38 = arith.constant dense<0.000000e+00> : vector<128x8xf32>
    %74 = tpu.matmul %71, %73, %cst_38 {dimension_numbers = #tpu.dot_dimension_numbers<[1], [0], [0], [1], [0, 0, 1, 1], [], []>} : vector<128x4xbf16>, vector<4x8xbf16>, vector<128x8xf32> -> vector<128x8xf32>
    %75 = arith.addf %69, %74 : vector<128x8xf32>
    %76 = vector.extract_strided_slice %26 {offsets = [2, 0, 0], sizes = [8, 16, 4], strides = [1, 1, 1]} : vector<10x16x4xbf16> to vector<8x16x4xbf16>
    %77 = vector.shape_cast %76 : vector<8x16x4xbf16> to vector<128x4xbf16>
    %c8 = arith.constant 8 : index
    %c0_39 = arith.constant 0 : index
    %c0_40 = arith.constant 0 : index
    %78 = vector.load %arg7[%c8, %c0_39, %c0_40] : memref<9x4x8xbf16, #tpu.memory_space<vmem>>, vector<1x4x8xbf16>
    %79 = vector.shape_cast %78 : vector<1x4x8xbf16> to vector<4x8xbf16>
    %cst_41 = arith.constant dense<0.000000e+00> : vector<128x8xf32>
    %80 = tpu.matmul %77, %79, %cst_41 {dimension_numbers = #tpu.dot_dimension_numbers<[1], [0], [0], [1], [0, 0, 1, 1], [], []>} : vector<128x4xbf16>, vector<4x8xbf16>, vector<128x8xf32> -> vector<128x8xf32>
    %81 = arith.addf %75, %80 : vector<128x8xf32>
    %c0_42 = arith.constant 0 : index
    %c0_43 = arith.constant 0 : index
    %82 = vector.load %arg8[%c0_42, %c0_43] : memref<1x8xf32, #tpu.memory_space<vmem>>, vector<1x8xf32>
    %83 = vector.shape_cast %82 : vector<1x8xf32> to vector<8xf32>
    %84 = vector.shape_cast %83 : vector<8xf32> to vector<1x8xf32>
    %85 = vector.broadcast %84 : vector<1x8xf32> to vector<128x8xf32>
    %86 = arith.addf %81, %85 : vector<128x8xf32>
    %87 = vector.shape_cast %86 : vector<128x8xf32> to vector<1x8x16x8xf32>
    %88 = arith.truncf %87 : vector<1x8x16x8xf32> to vector<1x8x16x8xbf16>
    %c0_44 = arith.constant 0 : index
    %c0_45 = arith.constant 0 : index
    %c0_46 = arith.constant 0 : index
    %c0_47 = arith.constant 0 : index
    %89 = vector.load %arg9[%c0_44, %c0_45, %c0_46, %c0_47] : memref<1x8x16x8xbf16, #tpu.memory_space<vmem>>, vector<1x8x16x8xbf16>
    tpu.vector_store %arg9[%c0_44, %c0_45, %c0_46, %c0_47], %88 {strides = array<i32>} : memref<1x8x16x8xbf16, #tpu.memory_space<vmem>>, vector<1x8x16x8xbf16>,
    %cst_48 = arith.constant dense<0.000000e+00> : vector<8xf32>
    %90 = vector.multi_reduction <add>, %86, %cst_48 [0] : vector<128x8xf32> to vector<8xf32>
    %91 = vector.shape_cast %90 : vector<8xf32> to vector<1x1x1x8xf32>
    %c0_49 = arith.constant 0 : index
    %c0_50 = arith.constant 0 : index
    %c0_51 = arith.constant 0 : index
    %c0_52 = arith.constant 0 : index
    %92 = vector.load %arg10[%c0_49, %c0_50, %c0_51, %c0_52] : memref<1x1x1x8xf32, #tpu.memory_space<vmem>>, vector<1x1x1x8xf32>
    tpu.vector_store %arg10[%c0_49, %c0_50, %c0_51, %c0_52], %91 {strides = array<i32>} : memref<1x1x1x8xf32, #tpu.memory_space<vmem>>, vector<1x1x1x8xf32>,
    %93 = arith.mulf %86, %86 : vector<128x8xf32>
    %cst_53 = arith.constant dense<0.000000e+00> : vector<8xf32>
    %94 = vector.multi_reduction <add>, %93, %cst_53 [0] : vector<128x8xf32> to vector<8xf32>
    %95 = vector.shape_cast %94 : vector<8xf32> to vector<1x1x1x8xf32>
    %c0_54 = arith.constant 0 : index
    %c0_55 = arith.constant 0 : index
    %c0_56 = arith.constant 0 : index
    %c0_57 = arith.constant 0 : index
    %96 = vector.load %arg11[%c0_54, %c0_55, %c0_56, %c0_57] : memref<1x1x1x8xf32, #tpu.memory_space<vmem>>, vector<1x1x1x8xf32>
    tpu.vector_store %arg11[%c0_54, %c0_55, %c0_56, %c0_57], %95 {strides = array<i32>} : memref<1x1x1x8xf32, #tpu.memory_space<vmem>>, vector<1x1x1x8xf32>,
    return
  }
  func.func @transform_0(%arg0: i32, %arg1: i32) -> (i32, i32, i32, i32) {
    %c0_i32 = arith.constant 0 : i32
    %c0_i32_0 = arith.constant 0 : i32
    %c0_i32_1 = arith.constant 0 : i32
    return %arg0, %arg1, %c0_i32, %c0_i32_0 : i32, i32, i32, i32
  }
  func.func @transform_1(%arg0: i32, %arg1: i32) -> (i32, i32, i32, i32) {
    %c8_i32 = arith.constant 8 : i32
    %0 = arith.muli %arg1, %c8_i32 : i32
    %c1_i32 = arith.constant 1 : i32
    %1 = arith.subi %0, %c1_i32 : i32
    %c0_i32 = arith.constant 0 : i32
    %2 = arith.maxsi %1, %c0_i32 : i32
    %c0_i32_0 = arith.constant 0 : i32
    %c0_i32_1 = arith.constant 0 : i32
    %c0_i32_2 = arith.constant 0 : i32
    return %arg0, %2, %c0_i32_0, %c0_i32_1 : i32, i32, i32, i32
  }
  func.func @transform_2(%arg0: i32, %arg1: i32) -> (i32, i32, i32, i32) {
    %c1_i32 = arith.constant 1 : i32
    %0 = arith.addi %arg1, %c1_i32 : i32
    %c8_i32 = arith.constant 8 : i32
    %1 = arith.muli %0, %c8_i32 : i32
    %c15_i32 = arith.constant 15 : i32
    %2 = arith.minsi %1, %c15_i32 : i32
    %c0_i32 = arith.constant 0 : i32
    %c0_i32_0 = arith.constant 0 : i32
    %c0_i32_1 = arith.constant 0 : i32
    return %arg0, %2, %c0_i32, %c0_i32_0 : i32, i32, i32, i32
  }
  func.func @transform_3(%arg0: i32, %arg1: i32) -> (i32, i32) {
    %c0_i32 = arith.constant 0 : i32
    %c0_i32_0 = arith.constant 0 : i32
    %c0_i32_1 = arith.constant 0 : i32
    return %c0_i32, %c0_i32_0 : i32, i32
  }
  func.func @transform_4(%arg0: i32, %arg1: i32) -> (i32, i32) {
    %c0_i32 = arith.constant 0 : i32
    %c0_i32_0 = arith.constant 0 : i32
    %c0_i32_1 = arith.constant 0 : i32
    return %c0_i32, %c0_i32_0 : i32, i32
  }
  func.func @transform_5(%arg0: i32, %arg1: i32) -> (i32, i32, i32) {
    %c0_i32 = arith.constant 0 : i32
    %c0_i32_0 = arith.constant 0 : i32
    %c0_i32_1 = arith.constant 0 : i32
    %c0_i32_2 = arith.constant 0 : i32
    return %c0_i32, %c0_i32_0, %c0_i32_1 : i32, i32, i32
  }
  func.func @transform_6(%arg0: i32, %arg1: i32) -> (i32, i32) {
    %c0_i32 = arith.constant 0 : i32
    %c0_i32_0 = arith.constant 0 : i32
    %c0_i32_1 = arith.constant 0 : i32
    return %c0_i32, %c0_i32_0 : i32, i32
  }
  func.func @transform_7(%arg0: i32, %arg1: i32) -> (i32, i32, i32, i32) {
    %c0_i32 = arith.constant 0 : i32
    %c0_i32_0 = arith.constant 0 : i32
    %c0_i32_1 = arith.constant 0 : i32
    return %arg0, %arg1, %c0_i32, %c0_i32_0 : i32, i32, i32, i32
  }
  func.func @transform_8(%arg0: i32, %arg1: i32) -> (i32, i32, i32, i32) {
    %c0_i32 = arith.constant 0 : i32
    %c0_i32_0 = arith.constant 0 : i32
    %c0_i32_1 = arith.constant 0 : i32
    return %arg0, %arg1, %c0_i32, %c0_i32_0 : i32, i32, i32, i32
  }
  func.func @transform_9(%arg0: i32, %arg1: i32) -> (i32, i32, i32, i32) {
    %c0_i32 = arith.constant 0 : i32
    %c0_i32_0 = arith.constant 0 : i32
    %c0_i32_1 = arith.constant 0 : i32
    return %arg0, %arg1, %c0_i32, %c0_i32_0 : i32, i32, i32, i32
  }
}

module attributes {stable_mosaic.version = 11 : i64} {
  func.func @_conv3x3_kernel(%arg0: i32, %arg1: i32, %arg2: memref<1x8x16x8xbf16, #tpu.memory_space<vmem>>, %arg3: memref<1x1x16x8xbf16, #tpu.memory_space<vmem>>, %arg4: memref<1x1x16x8xbf16, #tpu.memory_space<vmem>>, %arg5: memref<1x8xf32, #tpu.memory_space<vmem>>, %arg6: memref<1x8xf32, #tpu.memory_space<vmem>>, %arg7: memref<9x8x8xbf16, #tpu.memory_space<vmem>>, %arg8: memref<1x8xf32, #tpu.memory_space<vmem>>, %arg9: memref<1x8x16x8xbf16, #tpu.memory_space<vmem>>, %arg10: memref<1x1x1x8xf32, #tpu.memory_space<vmem>>, %arg11: memref<1x1x1x8xf32, #tpu.memory_space<vmem>>) attributes {dimension_semantics = [#tpu.dimension_semantics<parallel>, #tpu.dimension_semantics<parallel>], iteration_bounds = array<i64: 2, 2>, scalar_prefetch = 0 : i64, scratch_operands = 0 : i64, tpu.core_type = #tpu.core_type<tc>, window_params = [{transform_indices = @transform_0, window_bounds = array<i64: 1, 8, 16, 8>}, {transform_indices = @transform_1, window_bounds = array<i64: 1, 1, 16, 8>}, {transform_indices = @transform_2, window_bounds = array<i64: 1, 1, 16, 8>}, {pipeline_mode = #tpu.pipeline_mode<synchronous>, transform_indices = @transform_3, window_bounds = array<i64: 1, 8>}, {pipeline_mode = #tpu.pipeline_mode<synchronous>, transform_indices = @transform_4, window_bounds = array<i64: 1, 8>}, {pipeline_mode = #tpu.pipeline_mode<synchronous>, transform_indices = @transform_5, window_bounds = array<i64: 9, 8, 8>}, {pipeline_mode = #tpu.pipeline_mode<synchronous>, transform_indices = @transform_6, window_bounds = array<i64: 1, 8>}, {transform_indices = @transform_7, window_bounds = array<i64: 1, 8, 16, 8>}, {transform_indices = @transform_8, window_bounds = array<i64: 1, 1, 1, 8>}, {transform_indices = @transform_9, window_bounds = array<i64: 1, 1, 1, 8>}]} {
    %c0 = arith.constant 0 : index
    %c0_0 = arith.constant 0 : index
    %c0_1 = arith.constant 0 : index
    %c0_2 = arith.constant 0 : index
    %0 = vector.load %arg3[%c0, %c0_0, %c0_1, %c0_2] : memref<1x1x16x8xbf16, #tpu.memory_space<vmem>>, vector<1x1x16x8xbf16>
    %1 = vector.shape_cast %0 : vector<1x1x16x8xbf16> to vector<1x16x8xbf16>
    %c0_3 = arith.constant 0 : index
    %c0_4 = arith.constant 0 : index
    %c0_5 = arith.constant 0 : index
    %c0_6 = arith.constant 0 : index
    %2 = vector.load %arg2[%c0_3, %c0_4, %c0_5, %c0_6] : memref<1x8x16x8xbf16, #tpu.memory_space<vmem>>, vector<1x8x16x8xbf16>
    %3 = vector.shape_cast %2 : vector<1x8x16x8xbf16> to vector<8x16x8xbf16>
    %c0_7 = arith.constant 0 : index
    %c0_8 = arith.constant 0 : index
    %c0_9 = arith.constant 0 : index
    %c0_10 = arith.constant 0 : index
    %4 = vector.load %arg4[%c0_7, %c0_8, %c0_9, %c0_10] : memref<1x1x16x8xbf16, #tpu.memory_space<vmem>>, vector<1x1x16x8xbf16>
    %5 = vector.shape_cast %4 : vector<1x1x16x8xbf16> to vector<1x16x8xbf16>
    %6 = tpu.concatenate %1, %3, %5 in 0 : vector<1x16x8xbf16>, vector<8x16x8xbf16>, vector<1x16x8xbf16> -> vector<10x16x8xbf16>
    %7 = arith.extf %6 : vector<10x16x8xbf16> to vector<10x16x8xf32>
    %c0_11 = arith.constant 0 : index
    %c0_12 = arith.constant 0 : index
    %8 = vector.load %arg5[%c0_11, %c0_12] : memref<1x8xf32, #tpu.memory_space<vmem>>, vector<1x8xf32>
    %9 = vector.shape_cast %8 : vector<1x8xf32> to vector<8xf32>
    %10 = vector.shape_cast %9 : vector<8xf32> to vector<1x1x8xf32>
    %11 = vector.broadcast %10 : vector<1x1x8xf32> to vector<10x16x8xf32>
    %12 = arith.mulf %7, %11 : vector<10x16x8xf32>
    %c0_13 = arith.constant 0 : index
    %c0_14 = arith.constant 0 : index
    %13 = vector.load %arg6[%c0_13, %c0_14] : memref<1x8xf32, #tpu.memory_space<vmem>>, vector<1x8xf32>
    %14 = vector.shape_cast %13 : vector<1x8xf32> to vector<8xf32>
    %15 = vector.shape_cast %14 : vector<8xf32> to vector<1x1x8xf32>
    %16 = vector.broadcast %15 : vector<1x1x8xf32> to vector<10x16x8xf32>
    %17 = arith.addf %12, %16 : vector<10x16x8xf32>
    %cst = arith.constant 0.000000e+00 : f32
    %18 = vector.broadcast %cst : f32 to vector<10x16x8xf32>
    %19 = arith.maximumf %17, %18 : vector<10x16x8xf32>
    %20 = arith.truncf %19 : vector<10x16x8xf32> to vector<10x16x8xbf16>
    %c0_i32 = arith.constant 0 : i32
    %21 = arith.cmpi eq, %arg1, %c0_i32 : i32
    %22 = arith.extui %21 : i1 to i32
    %c-1_i32 = arith.constant -1 : i32
    %23 = arith.addi %c-1_i32, %22 : i32
    %c1_i32 = arith.constant 1 : i32
    %24 = arith.cmpi eq, %arg1, %c1_i32 : i32
    %25 = arith.extui %24 : i1 to i32
    %c10_i32 = arith.constant 10 : i32
    %26 = arith.muli %25, %c10_i32 : i32
    %c-1_i32_15 = arith.constant -1 : i32
    %27 = arith.addi %c-1_i32_15, %26 : i32
    %28 = tpu.iota {dimensions = array<i32: 0>} : vector<10x16x8xi32>
    %29 = vector.broadcast %23 : i32 to vector<10x16x8xi32>
    %30 = arith.cmpi ne, %28, %29 : vector<10x16x8xi32>
    %31 = vector.broadcast %27 : i32 to vector<10x16x8xi32>
    %32 = arith.cmpi ne, %28, %31 : vector<10x16x8xi32>
    %33 = arith.andi %30, %32 : vector<10x16x8xi1>
    %cst_16 = arith.constant 0.000000e+00 : bf16
    %34 = vector.broadcast %cst_16 : bf16 to vector<10x16x8xbf16>
    %35 = arith.select %33, %20, %34 : vector<10x16x8xi1>, vector<10x16x8xbf16>
    %cst_17 = arith.constant 0.000000e+00 : bf16
    %36 = vector.broadcast %cst_17 : bf16 to vector<10x1x8xbf16>
    %37 = vector.extract_strided_slice %35 {offsets = [0, 0, 0], sizes = [10, 15, 8], strides = [1, 1, 1]} : vector<10x16x8xbf16> to vector<10x15x8xbf16>
    %38 = tpu.concatenate %36, %37 in 1 : vector<10x1x8xbf16>, vector<10x15x8xbf16> -> vector<10x16x8xbf16>
    %39 = vector.extract_strided_slice %35 {offsets = [0, 1, 0], sizes = [10, 15, 8], strides = [1, 1, 1]} : vector<10x16x8xbf16> to vector<10x15x8xbf16>
    %40 = tpu.concatenate %39, %36 in 1 : vector<10x15x8xbf16>, vector<10x1x8xbf16> -> vector<10x16x8xbf16>
    %cst_18 = arith.constant 0.000000e+00 : f32
    %41 = vector.broadcast %cst_18 : f32 to vector<128x8xf32>
    %42 = vector.extract_strided_slice %38 {offsets = [0, 0, 0], sizes = [8, 16, 8], strides = [1, 1, 1]} : vector<10x16x8xbf16> to vector<8x16x8xbf16>
    %43 = vector.shape_cast %42 : vector<8x16x8xbf16> to vector<128x8xbf16>
    %c0_19 = arith.constant 0 : index
    %c0_20 = arith.constant 0 : index
    %c0_21 = arith.constant 0 : index
    %44 = vector.load %arg7[%c0_19, %c0_20, %c0_21] : memref<9x8x8xbf16, #tpu.memory_space<vmem>>, vector<1x8x8xbf16>
    %45 = vector.shape_cast %44 : vector<1x8x8xbf16> to vector<8x8xbf16>
    %cst_22 = arith.constant dense<0.000000e+00> : vector<128x8xf32>
    %46 = tpu.matmul %43, %45, %cst_22 {dimension_numbers = #tpu.dot_dimension_numbers<[1], [0], [0], [1], [0, 0, 1, 1], [], []>} : vector<128x8xbf16>, vector<8x8xbf16>, vector<128x8xf32> -> vector<128x8xf32>
    %47 = arith.addf %41, %46 : vector<128x8xf32>
    %48 = vector.extract_strided_slice %38 {offsets = [1, 0, 0], sizes = [8, 16, 8], strides = [1, 1, 1]} : vector<10x16x8xbf16> to vector<8x16x8xbf16>
    %49 = vector.shape_cast %48 : vector<8x16x8xbf16> to vector<128x8xbf16>
    %c3 = arith.constant 3 : index
    %c0_23 = arith.constant 0 : index
    %c0_24 = arith.constant 0 : index
    %50 = vector.load %arg7[%c3, %c0_23, %c0_24] : memref<9x8x8xbf16, #tpu.memory_space<vmem>>, vector<1x8x8xbf16>
    %51 = vector.shape_cast %50 : vector<1x8x8xbf16> to vector<8x8xbf16>
    %cst_25 = arith.constant dense<0.000000e+00> : vector<128x8xf32>
    %52 = tpu.matmul %49, %51, %cst_25 {dimension_numbers = #tpu.dot_dimension_numbers<[1], [0], [0], [1], [0, 0, 1, 1], [], []>} : vector<128x8xbf16>, vector<8x8xbf16>, vector<128x8xf32> -> vector<128x8xf32>
    %53 = arith.addf %47, %52 : vector<128x8xf32>
    %54 = vector.extract_strided_slice %38 {offsets = [2, 0, 0], sizes = [8, 16, 8], strides = [1, 1, 1]} : vector<10x16x8xbf16> to vector<8x16x8xbf16>
    %55 = vector.shape_cast %54 : vector<8x16x8xbf16> to vector<128x8xbf16>
    %c6 = arith.constant 6 : index
    %c0_26 = arith.constant 0 : index
    %c0_27 = arith.constant 0 : index
    %56 = vector.load %arg7[%c6, %c0_26, %c0_27] : memref<9x8x8xbf16, #tpu.memory_space<vmem>>, vector<1x8x8xbf16>
    %57 = vector.shape_cast %56 : vector<1x8x8xbf16> to vector<8x8xbf16>
    %cst_28 = arith.constant dense<0.000000e+00> : vector<128x8xf32>
    %58 = tpu.matmul %55, %57, %cst_28 {dimension_numbers = #tpu.dot_dimension_numbers<[1], [0], [0], [1], [0, 0, 1, 1], [], []>} : vector<128x8xbf16>, vector<8x8xbf16>, vector<128x8xf32> -> vector<128x8xf32>
    %59 = arith.addf %53, %58 : vector<128x8xf32>
    %60 = vector.extract_strided_slice %35 {offsets = [0, 0, 0], sizes = [8, 16, 8], strides = [1, 1, 1]} : vector<10x16x8xbf16> to vector<8x16x8xbf16>
    %61 = vector.shape_cast %60 : vector<8x16x8xbf16> to vector<128x8xbf16>
    %c1 = arith.constant 1 : index
    %c0_29 = arith.constant 0 : index
    %c0_30 = arith.constant 0 : index
    %62 = vector.load %arg7[%c1, %c0_29, %c0_30] : memref<9x8x8xbf16, #tpu.memory_space<vmem>>, vector<1x8x8xbf16>
    %63 = vector.shape_cast %62 : vector<1x8x8xbf16> to vector<8x8xbf16>
    %cst_31 = arith.constant dense<0.000000e+00> : vector<128x8xf32>
    %64 = tpu.matmul %61, %63, %cst_31 {dimension_numbers = #tpu.dot_dimension_numbers<[1], [0], [0], [1], [0, 0, 1, 1], [], []>} : vector<128x8xbf16>, vector<8x8xbf16>, vector<128x8xf32> -> vector<128x8xf32>
    %65 = arith.addf %59, %64 : vector<128x8xf32>
    %66 = vector.extract_strided_slice %35 {offsets = [1, 0, 0], sizes = [8, 16, 8], strides = [1, 1, 1]} : vector<10x16x8xbf16> to vector<8x16x8xbf16>
    %67 = vector.shape_cast %66 : vector<8x16x8xbf16> to vector<128x8xbf16>
    %c4 = arith.constant 4 : index
    %c0_32 = arith.constant 0 : index
    %c0_33 = arith.constant 0 : index
    %68 = vector.load %arg7[%c4, %c0_32, %c0_33] : memref<9x8x8xbf16, #tpu.memory_space<vmem>>, vector<1x8x8xbf16>
    %69 = vector.shape_cast %68 : vector<1x8x8xbf16> to vector<8x8xbf16>
    %cst_34 = arith.constant dense<0.000000e+00> : vector<128x8xf32>
    %70 = tpu.matmul %67, %69, %cst_34 {dimension_numbers = #tpu.dot_dimension_numbers<[1], [0], [0], [1], [0, 0, 1, 1], [], []>} : vector<128x8xbf16>, vector<8x8xbf16>, vector<128x8xf32> -> vector<128x8xf32>
    %71 = arith.addf %65, %70 : vector<128x8xf32>
    %72 = vector.extract_strided_slice %35 {offsets = [2, 0, 0], sizes = [8, 16, 8], strides = [1, 1, 1]} : vector<10x16x8xbf16> to vector<8x16x8xbf16>
    %73 = vector.shape_cast %72 : vector<8x16x8xbf16> to vector<128x8xbf16>
    %c7 = arith.constant 7 : index
    %c0_35 = arith.constant 0 : index
    %c0_36 = arith.constant 0 : index
    %74 = vector.load %arg7[%c7, %c0_35, %c0_36] : memref<9x8x8xbf16, #tpu.memory_space<vmem>>, vector<1x8x8xbf16>
    %75 = vector.shape_cast %74 : vector<1x8x8xbf16> to vector<8x8xbf16>
    %cst_37 = arith.constant dense<0.000000e+00> : vector<128x8xf32>
    %76 = tpu.matmul %73, %75, %cst_37 {dimension_numbers = #tpu.dot_dimension_numbers<[1], [0], [0], [1], [0, 0, 1, 1], [], []>} : vector<128x8xbf16>, vector<8x8xbf16>, vector<128x8xf32> -> vector<128x8xf32>
    %77 = arith.addf %71, %76 : vector<128x8xf32>
    %78 = vector.extract_strided_slice %40 {offsets = [0, 0, 0], sizes = [8, 16, 8], strides = [1, 1, 1]} : vector<10x16x8xbf16> to vector<8x16x8xbf16>
    %79 = vector.shape_cast %78 : vector<8x16x8xbf16> to vector<128x8xbf16>
    %c2 = arith.constant 2 : index
    %c0_38 = arith.constant 0 : index
    %c0_39 = arith.constant 0 : index
    %80 = vector.load %arg7[%c2, %c0_38, %c0_39] : memref<9x8x8xbf16, #tpu.memory_space<vmem>>, vector<1x8x8xbf16>
    %81 = vector.shape_cast %80 : vector<1x8x8xbf16> to vector<8x8xbf16>
    %cst_40 = arith.constant dense<0.000000e+00> : vector<128x8xf32>
    %82 = tpu.matmul %79, %81, %cst_40 {dimension_numbers = #tpu.dot_dimension_numbers<[1], [0], [0], [1], [0, 0, 1, 1], [], []>} : vector<128x8xbf16>, vector<8x8xbf16>, vector<128x8xf32> -> vector<128x8xf32>
    %83 = arith.addf %77, %82 : vector<128x8xf32>
    %84 = vector.extract_strided_slice %40 {offsets = [1, 0, 0], sizes = [8, 16, 8], strides = [1, 1, 1]} : vector<10x16x8xbf16> to vector<8x16x8xbf16>
    %85 = vector.shape_cast %84 : vector<8x16x8xbf16> to vector<128x8xbf16>
    %c5 = arith.constant 5 : index
    %c0_41 = arith.constant 0 : index
    %c0_42 = arith.constant 0 : index
    %86 = vector.load %arg7[%c5, %c0_41, %c0_42] : memref<9x8x8xbf16, #tpu.memory_space<vmem>>, vector<1x8x8xbf16>
    %87 = vector.shape_cast %86 : vector<1x8x8xbf16> to vector<8x8xbf16>
    %cst_43 = arith.constant dense<0.000000e+00> : vector<128x8xf32>
    %88 = tpu.matmul %85, %87, %cst_43 {dimension_numbers = #tpu.dot_dimension_numbers<[1], [0], [0], [1], [0, 0, 1, 1], [], []>} : vector<128x8xbf16>, vector<8x8xbf16>, vector<128x8xf32> -> vector<128x8xf32>
    %89 = arith.addf %83, %88 : vector<128x8xf32>
    %90 = vector.extract_strided_slice %40 {offsets = [2, 0, 0], sizes = [8, 16, 8], strides = [1, 1, 1]} : vector<10x16x8xbf16> to vector<8x16x8xbf16>
    %91 = vector.shape_cast %90 : vector<8x16x8xbf16> to vector<128x8xbf16>
    %c8 = arith.constant 8 : index
    %c0_44 = arith.constant 0 : index
    %c0_45 = arith.constant 0 : index
    %92 = vector.load %arg7[%c8, %c0_44, %c0_45] : memref<9x8x8xbf16, #tpu.memory_space<vmem>>, vector<1x8x8xbf16>
    %93 = vector.shape_cast %92 : vector<1x8x8xbf16> to vector<8x8xbf16>
    %cst_46 = arith.constant dense<0.000000e+00> : vector<128x8xf32>
    %94 = tpu.matmul %91, %93, %cst_46 {dimension_numbers = #tpu.dot_dimension_numbers<[1], [0], [0], [1], [0, 0, 1, 1], [], []>} : vector<128x8xbf16>, vector<8x8xbf16>, vector<128x8xf32> -> vector<128x8xf32>
    %95 = arith.addf %89, %94 : vector<128x8xf32>
    %c0_47 = arith.constant 0 : index
    %c0_48 = arith.constant 0 : index
    %96 = vector.load %arg8[%c0_47, %c0_48] : memref<1x8xf32, #tpu.memory_space<vmem>>, vector<1x8xf32>
    %97 = vector.shape_cast %96 : vector<1x8xf32> to vector<8xf32>
    %98 = vector.shape_cast %97 : vector<8xf32> to vector<1x8xf32>
    %99 = vector.broadcast %98 : vector<1x8xf32> to vector<128x8xf32>
    %100 = arith.addf %95, %99 : vector<128x8xf32>
    %101 = vector.shape_cast %100 : vector<128x8xf32> to vector<1x8x16x8xf32>
    %102 = arith.truncf %101 : vector<1x8x16x8xf32> to vector<1x8x16x8xbf16>
    %c0_49 = arith.constant 0 : index
    %c0_50 = arith.constant 0 : index
    %c0_51 = arith.constant 0 : index
    %c0_52 = arith.constant 0 : index
    %103 = vector.load %arg9[%c0_49, %c0_50, %c0_51, %c0_52] : memref<1x8x16x8xbf16, #tpu.memory_space<vmem>>, vector<1x8x16x8xbf16>
    tpu.vector_store %arg9[%c0_49, %c0_50, %c0_51, %c0_52], %102 {strides = array<i32>} : memref<1x8x16x8xbf16, #tpu.memory_space<vmem>>, vector<1x8x16x8xbf16>,
    %cst_53 = arith.constant dense<0.000000e+00> : vector<8xf32>
    %104 = vector.multi_reduction <add>, %100, %cst_53 [0] : vector<128x8xf32> to vector<8xf32>
    %105 = vector.shape_cast %104 : vector<8xf32> to vector<1x1x1x8xf32>
    %c0_54 = arith.constant 0 : index
    %c0_55 = arith.constant 0 : index
    %c0_56 = arith.constant 0 : index
    %c0_57 = arith.constant 0 : index
    %106 = vector.load %arg10[%c0_54, %c0_55, %c0_56, %c0_57] : memref<1x1x1x8xf32, #tpu.memory_space<vmem>>, vector<1x1x1x8xf32>
    tpu.vector_store %arg10[%c0_54, %c0_55, %c0_56, %c0_57], %105 {strides = array<i32>} : memref<1x1x1x8xf32, #tpu.memory_space<vmem>>, vector<1x1x1x8xf32>,
    %107 = arith.mulf %100, %100 : vector<128x8xf32>
    %cst_58 = arith.constant dense<0.000000e+00> : vector<8xf32>
    %108 = vector.multi_reduction <add>, %107, %cst_58 [0] : vector<128x8xf32> to vector<8xf32>
    %109 = vector.shape_cast %108 : vector<8xf32> to vector<1x1x1x8xf32>
    %c0_59 = arith.constant 0 : index
    %c0_60 = arith.constant 0 : index
    %c0_61 = arith.constant 0 : index
    %c0_62 = arith.constant 0 : index
    %110 = vector.load %arg11[%c0_59, %c0_60, %c0_61, %c0_62] : memref<1x1x1x8xf32, #tpu.memory_space<vmem>>, vector<1x1x1x8xf32>
    tpu.vector_store %arg11[%c0_59, %c0_60, %c0_61, %c0_62], %109 {strides = array<i32>} : memref<1x1x1x8xf32, #tpu.memory_space<vmem>>, vector<1x1x1x8xf32>,
    return
  }
  func.func @transform_0(%arg0: i32, %arg1: i32) -> (i32, i32, i32, i32) {
    %c0_i32 = arith.constant 0 : i32
    %c0_i32_0 = arith.constant 0 : i32
    %c0_i32_1 = arith.constant 0 : i32
    return %arg0, %arg1, %c0_i32, %c0_i32_0 : i32, i32, i32, i32
  }
  func.func @transform_1(%arg0: i32, %arg1: i32) -> (i32, i32, i32, i32) {
    %c8_i32 = arith.constant 8 : i32
    %0 = arith.muli %arg1, %c8_i32 : i32
    %c1_i32 = arith.constant 1 : i32
    %1 = arith.subi %0, %c1_i32 : i32
    %c0_i32 = arith.constant 0 : i32
    %2 = arith.maxsi %1, %c0_i32 : i32
    %c0_i32_0 = arith.constant 0 : i32
    %c0_i32_1 = arith.constant 0 : i32
    %c0_i32_2 = arith.constant 0 : i32
    return %arg0, %2, %c0_i32_0, %c0_i32_1 : i32, i32, i32, i32
  }
  func.func @transform_2(%arg0: i32, %arg1: i32) -> (i32, i32, i32, i32) {
    %c1_i32 = arith.constant 1 : i32
    %0 = arith.addi %arg1, %c1_i32 : i32
    %c8_i32 = arith.constant 8 : i32
    %1 = arith.muli %0, %c8_i32 : i32
    %c15_i32 = arith.constant 15 : i32
    %2 = arith.minsi %1, %c15_i32 : i32
    %c0_i32 = arith.constant 0 : i32
    %c0_i32_0 = arith.constant 0 : i32
    %c0_i32_1 = arith.constant 0 : i32
    return %arg0, %2, %c0_i32, %c0_i32_0 : i32, i32, i32, i32
  }
  func.func @transform_3(%arg0: i32, %arg1: i32) -> (i32, i32) {
    %c0_i32 = arith.constant 0 : i32
    %c0_i32_0 = arith.constant 0 : i32
    %c0_i32_1 = arith.constant 0 : i32
    return %c0_i32, %c0_i32_0 : i32, i32
  }
  func.func @transform_4(%arg0: i32, %arg1: i32) -> (i32, i32) {
    %c0_i32 = arith.constant 0 : i32
    %c0_i32_0 = arith.constant 0 : i32
    %c0_i32_1 = arith.constant 0 : i32
    return %c0_i32, %c0_i32_0 : i32, i32
  }
  func.func @transform_5(%arg0: i32, %arg1: i32) -> (i32, i32, i32) {
    %c0_i32 = arith.constant 0 : i32
    %c0_i32_0 = arith.constant 0 : i32
    %c0_i32_1 = arith.constant 0 : i32
    %c0_i32_2 = arith.constant 0 : i32
    return %c0_i32, %c0_i32_0, %c0_i32_1 : i32, i32, i32
  }
  func.func @transform_6(%arg0: i32, %arg1: i32) -> (i32, i32) {
    %c0_i32 = arith.constant 0 : i32
    %c0_i32_0 = arith.constant 0 : i32
    %c0_i32_1 = arith.constant 0 : i32
    return %c0_i32, %c0_i32_0 : i32, i32
  }
  func.func @transform_7(%arg0: i32, %arg1: i32) -> (i32, i32, i32, i32) {
    %c0_i32 = arith.constant 0 : i32
    %c0_i32_0 = arith.constant 0 : i32
    %c0_i32_1 = arith.constant 0 : i32
    return %arg0, %arg1, %c0_i32, %c0_i32_0 : i32, i32, i32, i32
  }
  func.func @transform_8(%arg0: i32, %arg1: i32) -> (i32, i32, i32, i32) {
    %c0_i32 = arith.constant 0 : i32
    %c0_i32_0 = arith.constant 0 : i32
    %c0_i32_1 = arith.constant 0 : i32
    return %arg0, %arg1, %c0_i32, %c0_i32_0 : i32, i32, i32, i32
  }
  func.func @transform_9(%arg0: i32, %arg1: i32) -> (i32, i32, i32, i32) {
    %c0_i32 = arith.constant 0 : i32
    %c0_i32_0 = arith.constant 0 : i32
    %c0_i32_1 = arith.constant 0 : i32
    return %arg0, %arg1, %c0_i32, %c0_i32_0 : i32, i32, i32, i32
  }
}

module attributes {stable_mosaic.version = 11 : i64} {
  func.func @_bn_relu_kernel(%arg0: i32, %arg1: memref<32x128xbf16, #tpu.memory_space<vmem>>, %arg2: memref<1x128xf32, #tpu.memory_space<vmem>>, %arg3: memref<1x128xf32, #tpu.memory_space<vmem>>, %arg4: memref<32x128xf32, #tpu.memory_space<vmem>>) attributes {dimension_semantics = [#tpu.dimension_semantics<parallel>], iteration_bounds = array<i64: 1>, scalar_prefetch = 0 : i64, scratch_operands = 0 : i64, tpu.core_type = #tpu.core_type<tc>, window_params = [{transform_indices = @transform_0, window_bounds = array<i64: 32, 128>}, {pipeline_mode = #tpu.pipeline_mode<synchronous>, transform_indices = @transform_1, window_bounds = array<i64: 1, 128>}, {pipeline_mode = #tpu.pipeline_mode<synchronous>, transform_indices = @transform_2, window_bounds = array<i64: 1, 128>}, {transform_indices = @transform_3, window_bounds = array<i64: 32, 128>}]} {
    %c0 = arith.constant 0 : index
    %c0_0 = arith.constant 0 : index
    %0 = vector.load %arg1[%c0, %c0_0] : memref<32x128xbf16, #tpu.memory_space<vmem>>, vector<32x128xbf16>
    %1 = arith.extf %0 : vector<32x128xbf16> to vector<32x128xf32>
    %c0_1 = arith.constant 0 : index
    %c0_2 = arith.constant 0 : index
    %2 = vector.load %arg2[%c0_1, %c0_2] : memref<1x128xf32, #tpu.memory_space<vmem>>, vector<1x128xf32>
    %3 = vector.broadcast %2 : vector<1x128xf32> to vector<32x128xf32>
    %4 = arith.mulf %1, %3 : vector<32x128xf32>
    %c0_3 = arith.constant 0 : index
    %c0_4 = arith.constant 0 : index
    %5 = vector.load %arg3[%c0_3, %c0_4] : memref<1x128xf32, #tpu.memory_space<vmem>>, vector<1x128xf32>
    %6 = vector.broadcast %5 : vector<1x128xf32> to vector<32x128xf32>
    %7 = arith.addf %4, %6 : vector<32x128xf32>
    %cst = arith.constant 0.000000e+00 : f32
    %8 = vector.broadcast %cst : f32 to vector<32x128xf32>
    %9 = arith.maximumf %7, %8 : vector<32x128xf32>
    %c0_5 = arith.constant 0 : index
    %c0_6 = arith.constant 0 : index
    %10 = vector.load %arg4[%c0_5, %c0_6] : memref<32x128xf32, #tpu.memory_space<vmem>>, vector<32x128xf32>
    tpu.vector_store %arg4[%c0_5, %c0_6], %9 {strides = array<i32>} : memref<32x128xf32, #tpu.memory_space<vmem>>, vector<32x128xf32>,
    return
  }
  func.func @transform_0(%arg0: i32) -> (i32, i32) {
    %c0_i32 = arith.constant 0 : i32
    %c0_i32_0 = arith.constant 0 : i32
    return %arg0, %c0_i32 : i32, i32
  }
  func.func @transform_1(%arg0: i32) -> (i32, i32) {
    %c0_i32 = arith.constant 0 : i32
    %c0_i32_0 = arith.constant 0 : i32
    %c0_i32_1 = arith.constant 0 : i32
    return %c0_i32, %c0_i32_0 : i32, i32
  }
  func.func @transform_2(%arg0: i32) -> (i32, i32) {
    %c0_i32 = arith.constant 0 : i32
    %c0_i32_0 = arith.constant 0 : i32
    %c0_i32_1 = arith.constant 0 : i32
    return %c0_i32, %c0_i32_0 : i32, i32
  }
  func.func @transform_3(%arg0: i32) -> (i32, i32) {
    %c0_i32 = arith.constant 0 : i32
    %c0_i32_0 = arith.constant 0 : i32
    return %arg0, %c0_i32 : i32, i32
  }
}

</mosaic_0001>

<bundles_post_ra>
// kernel: tile.13
= control target key start
LH: loop header
LB: loop body
LE: loop exit
PB: predicated region body
PF: predicated region fallthrough
CT: control target
= control target key end

     0   :  { %s28_s0 = inlined_call_operand.vmem [shape: f32[8], index: 0, kind: input, shape index: {}]   ;;  %s29_s1 = inlined_call_operand.vmem [shape: f32[16,8], index: 1, kind: output, shape index: {}]  }
   0x1   :  { %v4_v0 = vld [vmem:[%s28_s0] ss:$0 sm:$0xff] }
   0x2   :  { %5 = vst [vmem:[%s29_s1] sm:$0xff] %v4_v0 }
   0x3   :  { %8 = vst [vmem:[%s29_s1 + $0x8] sm:$0xff] %v4_v0 }

// kernel: tile.14
= control target key start
LH: loop header
LB: loop body
LE: loop exit
PB: predicated region body
PF: predicated region fallthrough
CT: control target
= control target key end

     0   :  { %s131_s10 = smov 120   ;;  %s132_s11 = smov 104   ;;  %vm3_vm0 = vcmask 64512   ;;  %vm9_vm1 = vcmask 1048512   ;;  %vm15_vm2 = vcmask 982912   ;;  %vm21_vm3 = vcmask 917312   ;;  %s207_s0 = inlined_call_operand.vmem [shape: f32[16,8], index: 0, kind: input, shape index: {}]   ;;  %s208_s1 = inlined_call_operand.vmem [shape: f32[1,128], index: 1, kind: output, shape index: {}]  }
   0x1   :  { %v101_v0 = vld [vmem:[%s207_s0 + $0xf] sm:$0x1]   ;;  %v103_v1 = vld [vmem:[%s207_s0 + $0xd] sm:$0x1]   ;;  %v105_v2 = vld [vmem:[%s207_s0 + $0xb] sm:$0x1]  }
   0x2   :  { %7 = vrot.lane.b32.xlu0 %v101_v0, %s131_s10  ;;  %19 = vrot.lane.b32.xlu1 %v103_v1, %s132_s11  ;;  %s133_s14 = smov 88   ;;  %v102_v3 = vld [vmem:[%s207_s0 + $0xe] sm:$0x1]   ;;  %v104_v4 = vld [vmem:[%s207_s0 + $0xc] sm:$0x1]   ;;  %s134_s19 = smov 112  }
   0x3   :  { %31 = vrot.lane.b32.xlu2 %v105_v2, %s133_s14  ;;  %s135_s20 = smov 96   ;;  %v106_v5 = vld [vmem:[%s207_s0 + $0xa] sm:$0x1]   ;;  %s136_s23 = smov 80   ;;  %v107_v6 = vld [vmem:[%s207_s0 + $0x9] sm:$0x1]  }
   0x4   :  { %v108_v7 = vld [vmem:[%s207_s0 + $0x8] sm:$0x1]   ;;  %s137_s28 = smov 72   ;;  %s138_s29 = smov 64   ;;  %v109_v8 = vld [vmem:[%s207_s0 + $0x7] sm:$0x1]  }
   0x5   :  { %s139_s3 = smov 56   ;;  %v110_v9 = vld [vmem:[%s207_s0 + $0x6] sm:$0x1]   ;;  %v111_v10 = vld [vmem:[%s207_s0 + $0x5] sm:$0x1]   ;;  %s140_s8 = smov 48  }
   0x6   :  { %s141_s9 = smov 40   ;;  %v112_v11 = vld [vmem:[%s207_s0 + $0x4] sm:$0x1]   ;;  %s142_s12 = smov 32   ;;  %v113_v12 = vld [vmem:[%s207_s0 + $0x3] sm:$0x1]  }
   0x7   :  { %v114_v13 = vld [vmem:[%s207_s0 + $0x2] sm:$0x1]   ;;  %s143_s17 = smov 24   ;;  %s144_s18 = smov 16   ;;  %v115_v14 = vld [vmem:[%s207_s0 + $0x1] sm:$0x1]  }
   0x8   :  { %s145_s21 = smov 8   ;;  %v2_v15 = vld [vmem:[%s207_s0] sm:$0x1]   ;;  %vm27_vm4 = vcmask 851712   ;;  %vm33_vm5 = vcmask 786112   ;;  %vm39_vm6 = vcmask 720512  }
   0x9   :  { %4 = vst.msk [vmem:[#allocation0] sm:$0x1] %vm3_vm0, %v2_v15   ;;  %vm45_vm7 = vcmask 654912   ;;  %vm51_vm8 = vcmask 589312   ;;  %vm57_vm9 = vcmask 523712   ;;  %vm63_vm10 = vcmask 458112  }
   0xa   :  { %13 = vrot.lane.b32.xlu0 %v102_v3, %s134_s19  ;;  %25 = vrot.lane.b32.xlu1 %v104_v4, %s135_s20  ;;  %vm69_vm11 = vcmask 392512   ;;  %vm75_vm12 = vcmask 326912   ;;  %vm81_vm13 = vcmask 261312   ;;  %vm87_vm14 = vcmask 195712  }
   0xb   :  { %37 = vrot.lane.b32.xlu2 %v106_v5, %s136_s23  ;;  %vm93_vm15 = vcmask 130112  }
  0x12   :  { %43 = vrot.lane.b32.xlu0 %v107_v6, %s137_s28  ;;  %49 = vrot.lane.b32.xlu1 %v108_v7, %s138_s29 }
  0x13   :  { %55 = vrot.lane.b32.xlu2 %v109_v8, %s139_s3 }
  0x1a   :  { %61 = vrot.lane.b32.xlu0 %v110_v9, %s140_s8  ;;  %67 = vrot.lane.b32.xlu1 %v111_v10, %s141_s9 }
  0x1b   :  { %73 = vrot.lane.b32.xlu2 %v112_v11, %s142_s12 }
  0x22   :  { %79 = vrot.lane.b32.xlu0 %v113_v12, %s143_s17  ;;  %85 = vrot.lane.b32.xlu1 %v114_v13, %s144_s18 }
  0x23   :  { %91 = vrot.lane.b32.xlu2 %v115_v14, %s145_s21 }
  0x5d   :  { %v32_v16 = vpop.permute.xlu2 %31  }
  0x65   :  { %v38_v17 = vpop.permute.xlu2 %37  }
  0x6d   :  { %v56_v18 = vpop.permute.xlu2 %55  }
  0x74   :  { %v8_v19 = vpop.permute.xlu0 %7   ;;  %v20_v20 = vpop.permute.xlu1 %19  }
  0x75   :  { %10 = vst.msk [vmem:[#allocation0] sm:$0x1] %vm9_vm1, %v8_v19   ;;  %v74_v21 = vpop.permute.xlu2 %73  }
  0x7c   :  { %v14_v22 = vpop.permute.xlu0 %13   ;;  %v26_v23 = vpop.permute.xlu1 %25  }
  0x7d   :  { %16 = vst.msk [vmem:[#allocation0] sm:$0x1] %vm15_vm2, %v14_v22   ;;  %v92_v24 = vpop.permute.xlu2 %91  }
  0x7e   :  { %22 = vst.msk [vmem:[#allocation0] sm:$0x1] %vm21_vm3, %v20_v20  }
  0x7f   :  { %28 = vst.msk [vmem:[#allocation0] sm:$0x1] %vm27_vm4, %v26_v23  }
  0x80   :  { %34 = vst.msk [vmem:[#allocation0] sm:$0x1] %vm33_vm5, %v32_v16  }
  0x81   :  { %40 = vst.msk [vmem:[#allocation0] sm:$0x1] %vm39_vm6, %v38_v17  }
  0x84   :  { %v44_v25 = vpop.permute.xlu0 %43   ;;  %v50_v26 = vpop.permute.xlu1 %49  }
  0x85   :  { %46 = vst.msk [vmem:[#allocation0] sm:$0x1] %vm45_vm7, %v44_v25  }
  0x86   :  { %52 = vst.msk [vmem:[#allocation0] sm:$0x1] %vm51_vm8, %v50_v26  }
  0x87   :  { %58 = vst.msk [vmem:[#allocation0] sm:$0x1] %vm57_vm9, %v56_v18  }
  0x8c   :  { %v62_v27 = vpop.permute.xlu0 %61   ;;  %v68_v28 = vpop.permute.xlu1 %67  }
  0x8d   :  { %64 = vst.msk [vmem:[#allocation0] sm:$0x1] %vm63_vm10, %v62_v27  }
  0x8e   :  { %70 = vst.msk [vmem:[#allocation0] sm:$0x1] %vm69_vm11, %v68_v28  }
  0x8f   :  { %76 = vst.msk [vmem:[#allocation0] sm:$0x1] %vm75_vm12, %v74_v21  }
  0x94   :  { %v80_v29 = vpop.permute.xlu0 %79   ;;  %v86_v30 = vpop.permute.xlu1 %85  }
  0x95   :  { %82 = vst.msk [vmem:[#allocation0] sm:$0x1] %vm81_vm13, %v80_v29  }
  0x96   :  { %88 = vst.msk [vmem:[#allocation0] sm:$0x1] %vm87_vm14, %v86_v30  }
  0x97   :  { %94 = vst.msk [vmem:[#allocation0] sm:$0x1] %vm93_vm15, %v92_v24  }
  0x9e   :  { %v97_v31 = vld [vmem:[#allocation0] sm:$0x1] }
  0x9f   :  { %100 = vst [vmem:[%s208_s1] sm:$0x1] %v97_v31 }

// kernel: unet_conv2_forward.5
= control target key start
LH: loop header
LB: loop body
LE: loop exit
PB: predicated region body
PF: predicated region fallthrough
CT: control target
= control target key end

     0   :  { %s105_s0 = inlined_call_operand.vmem [shape: bf16[32,128], index: 0, kind: input, shape index: {}]   ;;  %s106_s1 = inlined_call_operand.vmem [shape: f32[1,128], index: 1, kind: input, shape index: {}]   ;;  %s107_s2 = inlined_call_operand.vmem [shape: f32[1,128], index: 2, kind: input, shape index: {}]   ;;  %s108_s3 = inlined_call_operand.vmem [shape: f32[32,128], index: 3, kind: output, shape index: {}]  }
   0x1   :  { %v51_v0 = vld [vmem:[%s105_s0] sm:$0xff]   ;;  %v58_v5 = vld [vmem:[%s105_s0 + $0x8] sm:$0xff]  }
   0x2   :  { %v59_v1 = vld [vmem:[%s106_s1] ss:$0 sm:$0xff]  ;;  %v52_v2 = vunpack.c.l.bf16 %v51_v0  ;;  %v53_v4 = vunpack.c.h.bf16 %v51_v0  ;;  %v56_v6 = vunpack.c.l.bf16 %v58_v5  ;;  %v57_v7 = vunpack.c.h.bf16 %v58_v5 }
   0x3   :  { %v60_v3 = vld [vmem:[%s107_s2] ss:$0 sm:$0xff] }
   0x4   :  { %v26_v8 = vmul.f32 %v59_v1, %v52_v2  ;;  %v27_v9 = vmul.f32 %v59_v1, %v53_v4  ;;  %v28_v10 = vmul.f32 %v59_v1, %v56_v6  ;;  %v29_v11 = vmul.f32 %v59_v1, %v57_v7 }
   0x6   :  { %v34_v12 = vadd.f32 %v60_v3, %v26_v8  ;;  %v35_v13 = vadd.f32 %v60_v3, %v27_v9  ;;  %v36_v14 = vadd.f32 %v60_v3, %v28_v10  ;;  %v37_v15 = vadd.f32 %v60_v3, %v29_v11 }
   0x8   :  { %v38_v16 = vmax.f32 %v34_v12, 0.0  ;;  %v39_v17 = vmax.f32 %v35_v13, 0.0  ;;  %v40_v18 = vmax.f32 %v36_v14, 0.0  ;;  %v41_v19 = vmax.f32 %v37_v15, 0.0 }
   0xa   :  { %42 = vst [vmem:[%s108_s3] sm:$0xff] %v38_v16 }
   0xb   :  { %43 = vst [vmem:[%s108_s3 + $0x8] sm:$0xff] %v39_v17 }
   0xc   :  { %44 = vst [vmem:[%s108_s3 + $0x10] sm:$0xff] %v40_v18 }
   0xd   :  { %45 = vst [vmem:[%s108_s3 + $0x18] sm:$0xff] %v41_v19 }

// kernel: unet_conv2_forward.3
= control target key start
LH: loop header
LB: loop body
LE: loop exit
PB: predicated region body
PF: predicated region fallthrough
CT: control target
= control target key end

     0   :  { %s2115_s30 = smov 0   ;;  %s2117_s3 = smov 0   ;;  %s2831_s0 = inlined_call_operand.vmem [shape: bf16[2,16,16,4], index: 0, kind: input, shape index: {}, may-alias: {0,1,2}]   ;;  %s2832_s1 = inlined_call_operand.vmem [shape: bf16[2,16,16,4], index: 1, kind: input, shape index: {}, may-alias: {0,1,2}]   ;;  %s2833_s2 = inlined_call_operand.vmem [shape: bf16[2,16,16,4], index: 2, kind: input, shape index: {}, may-alias: {0,1,2}]   ;;  %s2834_s3 = inlined_call_operand.vmem [shape: f32[1,4], index: 3, kind: input, shape index: {}]   ;;  %s2835_s4 = inlined_call_operand.vmem [shape: f32[1,4], index: 4, kind: input, shape index: {}]   ;;  %s2836_s5 = inlined_call_operand.vmem [shape: bf16[9,4,8], index: 5, kind: input, shape index: {}]   ;;  %s2837_s6 = inlined_call_operand.vmem [shape: f32[1,8], index: 6, kind: input, shape index: {}]   ;;  %s2838_s7 = inlined_call_operand.vmem [shape: bf16[2,16,16,8], index: 7, kind: output, shape index: {0}]   ;;  %s2839_s8 = inlined_call_operand.vmem [shape: f32[2,2,1,8], index: 8, kind: output, shape index: {1}]   ;;  %s2840_s9 = inlined_call_operand.vmem [shape: f32[2,2,1,8], index: 9, kind: output, shape index: {2}]  }
   0x1   :  { %s2119_s4 = smov 0   ;;  %s2121_s10 = smov 0  }
   0x2   :  { %s2123_s11 = smov 0  }
   0x3 LB: > { %s29_s12 = sadd.s32 1, %s2055_s4  ;;  %s32_s13 = sadd.s32 1, %s2059_s10  ;;  %s2063_s11 = sphi %s2123_s11, %s20_s11   ;;  %s2059_s10 = sphi %s2121_s10, %s2865_s10   ;;  %s2055_s4 = sphi %s2119_s4, %s2864_s4   ;;  %s2051_s3 = sphi %s2117_s3, %s2863_s3   ;;  %s2047_s30 = sphi %s2115_s30, %s2862_s30  }
   0x4   : > { %p30_p0 = scmp.ge.s32.totalorder %s29_s12, 2  ;;  %p1863_p1 = scmp.ge.s32.totalorder %s2063_s11, 1 }
   0x5   : > { %p382_p2 = scmp.lt.s32.totalorder %s2063_s11, 5 }
   0x6   : > { %s2867_s12 = smov (%p30_p0, %s29_s12), 0  ;;  %s2869_s13 = smov (!%p30_p0, %s32_s13), %s2059_s10 }
   0x7   : > { %p383_p3 = pnand %p1863_p1, %p382_p2  ;;  %p34_p4 = scmp.ge.s32.totalorder %s2869_s13, 2 }
   0x8   : > { %s2151_s16 = sshll.u32 (!%p383_p3), %s2047_s30, 3  ;;  %p469_p5 = scmp.lt.s32.totalorder (!%p383_p3), %s2051_s3, 1 }
   0x9   : > { %s2871_s13 = smov (%p34_p4, %s2869_s13), 0  ;;  %386 = sbr.rel (%p383_p3) target bundleno = 481 (0x1e1), region = 48 }
   0xa   : > { %p471_p6 = scmp.lt.s32.totalorder (!%p383_p3), %s2151_s16, 15  ;;  %p559_p7 = scmp.eq.s32.totalorder (!%p383_p3), %s2047_s30, 0 }
   0xb   : > { %p562_p8 = scmp.eq.s32.totalorder (!%p383_p3), %s2047_s30, 1  ;;  %s2191_s18 = sadd.s32 (!%p383_p3), 4294967295, %s2151_s16 }
   0xc   : > { %p481_p9 = scmp.gt.s32.totalorder (!%p383_p3), %s2191_s18, 0  ;;  %p1870_p10 = scmp.lt.s32.totalorder (!%p383_p3), %s2191_s18, 15 }
   0xd   : > { %s1980_s14 = sadd.s32 (!%p383_p3), 8, %s2151_s16  ;;  %p526_p12 = scmp.lt.s32.totalorder (!%p383_p3), %s2047_s30, 1 }
   0xe   : > { %v1891_v0 = vld [vmem:[%s2836_s5 + $0x6] sm:$0x3]  ;;  %vm2841_vm0 = vcmask 1041408   ;;  %s2873_s3 = smov (!%p469_p5, %s2051_s3), 1  ;;  %v1908_v2 = vld [vmem:[%s2836_s5 + $0xc] sm:$0x3] }
   0xf   : > { %v834_v1 = vsel %vm2841_vm0, %v1891_v0, 0  ;;  %v1917_v3 = vld [vmem:[%s2836_s5 + $0x2] sm:$0x3]  ;;  %s472_s21 = scalar_select %p471_p6, %s2151_s16, 15  ;;  %v946_v4 = vsel %vm2841_vm0, %v1908_v2, 0 }
  0x10   : > { %1981 = vmatpush.bf16.msra.mxu1 %v834_v1  ;;  %1982 = vmatpush.bf16.msra.mxu2 %v834_v1  ;;  %v1032_v5 = vsel %vm2841_vm0, %v1917_v3, 0  ;;  %v804_v6 = vld [vmem:[%s2836_s5] sm:$0x3]  ;;  %s2170_s24 = sshll.u32 %s2873_s3, 5  ;;  %v1926_v8 = vld [vmem:[%s2836_s5 + $0x8] sm:$0x3] }
  0x11   : > { %1983 = vmatpush.bf16.msra.mxu3 %v834_v1  ;;  %843 = vmatpush.bf16.msra.mxu0 %v834_v1  ;;  %v889_v7 = vsel %vm2841_vm0, %v804_v6, 0  ;;  %s1865_s27 = sshll.u32 %s472_s21, 1  ;;  %v1104_v9 = vsel %vm2841_vm0, %v1926_v8, 0  ;;  %vm749_vm3 = vsmask.f32 256  ;;  %p2292_p11 = scmp.lt.s32.totalorder %s1980_s14, 15 }
  0x12   : > { %s2179_s28 = sadd.s32 %s2170_s24, %s1865_s27  ;;  %s2881_s30 = smov (!%p526_p12, %s2047_s30), 1 }
  0x13   : > { %s1867_s29 = sshll.u32 %s2179_s28, 2  ;;  %s2877_s14 = smov (!%p2292_p11, %s1980_s14), 15 }
  0x14   : > { %955 = vmatpush.bf16.msrb.mxu2 %v946_v4  ;;  %898 = vmatpush.bf16.msrb.mxu1 %v889_v7  ;;  %s2188_s17 = scalar_lea.vmem %s2831_s0, %s1867_s29  ;;  %s2879_s14 = smov (!%p2292_p11, %s2877_s14), 15 }
  0x15   : > { %1041 = vmatpush.bf16.msrb.mxu3 %v1032_v5  ;;  %1113 = vmatpush.bf16.msrb.mxu0 %v1104_v9  ;;  %s560_s19 = scalar_select %p559_p7, 1, 0  ;;  %v545_v11 = vld [vmem:[%s2188_s17 + $0x10] sm:$0xf]  ;;  %v546_v12 = vld [vmem:[%s2188_s17 + $0x14] sm:$0xf] }
  0x16   : > { %s563_s20 = scalar_select %p562_p8, 1, 0  ;;  %v549_v13 = vld [vmem:[%s2188_s17 + $0x20] sm:$0xf]  ;;  %v550_v14 = vld [vmem:[%s2188_s17 + $0x24] sm:$0xf] }
  0x17   : > { %s561_s21 = sadd.s32 4294967295, %s560_s19  ;;  %v553_v16 = vld [vmem:[%s2188_s17 + $0x30] sm:$0xf]  ;;  %v554_v17 = vld [vmem:[%s2188_s17 + $0x34] sm:$0xf]  ;;  %s1889_s28 = sshll.u32 %s2873_s3, 1 }
  0x18   : > { %s564_s22 = smul.u32 10, %s563_s20  ;;  %v2193_v10 = vstv %s561_s21  ;;  %v541_v18 = vld [vmem:[%s2188_s17] sm:$0xf]  ;;  %v542_v25 = vld [vmem:[%s2188_s17 + $0x4] sm:$0xf] }
  0x19   : > { %vm570_vm1 = vcmp.ne.s32.totalorder %v2193_v10, 3  ;;  %vm572_vm4 = vcmp.ne.s32.totalorder %v2193_v10, 5  ;;  %vm574_vm5 = vcmp.ne.s32.totalorder %v2193_v10, 7  ;;  %vm568_vm6 = vcmp.ne.s32.totalorder %v2193_v10, 1  ;;  %s482_s25 = scalar_select %p481_p9, %s2191_s18, 0 }
  0x1a   : > { %s565_s23 = sadd.s32 4294967295, %s564_s22  ;;  %vm571_vm10 = vcmp.ne.s32.totalorder %v2193_v10, 4  ;;  %vm573_vm14 = vcmp.ne.s32.totalorder %v2193_v10, 6  ;;  %vm575_vm15 = vcmp.ne.s32.totalorder %v2193_v10, 8  ;;  %v547_v26 = vld [vmem:[%s2188_s17 + $0x18] sm:$0xf] }
  0x1b   : > { %v2201_v15 = vstv %s565_s23  ;;  %s2875_s25 = smov (!%p1870_p10, %s482_s25), 15  ;;  %v548_v36 = vld [vmem:[%s2188_s17 + $0x1c] sm:$0xf]  ;;  %v551_v46 = vld [vmem:[%s2188_s17 + $0x28] sm:$0xf] }
  0x1c   : > { %vm581_vm7 = vcmp.ne.s32.totalorder %v2201_v15, 3  ;;  %vm583_vm8 = vcmp.ne.s32.totalorder %v2201_v15, 5  ;;  %vm585_vm9 = vcmp.ne.s32.totalorder %v2201_v15, 7  ;;  %vm579_vm12 = vcmp.ne.s32.totalorder %v2201_v15, 1  ;;  %s1875_s26 = sshll.u32 %s2875_s25, 1  ;;  %s2712_s25 = scalar_lea.vmem %s2838_s7, %s1867_s29 }
  0x1d   : > { %vm591_vm11 = vmand %vm570_vm1, %vm581_vm7  ;;  %vm582_vm13 = vcmp.ne.s32.totalorder %v2201_v15, 4  ;;  %vm584_vm2 = vcmp.ne.s32.totalorder %v2201_v15, 6  ;;  %vm586_vm1 = vcmp.ne.s32.totalorder %v2201_v15, 8  ;;  %vm807_vm7 = vcmask 31744   ;;  %v552_v47 = vld [vmem:[%s2188_s17 + $0x2c] sm:$0xf]  ;;  %s2279_s27 = sadd.s32 %s1875_s26, %s2170_s24  ;;  %s529_s29 = sadd.s32 %s1889_s28, %s2881_s30 }
  0x1e   : > { %v604_v19 = vsel %vm591_vm11, %v545_v11, 0  ;;  %v605_v20 = vsel %vm591_vm11, %v546_v12, 0  ;;  %vm593_vm0 = vmand %vm572_vm4, %vm583_vm8  ;;  %vm569_vm4 = vcmp.ne.s32.totalorder %v2193_v10, 2  ;;  %vm580_vm8 = vcmp.ne.s32.totalorder %v2201_v15, 2  ;;  %s1877_s16 = sshll.u32 %s2279_s27, 2 }
  0x1f   : > { %v644_v21 = vunpack.c.l.b16 %v604_v19  ;;  %v645_v22 = vunpack.c.l.b16 %v605_v20  ;;  %v608_v23 = vsel %vm593_vm0, %v549_v13, 0  ;;  %v609_v24 = vsel %vm593_vm0, %v550_v14, 0  ;;  %vm595_vm11 = vmand %vm574_vm5, %vm585_vm9  ;;  %v555_v6 = vld [vmem:[%s2188_s17 + $0x38] sm:$0xf]  ;;  %v556_v7 = vld [vmem:[%s2188_s17 + $0x3c] sm:$0xf]  ;;  %s491_s20 = scalar_lea.vmem %s2832_s1, %s1877_s16 }
  0x20   : > { %v648_v27 = vunpack.c.l.b16 %v608_v23  ;;  %v649_v28 = vunpack.c.l.b16 %v609_v24  ;;  %v612_v29 = vsel %vm595_vm11, %v553_v16, 0  ;;  %v613_v30 = vsel %vm595_vm11, %v554_v17, 0  ;;  %vm2239_vm0 = vmand %vm568_vm6, %vm579_vm12  ;;  %v543_v17 = vld [vmem:[%s2188_s17 + $0x8] sm:$0xf] }
  0x21   : > { %v2245_v32 = vpack.c.b16 %v645_v22, %v644_v21  ;;  %v652_v33 = vunpack.c.l.b16 %v612_v29  ;;  %v653_v34 = vunpack.c.l.b16 %v613_v30  ;;  %v600_v35 = vsel %vm2239_vm0, %v541_v18, 0  ;;  %vm2254_vm5 = vmand %vm571_vm10, %vm582_vm13  ;;  %v544_v18 = vld [vmem:[%s2188_s17 + $0xc] sm:$0xf]  ;;  %s2375_s17 = sshll.u32 %s2879_s14, 1  ;;  %s530_s14 = scalar_lea.vmem %s2839_s8, %s529_s29 }
  0x22   : > { %v2258_v38 = vpack.c.b16 %v649_v28, %v648_v27  ;;  %v601_v39 = vsel %vm2239_vm0, %v542_v25, 0  ;;  %v640_v40 = vunpack.c.l.b16 %v600_v35  ;;  %v606_v41 = vsel %vm2254_vm5, %v547_v26, 0  ;;  %vm2274_vm6 = vmand %vm573_vm14, %vm584_vm2  ;;  %v1944_v27 = vld [vmem:[%s2836_s5 + $0x4] sm:$0x3]  ;;  %s506_s23 = sadd.s32 %s2375_s17, %s2170_s24 }
  0x23   : > { %v690_v42 = vshrl.u32 %v2245_v32, 16  ;;  %v693_v43 = vshll.u32 %v2245_v32, 16  ;;  %v2266_v44 = vpack.c.b16 %v653_v34, %v652_v33  ;;  %v641_v45 = vunpack.c.l.b16 %v601_v39  ;;  %vm2356_vm10 = vmand %vm569_vm4, %vm580_vm8  ;;  %v539_v33 = vld [vmem:[%s491_s20] sm:$0xf]  ;;  %v540_v39 = vld [vmem:[%s491_s20 + $0x4] sm:$0xf] }
  0x24   : > { %v704_v49 = vshrl.u32 %v2258_v38, 16  ;;  %v707_v50 = vshll.u32 %v2258_v38, 16  ;;  %v607_v51 = vsel %vm2254_vm5, %v548_v36, 0  ;;  %v646_v52 = vunpack.c.l.b16 %v606_v41  ;;  %s1884_s18 = sshll.u32 %s506_s23, 2 }
  0x25   : > { %v692_v53 = vrot.slane %v690_v42, 7  ;;  %v718_v54 = vshrl.u32 %v2266_v44, 16  ;;  %v721_v55 = vshll.u32 %v2266_v44, 16  ;;  %v2290_v56 = vpack.c.b16 %v641_v45, %v640_v40  ;;  %v1953_v40 = vld [vmem:[%s2836_s5 + $0xa] sm:$0x3]  ;;  %s508_s21 = scalar_lea.vmem %s2833_s2, %s1884_s18  ;;  %s537_s18 = scalar_lea.vmem %s2840_s9, %s529_s29 }
  0x26   : > { %vm2849_vm2 = vcmask 1040384   ;;  %v706_v58 = vrot.slane %v704_v49, 7  ;;  %v647_v59 = vunpack.c.l.b16 %v607_v51  ;;  %v610_v60 = vsel %vm2274_vm6, %v551_v46, 0  ;;  %v1935_v51 = vld [vmem:[%s2836_s5 + $0xe] sm:$0x3] }
  0x27   : > { %vm2298_vm9 = vmand %vm2849_vm2, %vm749_vm3  ;;  %v611_v61 = vsel %vm2274_vm6, %v552_v47, 0  ;;  %v695_v62 = vor.u32 %v693_v43, %v692_v53  ;;  %v720_v63 = vrot.slane %v718_v54, 7  ;;  %v676_v0 = vshrl.u32 %v2290_v56, 16 }
  0x28   : > { %v679_v1 = vshll.u32 %v2290_v56, 16  ;;  %v709_v2 = vor.u32 %v707_v50, %v706_v58  ;;  %v2319_v3 = vpack.c.b16 %v647_v59, %v646_v52  ;;  %v650_v4 = vunpack.c.l.b16 %v610_v60  ;;  %vm2327_vm3 = vmand %vm575_vm15, %vm586_vm1  ;;  %v1962_v52 = vld [vmem:[%s2836_s5 + $0x10] sm:$0x3] }
  0x29   : > { %v651_v5 = vunpack.c.l.b16 %v611_v61  ;;  %v2333_v9 = vsel %vm2298_vm9, 0, %v695_v62  ;;  %v723_v11 = vor.u32 %v721_v55, %v720_v63  ;;  %v678_v12 = vrot.slane %v676_v0, 7 }
  0x2a   : > { %1894 = vmatmul.msk.bf16.vlgmr.msra.gmra.mxu1 %vm807_vm7, %v2333_v9  ;;  %v2345_v13 = vsel %vm2298_vm9, 0, %v709_v2  ;;  %v697_v14 = vshrl.u32 %v2319_v3, 16  ;;  %v614_v22 = vsel %vm2327_vm3, %v555_v6, 0  ;;  %v615_v23 = vsel %vm2327_vm3, %v556_v7, 0 }
  0x2b   : > { %v2348_v16 = vpack.c.b16 %v651_v5, %v650_v4  ;;  %1896 = vmatmul.msk.bf16.vlgmr.msra.gmra.mxu2 %vm807_vm7, %v2345_v13  ;;  %v2367_v20 = vsel %vm2298_vm9, 0, %v723_v11  ;;  %v681_v21 = vor.u32 %v679_v1, %v678_v12  ;;  %v700_v24 = vshll.u32 %v2319_v3, 16 }
  0x2c   : > { %1898 = vmatmul.msk.bf16.vlgmr.msra.gmra.mxu3 %vm807_vm7, %v2367_v20  ;;  %v654_v26 = vunpack.c.l.b16 %v614_v22  ;;  %v655_v29 = vunpack.c.l.b16 %v615_v23  ;;  %v602_v30 = vsel %vm2356_vm10, %v543_v17, 0  ;;  %v603_v31 = vsel %vm2356_vm10, %v544_v18, 0 }
  0x2d   : > { %v711_v25 = vshrl.u32 %v2348_v16, 16  ;;  %v752_v28 = vsel %vm2298_vm9, 0, %v681_v21  ;;  %v699_v34 = vrot.slane %v697_v14, 7  ;;  %v714_v35 = vshll.u32 %v2348_v16, 16 }
  0x2e   : > { %1892 = vmatmul.msk.bf16.vlgmr.msra.gmra.mxu0 %vm807_vm7, %v752_v28  ;;  %v642_v36 = vunpack.c.l.b16 %v602_v30  ;;  %v643_v37 = vunpack.c.l.b16 %v603_v31  ;;  %v2399_v41 = vpack.c.b16 %v655_v29, %v654_v26  ;;  %vm567_vm12 = vcmp.ne.s32.totalorder %v2193_v10, 0 }
  0x2f   : > { %vm578_vm13 = vcmp.ne.s32.totalorder %v2201_v15, 0  ;;  %vm2856_vm14 = vcmask 1041408   ;;  %v713_v46 = vrot.slane %v711_v25, 7  ;;  %v702_v61 = vor.u32 %v700_v24, %v699_v34 }
  0x30   : > { %v1270_v45 = vsel %vm2856_vm14, %v1944_v27, 0  ;;  %v2406_v47 = vpack.c.b16 %v643_v37, %v642_v36  ;;  %vm588_vm15 = vmand %vm567_vm12, %vm578_vm13  ;;  %v725_v53 = vshrl.u32 %v2399_v41, 16  ;;  %v728_v58 = vshll.u32 %v2399_v41, 16 }
  0x31   : > { %1279 = vmatpush.bf16.msra.mxu2 %v1270_v45  ;;  %vm2857_vm1 = vmmov %vm2856_vm14  ;;  %v598_v59 = vsel %vm588_vm15, %v539_v33, 0  ;;  %v599_v60 = vsel %vm588_vm15, %v540_v39, 0  ;;  %v716_v8 = vor.u32 %v714_v35, %v713_v46  ;;  %v755_v17 = vsel %vm2298_vm9, 0, %v702_v61 }
  0x32   : > { %v1343_v48 = vsel %vm2857_vm1, %v1953_v40, 0  ;;  %v683_v62 = vshrl.u32 %v2406_v47, 16  ;;  %v686_v63 = vshll.u32 %v2406_v47, 16  ;;  %v638_v2 = vunpack.c.l.b16 %v598_v59  ;;  %vm2858_vm11 = vmmov %vm2857_vm1 }
  0x33   : > { %1352 = vmatpush.bf16.msra.mxu3 %v1343_v48  ;;  %v727_v4 = vrot.slane %v725_v53, 7  ;;  %v639_v5 = vunpack.c.l.b16 %v599_v60  ;;  %v1176_v6 = vsel %vm2858_vm11, %v1935_v51, 0  ;;  %vm2859_vm4 = vmmov %vm2857_vm1  ;;  %v757_v21 = vsel %vm2298_vm9, 0, %v716_v8 }
  0x34   : > { %v1416_v7 = vsel %vm2859_vm4, %v1962_v52, 0  ;;  %v685_v11 = vrot.slane %v683_v62, 7  ;;  %1185 = vmatpush.bf16.msra.mxu1 %v1176_v6  ;;  %vm576_vm8 = vcmp.ne.s32.totalorder %v2193_v10, 9  ;;  %vm587_vm0 = vcmp.ne.s32.totalorder %v2201_v15, 9 }
  0x35   : > { %1425 = vmatpush.bf16.msra.mxu0 %v1416_v7  ;;  %v730_v12 = vor.u32 %v728_v58, %v727_v4  ;;  %v2435_v19 = vpack.c.b16 %v639_v5, %v638_v2  ;;  %vm597_vm5 = vmand %vm576_vm8, %vm587_vm0  ;;  %vm791_vm6 = vcmask 1047552   ;;  %vm792_vm2 = vsmask.f32 7424 }
  0x36   : > { %v688_v18 = vor.u32 %v686_v63, %v685_v11  ;;  %v765_v11 = vrot.slane %v686_v63, 1  ;;  %vm1536_vm3 = vcmask 64512   ;;  %vm1574_vm10 = vcmask 57344  }
  0x37   : > { %v759_v22 = vsel %vm2298_vm9, 0, %v730_v12  ;;  %v669_v26 = vshrl.u32 %v2435_v19, 16  ;;  %v672_v29 = vshll.u32 %v2435_v19, 16 }
  0x38   : > { %v753_v23 = vsel %vm2298_vm9, 0, %v688_v18 }
  0x39   : > { %v671_v27 = vrot.slane %v669_v26, 7  ;;  %v761_v57 = vrot.slane %v672_v29, 1 }
  0x3a   : > { %1895 = vmatmul.msk.bf16.gmra.mxu1 %vm807_vm7, %v755_v17 }
  0x3b   : > { %1897 = vmatmul.msk.bf16.gmra.mxu2 %vm807_vm7, %v757_v21  ;;  %v674_v30 = vor.u32 %v672_v29, %v671_v27  ;;  %v766_v27 = vor.u32 %v765_v11, %v683_v62 }
  0x3c   : > { %1899 = vmatmul.msk.bf16.gmra.mxu3 %vm807_vm7, %v759_v22 }
  0x3d   : > { %v751_v31 = vsel %vm2298_vm9, 0, %v674_v30 }
  0x3e   : > { %1893 = vmatmul.msk.bf16.gmra.mxu0 %vm807_vm7, %v753_v23 }
  0x4a   : > { %1900 = vmatmul.msk.bf16.vlgmr.msrb.gmra.mxu1 %vm807_vm7, %v751_v31 }
  0x4b   : > { %1909 = vmatmul.msk.bf16.vlgmr.msrb.gmra.mxu2 %vm807_vm7, %v753_v23 }
  0x4c   : > { %1918 = vmatmul.msk.bf16.vlgmr.msrb.gmra.mxu3 %vm807_vm7, %v2435_v19 }
  0x4e   : > { %1927 = vmatmul.msk.bf16.vlgmr.msrb.gmra.mxu0 %vm807_vm7, %v2290_v56 }
  0x5a   : > { %1901 = vmatmul.msk.bf16.gmra.mxu1 %vm807_vm7, %v752_v28  ;;  %v558_v28 = vld [vmem:[%s508_s21 + $0x4] sm:$0xf] }
  0x5b   : > { %1910 = vmatmul.msk.bf16.gmra.mxu2 %vm807_vm7, %v2333_v9  ;;  %v617_v33 = vsel %vm597_vm5, %v558_v28, 0 }
  0x5c   : > { %1919 = vmatmul.msk.bf16.gmra.mxu3 %vm807_vm7, %v2290_v56  ;;  %v657_v36 = vunpack.c.l.b16 %v617_v33 }
  0x5e   : > { %1928 = vmatmul.msk.bf16.gmra.mxu0 %vm807_vm7, %v2406_v47 }
  0x6a   : > { %1902 = vmatmul.msk.bf16.gmra.mxu1 %vm807_vm7, %v753_v23 }
  0x6b   : > { %1911 = vmatmul.msk.bf16.gmra.mxu2 %vm807_vm7, %v755_v17 }
  0x6c   : > { %1920 = vmatmul.msk.bf16.gmra.mxu3 %vm807_vm7, %v2406_v47 }
  0x6e   : > { %1929 = vmatmul.msk.bf16.gmra.mxu0 %vm807_vm7, %v2245_v32 }
  0x7a   : > { %1903 = vmatmul.msk.bf16.gmra.mxu1 %vm807_vm7, %v2333_v9  ;;  %v557_v9 = vld [vmem:[%s508_s21] sm:$0xf] }
  0x7b   : > { %1912 = vmatmul.msk.bf16.gmra.mxu2 %vm807_vm7, %v2345_v13 }
  0x7c   : > { %1921 = vmatmul.msk.bf16.gmra.mxu3 %vm807_vm7, %v2245_v32 }
  0x7e   : > { %1930 = vmatmul.msk.bf16.gmra.mxu0 %vm807_vm7, %v2319_v3 }
  0x8a   : > { %1904 = vmatmul.msk.bf16.gmra.mxu1 %vm807_vm7, %v755_v17  ;;  %v762_v17 = vor.u32 %v761_v57, %v669_v26 }
  0x8b   : > { %1913 = vmatmul.msk.bf16.gmra.mxu2 %vm807_vm7, %v757_v21 }
  0x8c   : > { %1922 = vmatmul.msk.bf16.gmra.mxu3 %vm807_vm7, %v2319_v3 }
  0x8e   : > { %1931 = vmatmul.msk.bf16.gmra.mxu0 %vm807_vm7, %v2258_v38 }
  0x9a   : > { %1905 = vmatmul.msk.bf16.gmra.mxu1 %vm807_vm7, %v2345_v13  ;;  %v616_v13 = vsel %vm597_vm5, %v557_v9, 0 }
  0x9b   : > { %1914 = vmatmul.msk.bf16.gmra.mxu2 %vm807_vm7, %v2367_v20  ;;  %v656_v34 = vunpack.c.l.b16 %v616_v13 }
  0x9c   : > { %1923 = vmatmul.msk.bf16.gmra.mxu3 %vm807_vm7, %v2258_v38 }
  0x9d   : > { %v2506_v39 = vpack.c.b16 %v657_v36, %v656_v34 }
  0x9e   : > { %1932 = vmatmul.msk.bf16.gmra.mxu0 %vm807_vm7, %v2348_v16 }
  0x9f   : > { %v732_v15 = vshrl.u32 %v2506_v39, 16  ;;  %v735_v51 = vshll.u32 %v2506_v39, 16 }
  0xa1   : > { %v734_v48 = vrot.slane %v732_v15, 7 }
  0xa3   : > { %v737_v59 = vor.u32 %v735_v51, %v734_v48 }
  0xa5   : > { %v760_v4 = vsel %vm2298_vm9, 0, %v737_v59  ;;  %vm2555_vm9 = vmand %vm791_vm6, %vm792_vm2 }
  0xa6   : > { %v794_v19 = vsel %vm2555_vm9, %v762_v17, 0 }
  0xa7   : > { %v2504_v37 = vpop.f32.mrf.mxu1 }
  0xaa   : > { %1906 = vmatmul.msk.bf16.gmra.mxu1 %vm807_vm7, %v757_v21 }
  0xab   : > { %v845_v10 = vpop.f32.mrf.mxu0  ;;  %1915 = vmatmul.msk.bf16.gmra.mxu2 %vm807_vm7, %v759_v22 }
  0xac   : > { %1924 = vmatmul.msk.bf16.gmra.mxu3 %vm807_vm7, %v2348_v16 }
  0xae   : > { %1933 = vmatmul.msk.bf16.gmra.mxu0 %vm807_vm7, %v2266_v44  ;;  %v2515_v40 = vpop.f32.mrf.mxu2 }
  0xaf   : > { %v2517_v45 = vpop.f32.mrf.mxu3  ;;  %v2519_v46 = vpop.f32.mrf.mxu1 }
  0xb3   : > { %v847_v52 = vpop.f32.mrf.mxu0 }
  0xb6   : > { %v2526_v60 = vpop.f32.mrf.mxu2 }
  0xb7   : > { %v2528_v61 = vpop.f32.mrf.mxu3  ;;  %v2530_v2 = vpop.f32.mrf.mxu1 }
  0xba   : > { %1907 = vmatmul.msk.bf16.gmra.mxu1 %vm807_vm7, %v2367_v20  ;;  %v763_v20 = vrot.slane %v679_v1, 1 }
  0xbb   : > { %v850_v5 = vpop.f32.mrf.mxu0  ;;  %1916 = vmatmul.msk.bf16.gmra.mxu2 %vm807_vm7, %v760_v4 }
  0xbc   : > { %1925 = vmatmul.msk.bf16.gmra.mxu3 %vm807_vm7, %v2266_v44  ;;  %v764_v21 = vor.u32 %v763_v20, %v676_v0  ;;  %v796_v0 = vsel %vm2555_vm9, %v766_v27, 0 }
  0xbe   : > { %1934 = vmatmul.msk.bf16.gmra.mxu0 %vm807_vm7, %v2399_v41  ;;  %v2541_v6 = vpop.f32.mrf.mxu2  ;;  %v795_v26 = vsel %vm2555_vm9, %v764_v21, 0 }
  0xbf   : > { %v2543_v7 = vpop.f32.mrf.mxu3  ;;  %v2545_v8 = vpop.f32.mrf.mxu1 }
  0xc3   : > { %v852_v12 = vpop.f32.mrf.mxu0 }
  0xc6   : > { %v2561_v22 = vpop.f32.mrf.mxu2 }
  0xc7   : > { %v2563_v23 = vpop.f32.mrf.mxu3  ;;  %v900_v1 = vpop.f32.mrf.mxu1 }
  0xc8   : > { %v901_v63 = vadd.f32 %v900_v1, %v845_v10 }
  0xca   : > { %1936 = vmatmul.msk.bf16.vlgmr.msra.gmra.mxu1 %vm807_vm7, %v2406_v47  ;;  %v767_v47 = vrot.slane %v693_v43, 1 }
  0xcb   : > { %v1115_v56 = vpop.f32.mrf.mxu0  ;;  %1945 = vmatmul.msk.bf16.vlgmr.msra.gmra.mxu2 %vm807_vm7, %v794_v19 }
  0xcc   : > { %1954 = vmatmul.msk.bf16.vlgmr.msra.gmra.mxu3 %vm807_vm7, %v795_v26  ;;  %v768_v59 = vor.u32 %v767_v47, %v690_v42 }
  0xce   : > { %1963 = vmatmul.msk.bf16.vlgmr.msra.gmra.mxu0 %vm807_vm7, %v796_v0  ;;  %v957_v62 = vpop.f32.mrf.mxu2  ;;  %v797_v43 = vsel %vm2555_vm9, %v768_v59, 0 }
  0xcf   : > { %v997_v29 = vadd.f32 %v957_v62, %v901_v63  ;;  %v1043_v30 = vpop.f32.mrf.mxu3  ;;  %v902_v31 = vpop.f32.mrf.mxu1 }
  0xd0   : > { %v903_v9 = vadd.f32 %v902_v31, %v847_v52 }
  0xd1   : > { %v1083_v28 = vadd.f32 %v1043_v30, %v997_v29 }
  0xd3   : > { %v1117_v13 = vpop.f32.mrf.mxu0  ;;  %v2580_v33 = vadd.f32 %v1115_v56, %v1083_v28 }
  0xd6   : > { %v959_v34 = vpop.f32.mrf.mxu2 }
  0xd7   : > { %v998_v36 = vadd.f32 %v959_v34, %v903_v9  ;;  %v1045_v10 = vpop.f32.mrf.mxu3  ;;  %v905_v48 = vpop.f32.mrf.mxu1 }
  0xd8   : > { %v906_v4 = vadd.f32 %v905_v48, %v850_v5 }
  0xd9   : > { %v1084_v57 = vadd.f32 %v1045_v10, %v998_v36 }
  0xda   : > { %1937 = vmatmul.msk.bf16.gmra.mxu1 %vm807_vm7, %v2245_v32  ;;  %v769_v32 = vrot.slane %v700_v24, 1 }
  0xdb   : > { %v1120_v52 = vpop.f32.mrf.mxu0  ;;  %1946 = vmatmul.msk.bf16.gmra.mxu2 %vm807_vm7, %v795_v26  ;;  %v2589_v20 = vadd.f32 %v1117_v13, %v1084_v57 }
  0xdc   : > { %1955 = vmatmul.msk.bf16.gmra.mxu3 %vm807_vm7, %v796_v0  ;;  %v770_v29 = vor.u32 %v769_v32, %v697_v14 }
  0xde   : > { %1964 = vmatmul.msk.bf16.gmra.mxu0 %vm807_vm7, %v797_v43  ;;  %v962_v11 = vpop.f32.mrf.mxu2  ;;  %v798_v24 = vsel %vm2555_vm9, %v770_v29, 0 }
  0xdf   : > { %v999_v17 = vadd.f32 %v962_v11, %v906_v4  ;;  %v1048_v42 = vpop.f32.mrf.mxu3  ;;  %v907_v5 = vpop.f32.mrf.mxu1 }
  0xe0   : > { %v908_v21 = vadd.f32 %v907_v5, %v852_v12 }
  0xe1   : > { %v1085_v1 = vadd.f32 %v1048_v42, %v999_v17 }
  0xe3   : > { %v1122_v27 = vpop.f32.mrf.mxu0  ;;  %v2595_v63 = vadd.f32 %v1120_v52, %v1085_v1 }
  0xe6   : > { %v964_v19 = vpop.f32.mrf.mxu2 }
  0xe7   : > { %v1000_v26 = vadd.f32 %v964_v19, %v908_v21  ;;  %v1050_v56 = vpop.f32.mrf.mxu3  ;;  %v910_v62 = vpop.f32.mrf.mxu1 }
  0xe8   : > { %v911_v30 = vadd.f32 %v910_v62, %v2504_v37 }
  0xe9   : > { %v1086_v31 = vadd.f32 %v1050_v56, %v1000_v26 }
  0xea   : > { %1938 = vmatmul.msk.bf16.gmra.mxu1 %vm807_vm7, %v2319_v3 }
  0xeb   : > { %v1125_v12 = vpop.f32.mrf.mxu0  ;;  %1947 = vmatmul.msk.bf16.gmra.mxu2 %vm807_vm7, %v796_v0  ;;  %v2605_v9 = vadd.f32 %v1122_v27, %v1086_v31  ;;  %v771_v0 = vrot.slane %v707_v50, 1 }
  0xec   : > { %1956 = vmatmul.msk.bf16.gmra.mxu3 %vm807_vm7, %v797_v43 }
  0xed   : > { %v772_v57 = vor.u32 %v771_v0, %v704_v49 }
  0xee   : > { %1965 = vmatmul.msk.bf16.gmra.mxu0 %vm807_vm7, %v798_v24  ;;  %v967_v28 = vpop.f32.mrf.mxu2 }
  0xef   : > { %v1001_v14 = vadd.f32 %v967_v28, %v911_v30  ;;  %v1053_v13 = vpop.f32.mrf.mxu3  ;;  %v912_v37 = vpop.f32.mrf.mxu1  ;;  %v799_v50 = vsel %vm2555_vm9, %v772_v57, 0 }
  0xf0   : > { %v913_v47 = vadd.f32 %v912_v37, %v2519_v46 }
  0xf1   : > { %v1087_v34 = vadd.f32 %v1053_v13, %v1001_v14 }
  0xf3   : > { %v1127_v3 = vpop.f32.mrf.mxu0  ;;  %v2612_v36 = vadd.f32 %v1125_v12, %v1087_v34 }
  0xf6   : > { %v969_v10 = vpop.f32.mrf.mxu2 }
  0xf7   : > { %v1002_v48 = vadd.f32 %v969_v10, %v913_v47  ;;  %v1055_v59 = vpop.f32.mrf.mxu3  ;;  %v915_v4 = vpop.f32.mrf.mxu1 }
  0xf8   : > { %v916_v52 = vadd.f32 %v915_v4, %v2530_v2 }
  0xf9   : > { %v1088_v11 = vadd.f32 %v1055_v59, %v1002_v48 }
  0xfa   : > { %1939 = vmatmul.msk.bf16.gmra.mxu1 %vm807_vm7, %v2258_v38 }
  0xfb   : > { %v1130_v46 = vpop.f32.mrf.mxu0  ;;  %1948 = vmatmul.msk.bf16.gmra.mxu2 %vm807_vm7, %v797_v43  ;;  %v2622_v17 = vadd.f32 %v1127_v3, %v1088_v11  ;;  %v773_v43 = vrot.slane %v714_v35, 1 }
  0xfc   : > { %1957 = vmatmul.msk.bf16.gmra.mxu3 %vm807_vm7, %v798_v24 }
  0xfd   : > { %v774_v62 = vor.u32 %v773_v43, %v711_v25 }
  0xfe   : > { %1966 = vmatmul.msk.bf16.gmra.mxu0 %vm807_vm7, %v799_v50  ;;  %v972_v42 = vpop.f32.mrf.mxu2 }
  0xff   : > { %v1003_v49 = vadd.f32 %v972_v42, %v916_v52  ;;  %v1058_v5 = vpop.f32.mrf.mxu3  ;;  %v917_v2 = vpop.f32.mrf.mxu1 }
 0x100   : > { %v918_v21 = vadd.f32 %v917_v2, %v2545_v8  ;;  %v800_v8 = vsel %vm2555_vm9, %v774_v62, 0 }
 0x101   : > { %v1089_v1 = vadd.f32 %v1058_v5, %v1003_v49 }
 0x103   : > { %v1132_v38 = vpop.f32.mrf.mxu0  ;;  %v2629_v27 = vadd.f32 %v1130_v46, %v1089_v1 }
 0x106   : > { %v974_v32 = vpop.f32.mrf.mxu2 }
 0x107   : > { %v1004_v19 = vadd.f32 %v974_v32, %v918_v21  ;;  %v1060_v26 = vpop.f32.mrf.mxu3  ;;  %v920_v56 = vpop.f32.mrf.mxu1 }
 0x108   : > { %v921_v31 = vadd.f32 %v920_v56, %v2515_v40 }
 0x109   : > { %v1090_v29 = vadd.f32 %v1060_v26, %v1004_v19 }
 0x10a   : > { %1940 = vmatmul.msk.bf16.gmra.mxu1 %vm807_vm7, %v2348_v16 }
 0x10b   : > { %v1135_v30 = vpop.f32.mrf.mxu0  ;;  %1949 = vmatmul.msk.bf16.gmra.mxu2 %vm807_vm7, %v798_v24  ;;  %v2638_v35 = vadd.f32 %v1132_v38, %v1090_v29  ;;  %v775_v24 = vrot.slane %v721_v55, 1  ;;  %v779_v29 = vrot.slane %v735_v51, 1 }
 0x10c   : > { %1958 = vmatmul.msk.bf16.gmra.mxu3 %vm807_vm7, %v799_v50 }
 0x10d   : > { %v776_v40 = vor.u32 %v775_v24, %v718_v54 }
 0x10e   : > { %1967 = vmatmul.msk.bf16.gmra.mxu0 %vm807_vm7, %v800_v8  ;;  %v977_v12 = vpop.f32.mrf.mxu2 }
 0x10f   : > { %v1005_v25 = vadd.f32 %v977_v12, %v921_v31  ;;  %v1063_v28 = vpop.f32.mrf.mxu3  ;;  %v922_v14 = vpop.f32.mrf.mxu1  ;;  %v801_v55 = vsel %vm2555_vm9, %v776_v40, 0 }
 0x110   : > { %v923_v47 = vadd.f32 %v922_v14, %v2526_v60 }
 0x111   : > { %v1091_v13 = vadd.f32 %v1063_v28, %v1005_v25 }
 0x113   : > { %v1137_v16 = vpop.f32.mrf.mxu0  ;;  %v2645_v37 = vadd.f32 %v1135_v30, %v1091_v13 }
 0x116   : > { %v979_v34 = vpop.f32.mrf.mxu2 }
 0x117   : > { %v1006_v3 = vadd.f32 %v979_v34, %v923_v47  ;;  %v1065_v0 = vpop.f32.mrf.mxu3  ;;  %v925_v10 = vpop.f32.mrf.mxu1 }
 0x118   : > { %v926_v60 = vadd.f32 %v925_v10, %v2541_v6 }
 0x119   : > { %v1092_v48 = vadd.f32 %v1065_v0, %v1006_v3 }
 0x11a   : > { %1941 = vmatmul.msk.bf16.gmra.mxu1 %vm807_vm7, %v2266_v44 }
 0x11b   : > { %v1140_v59 = vpop.f32.mrf.mxu0  ;;  %1950 = vmatmul.msk.bf16.gmra.mxu2 %vm807_vm7, %v799_v50  ;;  %v2655_v4 = vadd.f32 %v1137_v16, %v1092_v48  ;;  %v777_v50 = vrot.slane %v728_v58, 1 }
 0x11c   : > { %1959 = vmatmul.msk.bf16.gmra.mxu3 %vm807_vm7, %v800_v8 }
 0x11d   : > { %v778_v6 = vor.u32 %v777_v50, %v725_v53 }
 0x11e   : > { %1968 = vmatmul.msk.bf16.gmra.mxu0 %vm807_vm7, %v801_v55  ;;  %v982_v57 = vpop.f32.mrf.mxu2 }
 0x11f   : > { %v1007_v54 = vadd.f32 %v982_v57, %v926_v60  ;;  %v1068_v52 = vpop.f32.mrf.mxu3  ;;  %v927_v11 = vpop.f32.mrf.mxu1  ;;  %v802_v58 = vsel %vm2555_vm9, %v778_v6, 0 }
 0x120   : > { %v928_v49 = vadd.f32 %v927_v11, %v2561_v22 }
 0x121   : > { %v1093_v46 = vadd.f32 %v1068_v52, %v1007_v54 }
 0x123   : > { %v1142_v44 = vpop.f32.mrf.mxu0  ;;  %v2662_v42 = vadd.f32 %v1140_v59, %v1093_v46 }
 0x126   : > { %v984_v5 = vpop.f32.mrf.mxu2 }
 0x127   : > { %v1008_v2 = vadd.f32 %v984_v5, %v928_v49  ;;  %v1070_v21 = vpop.f32.mrf.mxu3  ;;  %v930_v1 = vpop.f32.mrf.mxu1 }
 0x128   : > { %v931_v22 = vadd.f32 %v930_v1, %v2517_v45  ;;  %v780_v45 = vor.u32 %v779_v29, %v732_v15 }
 0x129   : > { %v1094_v38 = vadd.f32 %v1070_v21, %v1008_v2 }
 0x12a   : > { %1942 = vmatmul.msk.bf16.gmra.mxu1 %vm807_vm7, %v2399_v41  ;;  %v803_v51 = vsel %vm2555_vm9, %v780_v45, 0 }
 0x12b   : > { %v1145_v43 = vpop.f32.mrf.mxu0  ;;  %1951 = vmatmul.msk.bf16.gmra.mxu2 %vm807_vm7, %v800_v8  ;;  %v2672_v32 = vadd.f32 %v1142_v44, %v1094_v38 }
 0x12c   : > { %1960 = vmatmul.msk.bf16.gmra.mxu3 %vm807_vm7, %v801_v55 }
 0x12e   : > { %1969 = vmatmul.msk.bf16.gmra.mxu0 %vm807_vm7, %v802_v58  ;;  %v987_v19 = vpop.f32.mrf.mxu2 }
 0x12f   : > { %v1009_v53 = vadd.f32 %v987_v19, %v931_v22  ;;  %v1073_v26 = vpop.f32.mrf.mxu3  ;;  %v932_v56 = vpop.f32.mrf.mxu1 }
 0x130   : > { %v933_v8 = vadd.f32 %v932_v56, %v2528_v61 }
 0x131   : > { %v1095_v62 = vadd.f32 %v1073_v26, %v1009_v53 }
 0x133   : > { %v1147_v41 = vpop.f32.mrf.mxu0  ;;  %v2679_v30 = vadd.f32 %v1145_v43, %v1095_v62 }
 0x136   : > { %v989_v31 = vpop.f32.mrf.mxu2 }
 0x137   : > { %v1010_v12 = vadd.f32 %v989_v31, %v933_v8  ;;  %v1075_v25 = vpop.f32.mrf.mxu3  ;;  %v935_v28 = vpop.f32.mrf.mxu1 }
 0x138   : > { %v936_v61 = vadd.f32 %v935_v28, %v2543_v7 }
 0x139   : > { %v1096_v14 = vadd.f32 %v1075_v25, %v1010_v12 }
 0x13a   : > { %1943 = vmatmul.msk.bf16.gmra.mxu1 %vm807_vm7, %v2506_v39 }
 0x13b   : > { %v1150_v13 = vpop.f32.mrf.mxu0  ;;  %1952 = vmatmul.msk.bf16.gmra.mxu2 %vm807_vm7, %v801_v55  ;;  %v2689_v16 = vadd.f32 %v1147_v41, %v1096_v14 }
 0x13c   : > { %1961 = vmatmul.msk.bf16.gmra.mxu3 %vm807_vm7, %v802_v58 }
 0x13e   : > { %1970 = vmatmul.msk.bf16.gmra.mxu0 %vm807_vm7, %v803_v51  ;;  %v992_v24 = vpop.f32.mrf.mxu2  ;;  %vm1519_vm7 = vcmask 60416  }
 0x13f   : > { %v1011_v15 = vadd.f32 %v992_v24, %v936_v61  ;;  %v1078_v47 = vpop.f32.mrf.mxu3  ;;  %v937_v34 = vpop.f32.mrf.mxu1 }
 0x140   : > { %v938_v10 = vadd.f32 %v937_v34, %v2563_v23  ;;  %v2703_v23 = vld [vmem:[%s2837_s6] ss:$0 sm:$0xff] }
 0x141   : > { %v1097_v3 = vadd.f32 %v1078_v47, %v1011_v15 }
 0x143   : > { %v1152_v39 = vpop.f32.mrf.mxu0  ;;  %v2694_v0 = vadd.f32 %v1150_v13, %v1097_v3 }
 0x146   : > { %v994_v18 = vpop.f32.mrf.mxu2 }
 0x147   : > { %v1012_v40 = vadd.f32 %v994_v18, %v938_v10  ;;  %v1080_v48 = vpop.f32.mrf.mxu3  ;;  %v1187_v59 = vpop.f32.mrf.mxu1 }
 0x148   : > { %v1227_v57 = vadd.f32 %v1187_v59, %v2580_v33 }
 0x149   : > { %v1098_v55 = vadd.f32 %v1080_v48, %v1012_v40 }
 0x14b   : > { %v1427_v60 = vpop.f32.mrf.mxu0  ;;  %v2697_v7 = vadd.f32 %v1152_v39, %v1098_v55 }
 0x14e   : > { %v1281_v54 = vpop.f32.mrf.mxu2 }
 0x14f   : > { %v1321_v52 = vadd.f32 %v1281_v54, %v1227_v57  ;;  %v1354_v11 = vpop.f32.mrf.mxu3  ;;  %v1189_v46 = vpop.f32.mrf.mxu1 }
 0x150   : > { %v1228_v2 = vadd.f32 %v1189_v46, %v2589_v20 }
 0x151   : > { %v1394_v44 = vadd.f32 %v1354_v11, %v1321_v52 }
 0x153   : > { %v1467_v50 = vadd.f32 %v1427_v60, %v1394_v44  ;;  %v1429_v49 = vpop.f32.mrf.mxu0 }
 0x155   : > { %v1487_v5 = vadd.f32 %v2703_v23, %v1467_v50 }
 0x156   : > { %v1283_v33 = vpop.f32.mrf.mxu2 }
 0x157   : > { %v1503_v21 = vpack.c.bf16 %v1487_v5, %v1487_v5  ;;  %v1322_v1 = vadd.f32 %v1283_v33, %v1228_v2  ;;  %v1356_v6 = vpop.f32.mrf.mxu3  ;;  %v1192_v38 = vpop.f32.mrf.mxu1  ;;  %v1576_v22 = vmul.f32 %v1487_v5, %v1487_v5  ;;  %v1537_v26 = vsel %vm1536_vm3, %v1487_v5, 0.0 }
 0x158   : > { %v1229_v53 = vadd.f32 %v1192_v38, %v2595_v63 }
 0x159   : > { %1520 = vst.msk [vmem:[%s2712_s25] sm:$0xf] %vm1519_vm7, %v1503_v21  ;;  %v1395_v43 = vadd.f32 %v1356_v6, %v1322_v1  ;;  %v1592_v28 = vsel %vm1536_vm3, %v1576_v22, 0.0 }
 0x15b   : > { %v1468_v58 = vadd.f32 %v1429_v49, %v1395_v43  ;;  %v1432_v20 = vpop.f32.mrf.mxu0 }
 0x15d   : > { %v1488_v19 = vadd.f32 %v2703_v23, %v1468_v58 }
 0x15e   : > { %v1286_v56 = vpop.f32.mrf.mxu2 }
 0x15f   : > { %v1504_v62 = vpack.c.bf16 %v1488_v19, %v1488_v19  ;;  %v1538_v41 = vsel %vm1536_vm3, %v1488_v19, 0.0  ;;  %v1577_v29 = vmul.f32 %v1488_v19, %v1488_v19  ;;  %v1323_v8 = vadd.f32 %v1286_v56, %v1229_v53  ;;  %v1359_v31 = vpop.f32.mrf.mxu3  ;;  %v1194_v12 = vpop.f32.mrf.mxu1 }
 0x160   : > { %v1539_v25 = vadd.f32 %v1538_v41, %v1537_v26  ;;  %v1230_v24 = vadd.f32 %v1194_v12, %v2605_v9 }
 0x161   : > { %1521 = vst.msk [vmem:[%s2712_s25 + $0x4] sm:$0xf] %vm1519_vm7, %v1504_v62  ;;  %v1593_v45 = vsel %vm1536_vm3, %v1577_v29, 0.0  ;;  %v1396_v14 = vadd.f32 %v1359_v31, %v1323_v8 }
 0x162   : > { %v1594_v63 = vadd.f32 %v1593_v45, %v1592_v28 }
 0x163   : > { %v1469_v13 = vadd.f32 %v1432_v20, %v1396_v14  ;;  %v1434_v51 = vpop.f32.mrf.mxu0 }
 0x165   : > { %v1489_v61 = vadd.f32 %v2703_v23, %v1469_v13 }
 0x166   : > { %v1288_v15 = vpop.f32.mrf.mxu2 }
 0x167   : > { %v1505_v47 = vpack.c.bf16 %v1489_v61, %v1489_v61  ;;  %v1540_v34 = vsel %vm1536_vm3, %v1489_v61, 0.0  ;;  %v1578_v3 = vmul.f32 %v1489_v61, %v1489_v61  ;;  %v1324_v39 = vadd.f32 %v1288_v15, %v1230_v24  ;;  %v1361_v10 = vpop.f32.mrf.mxu3  ;;  %v1197_v18 = vpop.f32.mrf.mxu1 }
 0x168   : > { %v1541_v40 = vadd.f32 %v1540_v34, %v1539_v25  ;;  %v1231_v54 = vadd.f32 %v1197_v18, %v2612_v36 }
 0x169   : > { %1522 = vst.msk [vmem:[%s2712_s25 + $0x8] sm:$0xf] %vm1519_vm7, %v1505_v47  ;;  %v1595_v48 = vsel %vm1536_vm3, %v1578_v3, 0.0  ;;  %v1397_v59 = vadd.f32 %v1361_v10, %v1324_v39 }
 0x16a   : > { %v1596_v55 = vadd.f32 %v1595_v48, %v1594_v63 }
 0x16b   : > { %v1470_v60 = vadd.f32 %v1434_v51, %v1397_v59  ;;  %v1437_v57 = vpop.f32.mrf.mxu0 }
 0x16d   : > { %v1490_v9 = vadd.f32 %v2703_v23, %v1470_v60 }
 0x16e   : > { %v1291_v52 = vpop.f32.mrf.mxu2 }
 0x16f   : > { %v1506_v11 = vpack.c.bf16 %v1490_v9, %v1490_v9  ;;  %v1542_v46 = vsel %vm1536_vm3, %v1490_v9, 0.0  ;;  %v1579_v44 = vmul.f32 %v1490_v9, %v1490_v9  ;;  %v1325_v50 = vadd.f32 %v1291_v52, %v1231_v54  ;;  %v1364_v49 = vpop.f32.mrf.mxu3  ;;  %v1199_v5 = vpop.f32.mrf.mxu1 }
 0x170   : > { %v1543_v2 = vadd.f32 %v1542_v46, %v1541_v40  ;;  %v1232_v43 = vadd.f32 %v1199_v5, %v2622_v17 }
 0x171   : > { %1523 = vst.msk [vmem:[%s2712_s25 + $0xc] sm:$0xf] %vm1519_vm7, %v1506_v11  ;;  %v1597_v33 = vsel %vm1536_vm3, %v1579_v44, 0.0  ;;  %v1398_v21 = vadd.f32 %v1364_v49, %v1325_v50 }
 0x172   : > { %v1598_v1 = vadd.f32 %v1597_v33, %v1596_v55 }
 0x173   : > { %v1471_v6 = vadd.f32 %v1437_v57, %v1398_v21  ;;  %v1439_v38 = vpop.f32.mrf.mxu0 }
 0x175   : > { %v1491_v36 = vadd.f32 %v2703_v23, %v1471_v6 }
 0x176   : > { %v1293_v58 = vpop.f32.mrf.mxu2 }
 0x177   : > { %v1507_v20 = vpack.c.bf16 %v1491_v36, %v1491_v36  ;;  %v1544_v22 = vsel %vm1536_vm3, %v1491_v36, 0.0  ;;  %v1580_v19 = vmul.f32 %v1491_v36, %v1491_v36  ;;  %v1326_v53 = vadd.f32 %v1293_v58, %v1232_v43  ;;  %v1366_v26 = vpop.f32.mrf.mxu3  ;;  %v1202_v56 = vpop.f32.mrf.mxu1 }
 0x178   : > { %v1545_v62 = vadd.f32 %v1544_v22, %v1543_v2  ;;  %v1233_v25 = vadd.f32 %v1202_v56, %v2629_v27 }
 0x179   : > { %1524 = vst.msk [vmem:[%s2712_s25 + $0x10] sm:$0xf] %vm1519_vm7, %v1507_v20  ;;  %v1599_v41 = vsel %vm1536_vm3, %v1580_v19, 0.0  ;;  %v1399_v29 = vadd.f32 %v1366_v26, %v1326_v53 }
 0x17a   : > { %v1600_v8 = vadd.f32 %v1599_v41, %v1598_v1 }
 0x17b   : > { %v1472_v31 = vadd.f32 %v1439_v38, %v1399_v29  ;;  %v1442_v12 = vpop.f32.mrf.mxu0 }
 0x17d   : > { %v1492_v17 = vadd.f32 %v2703_v23, %v1472_v31 }
 0x17e   : > { %v1296_v28 = vpop.f32.mrf.mxu2 }
 0x17f   : > { %v1508_v45 = vpack.c.bf16 %v1492_v17, %v1492_v17  ;;  %v1546_v14 = vsel %vm1536_vm3, %v1492_v17, 0.0  ;;  %v1581_v63 = vmul.f32 %v1492_v17, %v1492_v17  ;;  %v1327_v13 = vadd.f32 %v1296_v28, %v1233_v25  ;;  %v1369_v51 = vpop.f32.mrf.mxu3  ;;  %v1204_v61 = vpop.f32.mrf.mxu1 }
 0x180   : > { %v1547_v24 = vadd.f32 %v1546_v14, %v1545_v62  ;;  %v1234_v10 = vadd.f32 %v1204_v61, %v2638_v35 }
 0x181   : > { %1525 = vst.msk [vmem:[%s2712_s25 + $0x14] sm:$0xf] %vm1519_vm7, %v1508_v45  ;;  %v1601_v15 = vsel %vm1536_vm3, %v1581_v63, 0.0  ;;  %v1400_v47 = vadd.f32 %v1369_v51, %v1327_v13 }
 0x182   : > { %v1602_v34 = vadd.f32 %v1601_v15, %v1600_v8 }
 0x183   : > { %v1473_v3 = vadd.f32 %v1442_v12, %v1400_v47  ;;  %v1444_v39 = vpop.f32.mrf.mxu0 }
 0x185   : > { %v1493_v27 = vadd.f32 %v2703_v23, %v1473_v3 }
 0x186   : > { %v1298_v18 = vpop.f32.mrf.mxu2 }
 0x187   : > { %v1509_v40 = vpack.c.bf16 %v1493_v27, %v1493_v27  ;;  %v1548_v48 = vsel %vm1536_vm3, %v1493_v27, 0.0  ;;  %v1582_v59 = vmul.f32 %v1493_v27, %v1493_v27  ;;  %v1328_v55 = vadd.f32 %v1298_v18, %v1234_v10  ;;  %v1371_v60 = vpop.f32.mrf.mxu3  ;;  %v1207_v57 = vpop.f32.mrf.mxu1 }
 0x188   : > { %v1549_v9 = vadd.f32 %v1548_v48, %v1547_v24  ;;  %v1235_v50 = vadd.f32 %v1207_v57, %v2645_v37 }
 0x189   : > { %1526 = vst.msk [vmem:[%s2712_s25 + $0x18] sm:$0xf] %vm1519_vm7, %v1509_v40  ;;  %v1603_v54 = vsel %vm1536_vm3, %v1582_v59, 0.0  ;;  %v1401_v52 = vadd.f32 %v1371_v60, %v1328_v55 }
 0x18a   : > { %v1604_v11 = vadd.f32 %v1603_v54, %v1602_v34 }
 0x18b   : > { %v1474_v46 = vadd.f32 %v1444_v39, %v1401_v52  ;;  %v1447_v44 = vpop.f32.mrf.mxu0 }
 0x18d   : > { %v1494_v35 = vadd.f32 %v2703_v23, %v1474_v46 }
 0x18e   : > { %v1301_v49 = vpop.f32.mrf.mxu2 }
 0x18f   : > { %v1510_v5 = vpack.c.bf16 %v1494_v35, %v1494_v35  ;;  %v1550_v2 = vsel %vm1536_vm3, %v1494_v35, 0.0  ;;  %v1583_v33 = vmul.f32 %v1494_v35, %v1494_v35  ;;  %v1329_v21 = vadd.f32 %v1301_v49, %v1235_v50  ;;  %v1374_v1 = vpop.f32.mrf.mxu3  ;;  %v1209_v6 = vpop.f32.mrf.mxu1 }
 0x190   : > { %v1551_v38 = vadd.f32 %v1550_v2, %v1549_v9  ;;  %v1236_v19 = vadd.f32 %v1209_v6, %v2655_v4 }
 0x191   : > { %1527 = vst.msk [vmem:[%s2712_s25 + $0x1c] sm:$0xf] %vm1519_vm7, %v1510_v5  ;;  %v1605_v36 = vsel %vm1536_vm3, %v1583_v33, 0.0  ;;  %v1402_v43 = vadd.f32 %v1374_v1, %v1329_v21 }
 0x192   : > { %v1606_v58 = vadd.f32 %v1605_v36, %v1604_v11 }
 0x193   : > { %v1475_v20 = vadd.f32 %v1447_v44, %v1402_v43  ;;  %v1449_v22 = vpop.f32.mrf.mxu0 }
 0x195   : > { %v1495_v37 = vadd.f32 %v2703_v23, %v1475_v20 }
 0x196   : > { %v1303_v53 = vpop.f32.mrf.mxu2 }
 0x197   : > { %v1511_v26 = vpack.c.bf16 %v1495_v37, %v1495_v37  ;;  %v1552_v56 = vsel %vm1536_vm3, %v1495_v37, 0.0  ;;  %v1584_v62 = vmul.f32 %v1495_v37, %v1495_v37  ;;  %v1330_v41 = vadd.f32 %v1303_v53, %v1236_v19  ;;  %v1376_v29 = vpop.f32.mrf.mxu3  ;;  %v1212_v8 = vpop.f32.mrf.mxu1 }
 0x198   : > { %v1553_v31 = vadd.f32 %v1552_v56, %v1551_v38  ;;  %v1237_v14 = vadd.f32 %v1212_v8, %v2662_v42 }
 0x199   : > { %1528 = vst.msk [vmem:[%s2712_s25 + $0x20] sm:$0xf] %vm1519_vm7, %v1511_v26  ;;  %v1607_v12 = vsel %vm1536_vm3, %v1584_v62, 0.0  ;;  %v1403_v17 = vadd.f32 %v1376_v29, %v1330_v41 }
 0x19a   : > { %v1608_v25 = vadd.f32 %v1607_v12, %v1606_v58 }
 0x19b   : > { %v1476_v28 = vadd.f32 %v1449_v22, %v1403_v17  ;;  %v1452_v45 = vpop.f32.mrf.mxu0 }
 0x19d   : > { %v1496_v4 = vadd.f32 %v2703_v23, %v1476_v28 }
 0x19e   : > { %v1306_v63 = vpop.f32.mrf.mxu2 }
 0x19f   : > { %v1512_v13 = vpack.c.bf16 %v1496_v4, %v1496_v4  ;;  %v1554_v51 = vsel %vm1536_vm3, %v1496_v4, 0.0  ;;  %v1585_v61 = vmul.f32 %v1496_v4, %v1496_v4  ;;  %v1331_v24 = vadd.f32 %v1306_v63, %v1237_v14  ;;  %v1379_v15 = vpop.f32.mrf.mxu3  ;;  %v1214_v47 = vpop.f32.mrf.mxu1 }
 0x1a0   : > { %v1555_v34 = vadd.f32 %v1554_v51, %v1553_v31  ;;  %v1238_v40 = vadd.f32 %v1214_v47, %v2672_v32 }
 0x1a1   : > { %1529 = vst.msk [vmem:[%s2712_s25 + $0x24] sm:$0xf] %vm1519_vm7, %v1512_v13  ;;  %v1609_v3 = vsel %vm1536_vm3, %v1585_v61, 0.0  ;;  %v1404_v39 = vadd.f32 %v1379_v15, %v1331_v24 }
 0x1a2   : > { %v1610_v27 = vadd.f32 %v1609_v3, %v1608_v25 }
 0x1a3   : > { %v1477_v10 = vadd.f32 %v1452_v45, %v1404_v39  ;;  %v1454_v18 = vpop.f32.mrf.mxu0 }
 0x1a5   : > { %v1497_v42 = vadd.f32 %v2703_v23, %v1477_v10 }
 0x1a6   : > { %v1308_v48 = vpop.f32.mrf.mxu2 }
 0x1a7   : > { %v1513_v59 = vpack.c.bf16 %v1497_v42, %v1497_v42  ;;  %v1556_v55 = vsel %vm1536_vm3, %v1497_v42, 0.0  ;;  %v1586_v60 = vmul.f32 %v1497_v42, %v1497_v42  ;;  %v1332_v57 = vadd.f32 %v1308_v48, %v1238_v40  ;;  %v1381_v9 = vpop.f32.mrf.mxu3  ;;  %v1217_v54 = vpop.f32.mrf.mxu1 }
 0x1a8   : > { %v1557_v52 = vadd.f32 %v1556_v55, %v1555_v34  ;;  %v1239_v49 = vadd.f32 %v1217_v54, %v2679_v30 }
 0x1a9   : > { %1530 = vst.msk [vmem:[%s2712_s25 + $0x28] sm:$0xf] %vm1519_vm7, %v1513_v59  ;;  %v1611_v11 = vsel %vm1536_vm3, %v1586_v60, 0.0  ;;  %v1405_v46 = vadd.f32 %v1381_v9, %v1332_v57 }
 0x1aa   : > { %v1612_v44 = vadd.f32 %v1611_v11, %v1610_v27 }
 0x1ab   : > { %v1478_v35 = vadd.f32 %v1454_v18, %v1405_v46  ;;  %v1457_v50 = vpop.f32.mrf.mxu0 }
 0x1ad   : > { %v1498_v32 = vadd.f32 %v2703_v23, %v1478_v35 }
 0x1ae   : > { %v1311_v5 = vpop.f32.mrf.mxu2 }
 0x1af   : > { %v1514_v2 = vpack.c.bf16 %v1498_v32, %v1498_v32  ;;  %v1558_v33 = vsel %vm1536_vm3, %v1498_v32, 0.0  ;;  %v1587_v21 = vmul.f32 %v1498_v32, %v1498_v32  ;;  %v1333_v1 = vadd.f32 %v1311_v5, %v1239_v49  ;;  %v1384_v6 = vpop.f32.mrf.mxu3  ;;  %v1219_v38 = vpop.f32.mrf.mxu1 }
 0x1b0   : > { %v1559_v36 = vadd.f32 %v1558_v33, %v1557_v52  ;;  %v1240_v30 = vadd.f32 %v1219_v38, %v2689_v16 }
 0x1b1   : > { %1531 = vst.msk [vmem:[%s2712_s25 + $0x2c] sm:$0xf] %vm1519_vm7, %v1514_v2  ;;  %v1613_v43 = vsel %vm1536_vm3, %v1587_v21, 0.0  ;;  %v1406_v58 = vadd.f32 %v1384_v6, %v1333_v1 }
 0x1b2   : > { %v1614_v20 = vadd.f32 %v1613_v43, %v1612_v44 }
 0x1b3   : > { %v1479_v22 = vadd.f32 %v1457_v50, %v1406_v58  ;;  %v1459_v19 = vpop.f32.mrf.mxu0 }
 0x1b5   : > { %v1499_v37 = vadd.f32 %v2703_v23, %v1479_v22 }
 0x1b6   : > { %v1313_v53 = vpop.f32.mrf.mxu2 }
 0x1b7   : > { %v1515_v26 = vpack.c.bf16 %v1499_v37, %v1499_v37  ;;  %v1560_v56 = vsel %vm1536_vm3, %v1499_v37, 0.0  ;;  %v1588_v62 = vmul.f32 %v1499_v37, %v1499_v37  ;;  %v1334_v41 = vadd.f32 %v1313_v53, %v1240_v30  ;;  %v1386_v29 = vpop.f32.mrf.mxu3  ;;  %v1222_v31 = vpop.f32.mrf.mxu1 }
 0x1b8   : > { %v1561_v8 = vadd.f32 %v1560_v56, %v1559_v36  ;;  %v1241_v45 = vadd.f32 %v1222_v31, %v2694_v0 }
 0x1b9   : > { %1532 = vst.msk [vmem:[%s2712_s25 + $0x30] sm:$0xf] %vm1519_vm7, %v1515_v26  ;;  %v1615_v12 = vsel %vm1536_vm3, %v1588_v62, 0.0  ;;  %v1407_v17 = vadd.f32 %v1386_v29, %v1334_v41 }
 0x1ba   : > { %v1616_v25 = vadd.f32 %v1615_v12, %v1614_v20 }
 0x1bb   : > { %v1480_v28 = vadd.f32 %v1459_v19, %v1407_v17  ;;  %v1462_v15 = vpop.f32.mrf.mxu0 }
 0x1bd   : > { %v1500_v16 = vadd.f32 %v2703_v23, %v1480_v28 }
 0x1be   : > { %v1316_v4 = vpop.f32.mrf.mxu2 }
 0x1bf   : > { %v1516_v14 = vpack.c.bf16 %v1500_v16, %v1500_v16  ;;  %v1562_v63 = vsel %vm1536_vm3, %v1500_v16, 0.0  ;;  %v1589_v13 = vmul.f32 %v1500_v16, %v1500_v16  ;;  %v1335_v51 = vadd.f32 %v1316_v4, %v1241_v45  ;;  %v1389_v61 = vpop.f32.mrf.mxu3  ;;  %v1224_v39 = vpop.f32.mrf.mxu1 }
 0x1c0   : > { %v1563_v24 = vadd.f32 %v1562_v63, %v1561_v8  ;;  %v1242_v10 = vadd.f32 %v1224_v39, %v2697_v7 }
 0x1c1   : > { %1533 = vst.msk [vmem:[%s2712_s25 + $0x34] sm:$0xf] %vm1519_vm7, %v1516_v14  ;;  %v1617_v47 = vsel %vm1536_vm3, %v1589_v13, 0.0  ;;  %v1408_v34 = vadd.f32 %v1389_v61, %v1335_v51 }
 0x1c2   : > { %v1618_v3 = vadd.f32 %v1617_v47, %v1616_v25 }
 0x1c3   : > { %v1481_v27 = vadd.f32 %v1462_v15, %v1408_v34  ;;  %v1464_v52 = vpop.f32.mrf.mxu0 }
 0x1c5   : > { %v1501_v0 = vadd.f32 %v2703_v23, %v1481_v27 }
 0x1c6   : > { %v1318_v18 = vpop.f32.mrf.mxu2 }
 0x1c7   : > { %v1517_v42 = vpack.c.bf16 %v1501_v0, %v1501_v0  ;;  %v1564_v40 = vsel %vm1536_vm3, %v1501_v0, 0.0  ;;  %v1590_v48 = vmul.f32 %v1501_v0, %v1501_v0  ;;  %v1336_v59 = vadd.f32 %v1318_v18, %v1242_v10  ;;  %v1391_v60 = vpop.f32.mrf.mxu3 }
 0x1c8   : > { %v1565_v55 = vadd.f32 %v1564_v40, %v1563_v24 }
 0x1c9   : > { %1534 = vst.msk [vmem:[%s2712_s25 + $0x38] sm:$0xf] %vm1519_vm7, %v1517_v42  ;;  %v1619_v57 = vsel %vm1536_vm3, %v1590_v48, 0.0  ;;  %v1409_v9 = vadd.f32 %v1391_v60, %v1336_v59 }
 0x1ca   : > { %v1620_v54 = vadd.f32 %v1619_v57, %v1618_v3 }
 0x1cb   : > { %v1482_v7 = vadd.f32 %v1464_v52, %v1409_v9 }
 0x1cd   : > { %v1502_v11 = vadd.f32 %v2703_v23, %v1482_v7 }
 0x1cf   : > { %v1518_v46 = vpack.c.bf16 %v1502_v11, %v1502_v11  ;;  %v1566_v44 = vsel %vm1536_vm3, %v1502_v11, 0.0  ;;  %v1591_v35 = vmul.f32 %v1502_v11, %v1502_v11 }
 0x1d0   : > { %v1567_v50 = vadd.f32 %v1566_v44, %v1565_v55 }
 0x1d1   : > { %1535 = vst.msk [vmem:[%s2712_s25 + $0x3c] sm:$0xf] %vm1519_vm7, %v1518_v46  ;;  %v1621_v32 = vsel %vm1536_vm3, %v1591_v35, 0.0 }
 0x1d2   : > { %v1568_v49 = vrot.slane %v1567_v50, 4  ;;  %v1622_v5 = vadd.f32 %v1621_v32, %v1620_v54 }
 0x1d4   : > { %v1569_v2 = vadd.f32 %v1568_v49, %v1567_v50  ;;  %v1623_v33 = vrot.slane %v1622_v5, 4 }
 0x1d6   : > { %v1570_v21 = vrot.slane %v1569_v2, 2  ;;  %v1624_v1 = vadd.f32 %v1623_v33, %v1622_v5 }
 0x1d8   : > { %v1571_v23 = vadd.f32 %v1570_v21, %v1569_v2  ;;  %v1625_v6 = vrot.slane %v1624_v1, 2 }
 0x1da   : > { %v1572_v38 = vrot.slane %v1571_v23, 1  ;;  %v1626_v36 = vadd.f32 %v1625_v6, %v1624_v1 }
 0x1dc   : > { %v1573_v43 = vadd.f32 %v1572_v38, %v1571_v23  ;;  %v1627_v58 = vrot.slane %v1626_v36, 1 }
 0x1de   : > { %1575 = vst.msk [vmem:[%s530_s14] sm:$0x1] %vm1574_vm10, %v1573_v43  ;;  %v1628_v20 = vadd.f32 %v1627_v58, %v1626_v36 }
 0x1e0   : > { %1629 = vst.msk [vmem:[%s537_s18] sm:$0x1] %vm1574_vm10, %v1628_v20 }
 0x1e1 PF: > { %s20_s11 = sadd.s32 1, %s2063_s11   ;;  %s2862_s30 = smov %s2055_s4 }
 0x1e2   : > { %p17_p13 = scmp.ge.s32.totalorder %s20_s11, 6   ;;  %s2863_s3 = smov %s2059_s10 }
 0x1e3   : > { %s2864_s4 = smov %s2867_s12  ;;  %s2865_s10 = smov %s2871_s13 }
 0x1e4   :  { %19 = sbr.rel (!%p17_p13) target bundleno = 3 (0x3), region = 116 }

// kernel: unet_conv2_forward.4
= control target key start
LH: loop header
LB: loop body
LE: loop exit
PB: predicated region body
PF: predicated region fallthrough
CT: control target
= control target key end

     0   :  { %s2271_s30 = smov 0   ;;  %s2273_s10 = smov 0   ;;  %s3068_s0 = inlined_call_operand.vmem [shape: bf16[2,16,16,8], index: 0, kind: input, shape index: {}, may-alias: {0,1,2}]   ;;  %s3069_s1 = inlined_call_operand.vmem [shape: bf16[2,16,16,8], index: 1, kind: input, shape index: {}, may-alias: {0,1,2}]   ;;  %s3070_s2 = inlined_call_operand.vmem [shape: bf16[2,16,16,8], index: 2, kind: input, shape index: {}, may-alias: {0,1,2}]   ;;  %s3071_s3 = inlined_call_operand.vmem [shape: f32[1,8], index: 3, kind: input, shape index: {}]   ;;  %s3072_s4 = inlined_call_operand.vmem [shape: f32[1,8], index: 4, kind: input, shape index: {}]   ;;  %s3073_s5 = inlined_call_operand.vmem [shape: bf16[9,8,8], index: 5, kind: input, shape index: {}]   ;;  %s3074_s6 = inlined_call_operand.vmem [shape: f32[1,8], index: 6, kind: input, shape index: {}]   ;;  %s3075_s7 = inlined_call_operand.vmem [shape: bf16[2,16,16,8], index: 7, kind: output, shape index: {0}]   ;;  %s3076_s8 = inlined_call_operand.vmem [shape: f32[2,2,1,8], index: 8, kind: output, shape index: {1}]   ;;  %s3077_s9 = inlined_call_operand.vmem [shape: f32[2,2,1,8], index: 9, kind: output, shape index: {2}]  }
   0x1   :  { %s2275_s11 = smov 0   ;;  %s2277_s12 = smov 0  }
   0x2   :  { %s2279_s13 = smov 0  }
   0x3 LB: > { %s29_s14 = sadd.s32 1, %s2211_s11  ;;  %s32_s15 = sadd.s32 1, %s2215_s12  ;;  %s2219_s13 = sphi %s2279_s13, %s20_s13   ;;  %s2215_s12 = sphi %s2277_s12, %s3102_s12   ;;  %s2211_s11 = sphi %s2275_s11, %s3101_s11   ;;  %s2207_s10 = sphi %s2273_s10, %s3100_s10   ;;  %s2203_s30 = sphi %s2271_s30, %s3099_s30  }
   0x4   : > { %p30_p0 = scmp.ge.s32.totalorder %s29_s14, 2  ;;  %p1970_p1 = scmp.ge.s32.totalorder %s2219_s13, 1 }
   0x5   : > { %p382_p2 = scmp.lt.s32.totalorder %s2219_s13, 5 }
   0x6   : > { %s3104_s14 = smov (%p30_p0, %s29_s14), 0  ;;  %s3106_s15 = smov (!%p30_p0, %s32_s15), %s2215_s12 }
   0x7   : > { %p383_p3 = pnand %p1970_p1, %p382_p2  ;;  %p34_p4 = scmp.ge.s32.totalorder %s3106_s15, 2 }
   0x8   : > { %s2307_s18 = sshll.u32 (!%p383_p3), %s2203_s30, 3  ;;  %p469_p5 = scmp.lt.s32.totalorder (!%p383_p3), %s2207_s10, 1 }
   0x9   : > { %s3108_s15 = smov (%p34_p4, %s3106_s15), 0  ;;  %386 = sbr.rel (%p383_p3) target bundleno = 492 (0x1ec), region = 48 }
   0xa   : > { %p471_p6 = scmp.lt.s32.totalorder (!%p383_p3), %s2307_s18, 15  ;;  %p667_p7 = scmp.eq.s32.totalorder (!%p383_p3), %s2203_s30, 0 }
   0xb   : > { %p670_p8 = scmp.eq.s32.totalorder (!%p383_p3), %s2203_s30, 1  ;;  %s2397_s29 = sadd.s32 (!%p383_p3), 4294967295, %s2307_s18 }
   0xc   : > { %p481_p9 = scmp.gt.s32.totalorder (!%p383_p3), %s2397_s29, 0  ;;  %p1977_p10 = scmp.lt.s32.totalorder (!%p383_p3), %s2397_s29, 15 }
   0xd   : > { %p526_p12 = scmp.lt.s32.totalorder (!%p383_p3), %s2203_s30, 1 }
   0xe   : > { %v1998_v0 = vld [vmem:[%s3073_s5 + $0xc] sm:$0xf]  ;;  %vm940_vm0 = vcmask 1043456   ;;  %s3110_s10 = smov (!%p469_p5, %s2207_s10), 1  ;;  %v2015_v2 = vld [vmem:[%s3073_s5 + $0x18] sm:$0xf] }
   0xf   : > { %v942_v1 = vsel %vm940_vm0, %v1998_v0, 0  ;;  %s472_s19 = scalar_select %p471_p6, %s2307_s18, 15  ;;  %v1054_v3 = vsel %vm940_vm0, %v2015_v2, 0  ;;  %v2337_v4 = vld [vmem:[%s3071_s3] ss:$0 sm:$0xff]  ;;  %vm856_vm6 = vcmask 1040384  }
  0x10   : > { %2135 = vmatpush.bf16.msra.mxu1 %v942_v1  ;;  %2136 = vmatpush.bf16.msra.mxu2 %v942_v1  ;;  %s2315_s20 = sshll.u32 %s3110_s10, 5  ;;  %v2345_v10 = vld [vmem:[%s3072_s4] ss:$0 sm:$0xff]  ;;  %vm857_vm7 = vsmask.f32 256  ;;  %vm915_vm12 = vcmask 64512  }
  0x11   : > { %2137 = vmatpush.bf16.msra.mxu3 %v942_v1  ;;  %951 = vmatpush.bf16.msra.mxu0 %v942_v1  ;;  %s1972_s23 = sshll.u32 %s472_s19, 1  ;;  %v2024_v62 = vld [vmem:[%s3073_s5 + $0x4] sm:$0xf]  ;;  %v912_v2 = vld [vmem:[%s3073_s5] sm:$0xf]  ;;  %s3118_s30 = smov (!%p526_p12, %s2203_s30), 1 }
  0x12   : > { %s2323_s24 = sadd.s32 %s2315_s20, %s1972_s23 }
  0x13   : > { %s1974_s25 = sshll.u32 %s2323_s24, 2  ;;  %s1996_s24 = sshll.u32 %s3110_s10, 1 }
  0x14   : > { %1063 = vmatpush.bf16.msrb.mxu2 %v1054_v3  ;;  %s2332_s28 = scalar_lea.vmem %s3068_s0, %s1974_s25 }
  0x15   : > { %v2129_v5 = vld [vmem:[%s2332_s28 + $0x10] sm:$0xff]   ;;  %s668_s17 = scalar_select %p667_p7, 1, 0  ;;  %v2131_v6 = vld [vmem:[%s2332_s28 + $0x20] sm:$0xff]  }
  0x16   : > { %v2133_v7 = vld [vmem:[%s2332_s28 + $0x30] sm:$0xff]   ;;  %v2102_v8 = vunpack.c.l.bf16 %v2129_v5  ;;  %v2103_v9 = vunpack.c.h.bf16 %v2129_v5  ;;  %s671_s22 = scalar_select %p670_p8, 1, 0  ;;  %v2110_v11 = vunpack.c.l.bf16 %v2131_v6  ;;  %v2111_v12 = vunpack.c.h.bf16 %v2131_v6  ;;  %v2093_v13 = vld [vmem:[%s2332_s28] sm:$0xff]  }
  0x17   : > { %s669_s23 = sadd.s32 4294967295, %s668_s17  ;;  %v2118_v14 = vunpack.c.l.bf16 %v2133_v7  ;;  %v2119_v15 = vunpack.c.h.bf16 %v2133_v7  ;;  %v2094_v16 = vunpack.c.l.bf16 %v2093_v13  ;;  %v2095_v17 = vunpack.c.h.bf16 %v2093_v13 }
  0x18   : > { %v589_v18 = vmul.f32 %v2337_v4, %v2102_v8  ;;  %v590_v19 = vmul.f32 %v2337_v4, %v2103_v9  ;;  %s672_s26 = smul.u32 10, %s671_s22  ;;  %v2350_v20 = vstv %s669_s23  ;;  %v593_v21 = vmul.f32 %v2337_v4, %v2110_v11  ;;  %v2033_v9 = vld [vmem:[%s3073_s5 + $0x10] sm:$0xf]  ;;  %v2130_v11 = vld [vmem:[%s2332_s28 + $0x18] sm:$0xff]  }
  0x19   : > { %vm678_vm1 = vcmp.ne.s32.totalorder %v2350_v20, 3  ;;  %v594_v22 = vmul.f32 %v2337_v4, %v2111_v12  ;;  %vm680_vm2 = vcmp.ne.s32.totalorder %v2350_v20, 5  ;;  %v597_v23 = vmul.f32 %v2337_v4, %v2118_v14 }
  0x1a   : > { %v613_v24 = vadd.f32 %v2345_v10, %v589_v18  ;;  %v614_v25 = vadd.f32 %v2345_v10, %v590_v19  ;;  %s673_s27 = sadd.s32 4294967295, %s672_s26  ;;  %v617_v26 = vadd.f32 %v2345_v10, %v593_v21  ;;  %v598_v27 = vmul.f32 %v2337_v4, %v2119_v15 }
  0x1b   : > { %v2361_v28 = vstv %s673_s27  ;;  %v618_v29 = vadd.f32 %v2345_v10, %v594_v22  ;;  %v621_v30 = vadd.f32 %v2345_v10, %v597_v23  ;;  %vm682_vm3 = vcmp.ne.s32.totalorder %v2350_v20, 7  ;;  %s482_s26 = scalar_select %p481_p9, %s2397_s29, 0 }
  0x1c   : > { %v633_v31 = vmax.f32 %v613_v24, 0.0  ;;  %v634_v32 = vmax.f32 %v614_v25, 0.0  ;;  %vm689_vm4 = vcmp.ne.s32.totalorder %v2361_v28, 3  ;;  %v637_v33 = vmax.f32 %v617_v26, 0.0  ;;  %s2087_s27 = sadd.s32 8, %s2307_s18 }
  0x1d   : > { %vm2369_vm5 = vmand %vm678_vm1, %vm689_vm4  ;;  %v638_v35 = vmax.f32 %v618_v29, 0.0  ;;  %vm691_vm8 = vcmp.ne.s32.totalorder %v2361_v28, 5  ;;  %v622_v36 = vadd.f32 %v2345_v10, %v598_v27  ;;  %v641_v37 = vmax.f32 %v621_v30, 0.0  ;;  %p2463_p11 = scmp.lt.s32.totalorder %s2087_s27, 15  ;;  %s3112_s26 = smov (!%p1977_p10, %s482_s26), 15 }
  0x1e   : > { %v653_v38 = vpack.c.bf16 %v633_v31, %v633_v31  ;;  %v654_v39 = vpack.c.bf16 %v634_v32, %v634_v32  ;;  %v657_v40 = vpack.c.bf16 %v637_v33, %v637_v33  ;;  %vm2377_vm9 = vmand %vm680_vm2, %vm691_vm8  ;;  %vm693_vm10 = vcmp.ne.s32.totalorder %v2361_v28, 7  ;;  %s1982_s18 = sshll.u32 %s3112_s26, 1 }
  0x1f   : > { %v658_v42 = vpack.c.bf16 %v638_v35, %v638_v35  ;;  %v642_v43 = vmax.f32 %v622_v36, 0.0  ;;  %v661_v44 = vpack.c.bf16 %v641_v37, %v641_v37  ;;  %vm2384_vm11 = vmand %vm682_vm3, %vm693_vm10  ;;  %v585_v46 = vmul.f32 %v2337_v4, %v2094_v16  ;;  %v2132_v35 = vld [vmem:[%s2332_s28 + $0x28] sm:$0xff]   ;;  %s3114_s27 = smov (!%p2463_p11, %s2087_s27), 15  ;;  %s2533_s19 = sadd.s32 %s1982_s18, %s2315_s20 }
  0x20   : > { %v712_v47 = vsel %vm2369_vm5, %v653_v38, 0  ;;  %v713_v48 = vsel %vm2369_vm5, %v654_v39, 0  ;;  %v716_v49 = vsel %vm2377_vm9, %v657_v40, 0  ;;  %v586_v50 = vmul.f32 %v2337_v4, %v2095_v17  ;;  %vm2444_vm1 = vmand %vm856_vm6, %vm857_vm7  ;;  %s3116_s27 = smov (!%p2463_p11, %s3114_s27), 15 }
  0x21   : > { %v752_v51 = vunpack.c.l.b16 %v712_v47  ;;  %v753_v52 = vunpack.c.l.b16 %v713_v48  ;;  %v717_v53 = vsel %vm2377_vm9, %v658_v42, 0  ;;  %v756_v54 = vunpack.c.l.b16 %v716_v49  ;;  %v2134_v49 = vld [vmem:[%s2332_s28 + $0x38] sm:$0xff]   ;;  %s2523_s29 = sshll.u32 %s3116_s27, 1 }
  0x22   : > { %v757_v55 = vunpack.c.l.b16 %v717_v53  ;;  %v662_v56 = vpack.c.bf16 %v642_v43, %v642_v43  ;;  %v720_v57 = vsel %vm2384_vm11, %v661_v44, 0  ;;  %v609_v58 = vadd.f32 %v2345_v10, %v585_v46  ;;  %s506_s17 = sadd.s32 %s2523_s29, %s2315_s20 }
  0x23   : > { %v2404_v59 = vpack.c.b16 %v753_v52, %v752_v51  ;;  %v760_v60 = vunpack.c.l.b16 %v720_v57  ;;  %v610_v61 = vadd.f32 %v2345_v10, %v586_v50  ;;  %vm676_vm13 = vcmp.ne.s32.totalorder %v2350_v20, 1 }
  0x24   : > { %v2412_v63 = vpack.c.b16 %v757_v55, %v756_v54  ;;  %v721_v0 = vsel %vm2384_vm11, %v662_v56, 0  ;;  %v629_v1 = vmax.f32 %v609_v58, 0.0  ;;  %vm687_vm14 = vcmp.ne.s32.totalorder %v2361_v28, 1 }
  0x25   : > { %v798_v3 = vshrl.u32 %v2404_v59, 16  ;;  %v801_v5 = vshll.u32 %v2404_v59, 16  ;;  %v761_v6 = vunpack.c.l.b16 %v721_v0  ;;  %v630_v7 = vmax.f32 %v610_v61, 0.0  ;;  %vm2422_vm15 = vmand %vm676_vm13, %vm687_vm14 }
  0x26   : > { %v812_v12 = vshrl.u32 %v2412_v63, 16  ;;  %v815_v13 = vshll.u32 %v2412_v63, 16  ;;  %v649_v14 = vpack.c.bf16 %v629_v1, %v629_v1  ;;  %v1140_v15 = vsel %vm940_vm0, %v2024_v62, 0 }
  0x27   : > { %v800_v16 = vrot.slane %v798_v3, 7  ;;  %v2436_v17 = vpack.c.b16 %v761_v6, %v760_v60  ;;  %v650_v18 = vpack.c.bf16 %v630_v7, %v630_v7  ;;  %1149 = vmatpush.bf16.msrb.mxu3 %v1140_v15  ;;  %v997_v19 = vsel %vm940_vm0, %v912_v2, 0 }
  0x28   : > { %v814_v22 = vrot.slane %v812_v12, 7  ;;  %v708_v23 = vsel %vm2422_vm15, %v649_v14, 0  ;;  %1006 = vmatpush.bf16.msrb.mxu1 %v997_v19  ;;  %v1212_v24 = vsel %vm940_vm0, %v2033_v9, 0  ;;  %v2106_v25 = vunpack.c.l.bf16 %v2130_v11  ;;  %v2128_v9 = vld [vmem:[%s2332_s28 + $0x8] sm:$0xff]   ;;  %s1984_s28 = sshll.u32 %s2533_s19, 2  ;;  %s2949_s19 = scalar_lea.vmem %s3075_s7, %s1974_s25 }
  0x29   : > { %v803_v26 = vor.u32 %v801_v5, %v800_v16  ;;  %v826_v27 = vshrl.u32 %v2436_v17, 16  ;;  %v829_v29 = vshll.u32 %v2436_v17, 16  ;;  %v709_v30 = vsel %vm2422_vm15, %v650_v18, 0  ;;  %1221 = vmatpush.bf16.msrb.mxu0 %v1212_v24  ;;  %s491_s23 = scalar_lea.vmem %s3069_s1, %s1984_s28  ;;  %s529_s25 = sadd.s32 %s1996_s24, %s3118_s30 }
  0x2a   : > { %v817_v31 = vor.u32 %v815_v13, %v814_v22  ;;  %v748_v32 = vunpack.c.l.b16 %v708_v23  ;;  %v749_v33 = vunpack.c.l.b16 %v709_v30  ;;  %v2107_v34 = vunpack.c.h.bf16 %v2130_v11  ;;  %v2089_v56 = vld [vmem:[%s491_s23] sm:$0xff]   ;;  %s1991_s23 = sshll.u32 %s506_s17, 2  ;;  %s530_s22 = scalar_lea.vmem %s3076_s8, %s529_s25 }
  0x2b   : > { %v2469_v36 = vsel %vm2444_vm1, 0, %v803_v26  ;;  %v828_v37 = vrot.slane %v826_v27, 7  ;;  %v591_v38 = vmul.f32 %v2337_v4, %v2106_v25  ;;  %vm679_vm2 = vcmp.ne.s32.totalorder %v2350_v20, 4  ;;  %s508_s16 = scalar_lea.vmem %s3070_s2, %s1991_s23  ;;  %s537_s27 = scalar_lea.vmem %s3077_s9, %s529_s25 }
  0x2c   : > { %2001 = vmatmul.msk.bf16.vlgmr.msra.gmra.mxu1 %vm915_vm12, %v2469_v36  ;;  %v2483_v39 = vsel %vm2444_vm1, 0, %v817_v31  ;;  %v2485_v40 = vpack.c.b16 %v749_v33, %v748_v32  ;;  %v592_v41 = vmul.f32 %v2337_v4, %v2107_v34  ;;  %vm690_vm3 = vcmp.ne.s32.totalorder %v2361_v28, 4 }
  0x2d   : > { %2003 = vmatmul.msk.bf16.vlgmr.msra.gmra.mxu2 %vm915_vm12, %v2483_v39  ;;  %v831_v42 = vor.u32 %v829_v29, %v828_v37  ;;  %v615_v43 = vadd.f32 %v2345_v10, %v591_v38  ;;  %v2114_v44 = vunpack.c.l.bf16 %v2132_v35  ;;  %v2115_v45 = vunpack.c.h.bf16 %v2132_v35  ;;  %vm2517_vm4 = vmand %vm679_vm2, %vm690_vm3 }
  0x2e   : > { %v784_v46 = vshrl.u32 %v2485_v40, 16  ;;  %v787_v47 = vshll.u32 %v2485_v40, 16  ;;  %v616_v48 = vadd.f32 %v2345_v10, %v592_v41  ;;  %vm681_vm5 = vcmp.ne.s32.totalorder %v2350_v20, 6 }
  0x2f   : > { %v2504_v50 = vsel %vm2444_vm1, 0, %v831_v42  ;;  %v635_v51 = vmax.f32 %v615_v43, 0.0  ;;  %v595_v52 = vmul.f32 %v2337_v4, %v2114_v44  ;;  %v596_v53 = vmul.f32 %v2337_v4, %v2115_v45 }
  0x30   : > { %2005 = vmatmul.msk.bf16.vlgmr.msra.gmra.mxu3 %vm915_vm12, %v2504_v50  ;;  %v786_v54 = vrot.slane %v784_v46, 7  ;;  %v636_v55 = vmax.f32 %v616_v48, 0.0  ;;  %vm692_vm6 = vcmp.ne.s32.totalorder %v2361_v28, 6  ;;  %v2122_v61 = vunpack.c.l.bf16 %v2134_v49 }
  0x31   : > { %v655_v57 = vpack.c.bf16 %v635_v51, %v635_v51  ;;  %v619_v58 = vadd.f32 %v2345_v10, %v595_v52  ;;  %v620_v60 = vadd.f32 %v2345_v10, %v596_v53  ;;  %v2123_v1 = vunpack.c.h.bf16 %v2134_v49  ;;  %vm2549_vm8 = vmand %vm681_vm5, %vm692_vm6 }
  0x32   : > { %v789_v62 = vor.u32 %v787_v47, %v786_v54  ;;  %v656_v0 = vpack.c.bf16 %v636_v55, %v636_v55  ;;  %vm683_vm7 = vcmp.ne.s32.totalorder %v2350_v20, 8  ;;  %v599_v8 = vmul.f32 %v2337_v4, %v2122_v61 }
  0x33   : > { %v714_v2 = vsel %vm2517_vm4, %v655_v57, 0  ;;  %v639_v6 = vmax.f32 %v619_v58, 0.0  ;;  %v640_v7 = vmax.f32 %v620_v60, 0.0  ;;  %v600_v18 = vmul.f32 %v2337_v4, %v2123_v1 }
  0x34   : > { %v2541_v11 = vsel %vm2444_vm1, 0, %v789_v62  ;;  %v715_v14 = vsel %vm2517_vm4, %v656_v0, 0  ;;  %v754_v15 = vunpack.c.l.b16 %v714_v2  ;;  %v623_v24 = vadd.f32 %v2345_v10, %v599_v8 }
  0x35   : > { %1999 = vmatmul.msk.bf16.vlgmr.msra.gmra.mxu0 %vm915_vm12, %v2541_v11  ;;  %v755_v19 = vunpack.c.l.b16 %v715_v14  ;;  %v659_v22 = vpack.c.bf16 %v639_v6, %v639_v6  ;;  %v660_v23 = vpack.c.bf16 %v640_v7, %v640_v7  ;;  %v624_v25 = vadd.f32 %v2345_v10, %v600_v18 }
  0x36   : > { %vm694_vm9 = vcmp.ne.s32.totalorder %v2361_v28, 8  ;;  %v2098_v26 = vunpack.c.l.bf16 %v2128_v9  ;;  %v2099_v30 = vunpack.c.h.bf16 %v2128_v9  ;;  %v643_v34 = vmax.f32 %v623_v24, 0.0 }
  0x37   : > { %v2560_v31 = vpack.c.b16 %v755_v19, %v754_v15  ;;  %v718_v32 = vsel %vm2549_vm8, %v659_v22, 0  ;;  %v719_v33 = vsel %vm2549_vm8, %v660_v23, 0  ;;  %v644_v38 = vmax.f32 %v624_v25, 0.0  ;;  %vm2568_vm10 = vmand %vm683_vm7, %vm694_vm9  ;;  %v2051_v19 = vld [vmem:[%s3073_s5 + $0x8] sm:$0xf] }
  0x38   : > { %v758_v35 = vunpack.c.l.b16 %v718_v32  ;;  %v759_v37 = vunpack.c.l.b16 %v719_v33  ;;  %v587_v42 = vmul.f32 %v2337_v4, %v2098_v26  ;;  %v663_v45 = vpack.c.bf16 %v643_v34, %v643_v34  ;;  %v2060_v25 = vld [vmem:[%s3073_s5 + $0x14] sm:$0xf]  ;;  %v2042_v26 = vld [vmem:[%s3073_s5 + $0x1c] sm:$0xf] }
  0x39   : > { %v805_v43 = vshrl.u32 %v2560_v31, 16  ;;  %v808_v44 = vshll.u32 %v2560_v31, 16  ;;  %v588_v48 = vmul.f32 %v2337_v4, %v2099_v30  ;;  %v664_v51 = vpack.c.bf16 %v644_v38, %v644_v38 }
  0x3a   : > { %v2579_v49 = vpack.c.b16 %v759_v37, %v758_v35  ;;  %v611_v52 = vadd.f32 %v2345_v10, %v587_v42  ;;  %vm677_vm11 = vcmp.ne.s32.totalorder %v2350_v20, 2  ;;  %v722_v54 = vsel %vm2568_vm10, %v663_v45, 0  ;;  %v2069_v35 = vld [vmem:[%s3073_s5 + $0x20] sm:$0xf] }
  0x3b   : > { %v807_v53 = vrot.slane %v805_v43, 7  ;;  %v612_v55 = vadd.f32 %v2345_v10, %v588_v48  ;;  %vm688_vm13 = vcmp.ne.s32.totalorder %v2361_v28, 2  ;;  %v723_v60 = vsel %vm2568_vm10, %v664_v51, 0 }
  0x3c   : > { %v819_v57 = vshrl.u32 %v2579_v49, 16  ;;  %v822_v58 = vshll.u32 %v2579_v49, 16  ;;  %v762_v61 = vunpack.c.l.b16 %v722_v54  ;;  %v763_v0 = vunpack.c.l.b16 %v723_v60  ;;  %vm2599_vm14 = vmand %vm677_vm11, %vm688_vm13 }
  0x3d   : > { %v810_v62 = vor.u32 %v808_v44, %v807_v53  ;;  %v631_v1 = vmax.f32 %v611_v52, 0.0  ;;  %v632_v2 = vmax.f32 %v612_v55, 0.0  ;;  %v2090_v8 = vunpack.c.l.bf16 %v2089_v56 }
  0x3e   : > { %v821_v6 = vrot.slane %v819_v57, 7  ;;  %v2091_v9 = vunpack.c.h.bf16 %v2089_v56  ;;  %vm675_vm15 = vcmp.ne.s32.totalorder %v2350_v20, 0  ;;  %v2608_v15 = vpack.c.b16 %v763_v0, %v762_v61 }
  0x3f   : > { %v2606_v14 = vsel %vm2444_vm1, 0, %v810_v62  ;;  %v651_v16 = vpack.c.bf16 %v631_v1, %v631_v1  ;;  %v652_v18 = vpack.c.bf16 %v632_v2, %v632_v2  ;;  %v583_v23 = vmul.f32 %v2337_v4, %v2090_v8 }
  0x40   : > { %2002 = vmatmul.msk.bf16.gmra.mxu1 %vm915_vm12, %v2606_v14  ;;  %v824_v22 = vor.u32 %v822_v58, %v821_v6  ;;  %v584_v24 = vmul.f32 %v2337_v4, %v2091_v9  ;;  %vm686_vm2 = vcmp.ne.s32.totalorder %v2361_v28, 0  ;;  %v833_v30 = vshrl.u32 %v2608_v15, 16 }
  0x41   : > { %v836_v32 = vshll.u32 %v2608_v15, 16  ;;  %v710_v33 = vsel %vm2599_vm14, %v651_v16, 0  ;;  %v711_v34 = vsel %vm2599_vm14, %v652_v18, 0  ;;  %v607_v42 = vadd.f32 %v2345_v10, %v583_v23  ;;  %vm696_vm3 = vmand %vm675_vm15, %vm686_vm2 }
  0x42   : > { %v2637_v37 = vsel %vm2444_vm1, 0, %v824_v22  ;;  %v750_v38 = vunpack.c.l.b16 %v710_v33  ;;  %v751_v41 = vunpack.c.l.b16 %v711_v34  ;;  %v835_v45 = vrot.slane %v833_v30, 7 }
  0x43   : > { %2004 = vmatmul.msk.bf16.gmra.mxu2 %vm915_vm12, %v2637_v37  ;;  %v608_v48 = vadd.f32 %v2345_v10, %v584_v24  ;;  %v1378_v51 = vsel %vm940_vm0, %v2051_v19, 0  ;;  %v1451_v52 = vsel %vm940_vm0, %v2060_v25, 0  ;;  %v627_v54 = vmax.f32 %v607_v42, 0.0 }
  0x44   : > { %v2647_v53 = vpack.c.b16 %v751_v41, %v750_v38  ;;  %1387 = vmatpush.bf16.msra.mxu2 %v1378_v51  ;;  %1460 = vmatpush.bf16.msra.mxu3 %v1451_v52  ;;  %v1284_v55 = vsel %vm940_vm0, %v2042_v26, 0  ;;  %v1524_v56 = vsel %vm940_vm0, %v2069_v35, 0  ;;  %v838_v60 = vor.u32 %v836_v32, %v835_v45 }
  0x45   : > { %v628_v61 = vmax.f32 %v608_v48, 0.0  ;;  %1293 = vmatpush.bf16.msra.mxu1 %v1284_v55  ;;  %1533 = vmatpush.bf16.msra.mxu0 %v1524_v56  ;;  %v647_v1 = vpack.c.bf16 %v627_v54, %v627_v54  ;;  %vm684_vm0 = vcmp.ne.s32.totalorder %v2350_v20, 9  ;;  %vm695_vm4 = vcmp.ne.s32.totalorder %v2361_v28, 9 }
  0x46   : > { %v791_v62 = vshrl.u32 %v2647_v53, 16  ;;  %v794_v0 = vshll.u32 %v2647_v53, 16  ;;  %v2661_v2 = vsel %vm2444_vm1, 0, %v838_v60  ;;  %vm705_vm5 = vmand %vm684_vm0, %vm695_vm4  ;;  %vm899_vm6 = vcmask 1047552  }
  0x47   : > { %v648_v6 = vpack.c.bf16 %v628_v61, %v628_v61  ;;  %2006 = vmatmul.msk.bf16.gmra.mxu3 %vm915_vm12, %v2661_v2  ;;  %v706_v8 = vsel %vm696_vm3, %v647_v1, 0  ;;  %vm1627_vm8 = vcmask 60416   ;;  %vm1681_vm9 = vcmask 57344  }
  0x48   : > { %v793_v7 = vrot.slane %v791_v62, 7  ;;  %v746_v16 = vunpack.c.l.b16 %v706_v8 }
  0x49   : > { %v707_v9 = vsel %vm696_vm3, %v648_v6, 0 }
  0x4a   : > { %v796_v18 = vor.u32 %v794_v0, %v793_v7  ;;  %v747_v19 = vunpack.c.l.b16 %v707_v9 }
  0x4c   : > { %v861_v22 = vsel %vm2444_vm1, 0, %v796_v18  ;;  %v2671_v23 = vpack.c.b16 %v747_v19, %v746_v16 }
  0x4d   : > { %2000 = vmatmul.msk.bf16.gmra.mxu0 %vm915_vm12, %v861_v22 }
  0x4e   : > { %v777_v24 = vshrl.u32 %v2671_v23, 16  ;;  %v780_v25 = vshll.u32 %v2671_v23, 16 }
  0x50   : > { %v779_v26 = vrot.slane %v777_v24, 7 }
  0x52   : > { %v782_v33 = vor.u32 %v780_v25, %v779_v26 }
  0x53   : > { %2016 = vmatmul.msk.bf16.vlgmr.msrb.gmra.mxu2 %vm915_vm12, %v861_v22 }
  0x54   : > { %v859_v34 = vsel %vm2444_vm1, 0, %v782_v33 }
  0x55   : > { %2007 = vmatmul.msk.bf16.vlgmr.msrb.gmra.mxu1 %vm915_vm12, %v859_v34 }
  0x57   : > { %2025 = vmatmul.msk.bf16.vlgmr.msrb.gmra.mxu3 %vm915_vm12, %v2671_v23  ;;  %v873_v23 = vrot.slane %v794_v0, 1 }
  0x5d   : > { %2034 = vmatmul.msk.bf16.vlgmr.msrb.gmra.mxu0 %vm915_vm12, %v2485_v40 }
  0x63   : > { %2017 = vmatmul.msk.bf16.gmra.mxu2 %vm915_vm12, %v2469_v36 }
  0x65   : > { %2008 = vmatmul.msk.bf16.gmra.mxu1 %vm915_vm12, %v2541_v11  ;;  %v2125_v11 = vld [vmem:[%s508_s16] sm:$0xff]  }
  0x66   : > { %v2127_v35 = vunpack.c.h.bf16 %v2125_v11 }
  0x67   : > { %2026 = vmatmul.msk.bf16.gmra.mxu3 %vm915_vm12, %v2485_v40  ;;  %v874_v40 = vor.u32 %v873_v23, %v791_v62 }
  0x68   : > { %v602_v41 = vmul.f32 %v2337_v4, %v2127_v35 }
  0x6a   : > { %v626_v45 = vadd.f32 %v2345_v10, %v602_v41 }
  0x6c   : > { %v646_v51 = vmax.f32 %v626_v45, 0.0 }
  0x6d   : > { %2035 = vmatmul.msk.bf16.gmra.mxu0 %vm915_vm12, %v2647_v53 }
  0x73   : > { %2018 = vmatmul.msk.bf16.gmra.mxu2 %vm915_vm12, %v2606_v14 }
  0x75   : > { %2009 = vmatmul.msk.bf16.gmra.mxu1 %vm915_vm12, %v861_v22  ;;  %v869_v22 = vrot.slane %v780_v25, 1 }
  0x77   : > { %2027 = vmatmul.msk.bf16.gmra.mxu3 %vm915_vm12, %v2647_v53  ;;  %v870_v34 = vor.u32 %v869_v22, %v777_v24 }
  0x7d   : > { %2036 = vmatmul.msk.bf16.gmra.mxu0 %vm915_vm12, %v2404_v59 }
  0x83   : > { %2019 = vmatmul.msk.bf16.gmra.mxu2 %vm915_vm12, %v2483_v39 }
  0x85   : > { %2010 = vmatmul.msk.bf16.gmra.mxu1 %vm915_vm12, %v2469_v36  ;;  %v2126_v36 = vunpack.c.l.bf16 %v2125_v11 }
  0x87   : > { %2028 = vmatmul.msk.bf16.gmra.mxu3 %vm915_vm12, %v2404_v59  ;;  %v601_v38 = vmul.f32 %v2337_v4, %v2126_v36 }
  0x89   : > { %v625_v42 = vadd.f32 %v2345_v10, %v601_v38 }
  0x8b   : > { %v645_v48 = vmax.f32 %v625_v42, 0.0 }
  0x8d   : > { %2037 = vmatmul.msk.bf16.gmra.mxu0 %vm915_vm12, %v2560_v31  ;;  %v665_v4 = vpack.c.bf16 %v645_v48, %v645_v48 }
  0x8f   : > { %v724_v52 = vsel %vm705_vm5, %v665_v4, 0 }
  0x90   : > { %v764_v55 = vunpack.c.l.b16 %v724_v52 }
  0x93   : > { %2020 = vmatmul.msk.bf16.gmra.mxu2 %vm915_vm12, %v2637_v37 }
  0x95   : > { %2011 = vmatmul.msk.bf16.gmra.mxu1 %vm915_vm12, %v2606_v14  ;;  %v666_v14 = vpack.c.bf16 %v646_v51, %v646_v51 }
  0x97   : > { %2029 = vmatmul.msk.bf16.gmra.mxu3 %vm915_vm12, %v2560_v31  ;;  %v725_v10 = vsel %vm705_vm5, %v666_v14, 0 }
  0x98   : > { %v765_v56 = vunpack.c.l.b16 %v725_v10 }
  0x9a   : > { %v2741_v20 = vpack.c.b16 %v765_v56, %v764_v55 }
  0x9c   : > { %v840_v60 = vshrl.u32 %v2741_v20, 16  ;;  %v843_v7 = vshll.u32 %v2741_v20, 16 }
  0x9d   : > { %2038 = vmatmul.msk.bf16.gmra.mxu0 %vm915_vm12, %v2412_v63 }
  0x9e   : > { %v842_v6 = vrot.slane %v840_v60, 7 }
  0xa3   : > { %2021 = vmatmul.msk.bf16.gmra.mxu2 %vm915_vm12, %v2504_v50 }
  0xa5   : > { %2012 = vmatmul.msk.bf16.gmra.mxu1 %vm915_vm12, %v2483_v39 }
  0xa7   : > { %2030 = vmatmul.msk.bf16.gmra.mxu3 %vm915_vm12, %v2412_v63 }
  0xa9   : > { %v2737_v54 = vpop.f32.mrf.mxu1 }
  0xad   : > { %2039 = vmatmul.msk.bf16.gmra.mxu0 %vm915_vm12, %v2579_v49 }
  0xb0   : > { %v2743_v28 = vpop.f32.mrf.mxu2 }
  0xb1   : > { %v2747_v39 = vpop.f32.mrf.mxu1 }
  0xb2   : > { %v953_v61 = vpop.f32.mrf.mxu0 }
  0xb3   : > { %2022 = vmatmul.msk.bf16.gmra.mxu2 %vm915_vm12, %v2661_v2  ;;  %v2752_v1 = vpop.f32.mrf.mxu3  ;;  %v845_v2 = vor.u32 %v843_v7, %v842_v6 }
  0xb5   : > { %2013 = vmatmul.msk.bf16.gmra.mxu1 %vm915_vm12, %v2637_v37  ;;  %v868_v16 = vsel %vm2444_vm1, 0, %v845_v2  ;;  %vm900_vm1 = vsmask.f32 7424 }
  0xb6   : > { %vm2790_vm7 = vmand %vm899_vm6, %vm900_vm1 }
  0xb7   : > { %2031 = vmatmul.msk.bf16.gmra.mxu3 %vm915_vm12, %v2579_v49  ;;  %v902_v36 = vsel %vm2790_vm7, %v870_v34, 0  ;;  %v904_v48 = vsel %vm2790_vm7, %v874_v40, 0 }
  0xb8   : > { %v2759_v8 = vpop.f32.mrf.mxu2 }
  0xba   : > { %v955_v9 = vpop.f32.mrf.mxu0 }
  0xbb   : > { %v2769_v18 = vpop.f32.mrf.mxu3 }
  0xbd   : > { %2040 = vmatmul.msk.bf16.gmra.mxu0 %vm915_vm12, %v2436_v17  ;;  %v2765_v37 = vpop.f32.mrf.mxu1 }
  0xc3   : > { %2023 = vmatmul.msk.bf16.gmra.mxu2 %vm915_vm12, %v868_v16 }
  0xc5   : > { %2014 = vmatmul.msk.bf16.gmra.mxu1 %vm915_vm12, %v2504_v50  ;;  %v2780_v26 = vpop.f32.mrf.mxu1  ;;  %v871_v50 = vrot.slane %v787_v47, 1 }
  0xc6   : > { %v2774_v19 = vpop.f32.mrf.mxu2 }
  0xc7   : > { %2032 = vmatmul.msk.bf16.gmra.mxu3 %vm915_vm12, %v2436_v17  ;;  %v872_v35 = vor.u32 %v871_v50, %v784_v46 }
  0xc9   : > { %v903_v42 = vsel %vm2790_vm7, %v872_v35, 0 }
  0xca   : > { %v958_v33 = vpop.f32.mrf.mxu0  ;;  %v2782_v21 = vpop.f32.mrf.mxu3 }
  0xcd   : > { %2041 = vmatmul.msk.bf16.gmra.mxu0 %vm915_vm12, %v2608_v15 }
  0xce   : > { %v2794_v11 = vpop.f32.mrf.mxu2 }
  0xd2   : > { %v960_v24 = vpop.f32.mrf.mxu0  ;;  %v1008_v47 = vpop.f32.mrf.mxu1 }
  0xd3   : > { %v2802_v38 = vpop.f32.mrf.mxu3  ;;  %v1009_v41 = vadd.f32 %v1008_v47, %v953_v61  ;;  %2052 = vmatmul.msk.bf16.vlgmr.msra.gmra.mxu2 %vm915_vm12, %v902_v36  ;;  %v875_v61 = vrot.slane %v801_v5, 1 }
  0xd5   : > { %2043 = vmatmul.msk.bf16.vlgmr.msra.gmra.mxu1 %vm915_vm12, %v2647_v53 }
  0xd6   : > { %v1065_v46 = vpop.f32.mrf.mxu2 }
  0xd7   : > { %v1105_v45 = vadd.f32 %v1065_v46, %v1009_v41  ;;  %2061 = vmatmul.msk.bf16.vlgmr.msra.gmra.mxu3 %vm915_vm12, %v903_v42  ;;  %v877_v46 = vrot.slane %v808_v44, 1 }
  0xda   : > { %v1223_v0 = vpop.f32.mrf.mxu0  ;;  %v1010_v51 = vpop.f32.mrf.mxu1 }
  0xdb   : > { %v1151_v4 = vpop.f32.mrf.mxu3  ;;  %v1011_v14 = vadd.f32 %v1010_v51, %v955_v9  ;;  %v876_v9 = vor.u32 %v875_v61, %v798_v3 }
  0xdc   : > { %v1191_v52 = vadd.f32 %v1151_v4, %v1105_v45 }
  0xdd   : > { %2070 = vmatmul.msk.bf16.vlgmr.msra.gmra.mxu0 %vm915_vm12, %v904_v48  ;;  %v905_v5 = vsel %vm2790_vm7, %v876_v9, 0 }
  0xde   : > { %v1067_v10 = vpop.f32.mrf.mxu2  ;;  %v2815_v55 = vadd.f32 %v1223_v0, %v1191_v52 }
  0xdf   : > { %v1106_v56 = vadd.f32 %v1067_v10, %v1011_v14 }
  0xe2   : > { %v1225_v53 = vpop.f32.mrf.mxu0  ;;  %v1013_v62 = vpop.f32.mrf.mxu1 }
  0xe3   : > { %v1153_v6 = vpop.f32.mrf.mxu3  ;;  %v1014_v2 = vadd.f32 %v1013_v62, %v958_v33  ;;  %2053 = vmatmul.msk.bf16.gmra.mxu2 %vm915_vm12, %v903_v42 }
  0xe4   : > { %v1192_v16 = vadd.f32 %v1153_v6, %v1106_v56 }
  0xe5   : > { %2044 = vmatmul.msk.bf16.gmra.mxu1 %vm915_vm12, %v2404_v59 }
  0xe6   : > { %v1070_v22 = vpop.f32.mrf.mxu2  ;;  %v2824_v34 = vadd.f32 %v1225_v53, %v1192_v16 }
  0xe7   : > { %v1107_v50 = vadd.f32 %v1070_v22, %v1014_v2  ;;  %2062 = vmatmul.msk.bf16.gmra.mxu3 %vm915_vm12, %v904_v48  ;;  %v879_v2 = vrot.slane %v815_v13, 1 }
  0xea   : > { %v1228_v36 = vpop.f32.mrf.mxu0  ;;  %v1015_v33 = vpop.f32.mrf.mxu1 }
  0xeb   : > { %v1156_v35 = vpop.f32.mrf.mxu3  ;;  %v1016_v23 = vadd.f32 %v1015_v33, %v960_v24  ;;  %v878_v24 = vor.u32 %v877_v46, %v805_v43 }
  0xec   : > { %v1193_v47 = vadd.f32 %v1156_v35, %v1107_v50 }
  0xed   : > { %2071 = vmatmul.msk.bf16.gmra.mxu0 %vm915_vm12, %v905_v5  ;;  %v906_v44 = vsel %vm2790_vm7, %v878_v24, 0 }
  0xee   : > { %v1072_v41 = vpop.f32.mrf.mxu2  ;;  %v2830_v42 = vadd.f32 %v1228_v36, %v1193_v47 }
  0xef   : > { %v1108_v59 = vadd.f32 %v1072_v41, %v1016_v23 }
  0xf2   : > { %v1230_v3 = vpop.f32.mrf.mxu0  ;;  %v1018_v40 = vpop.f32.mrf.mxu1 }
  0xf3   : > { %v1158_v45 = vpop.f32.mrf.mxu3  ;;  %2054 = vmatmul.msk.bf16.gmra.mxu2 %vm915_vm12, %v904_v48  ;;  %v1019_v51 = vadd.f32 %v1018_v40, %v2737_v54  ;;  %v881_v40 = vrot.slane %v822_v58, 1 }
  0xf4   : > { %v1194_v0 = vadd.f32 %v1158_v45, %v1108_v59 }
  0xf5   : > { %2045 = vmatmul.msk.bf16.gmra.mxu1 %vm915_vm12, %v2560_v31 }
  0xf6   : > { %v1075_v4 = vpop.f32.mrf.mxu2  ;;  %v2840_v14 = vadd.f32 %v1230_v3, %v1194_v0 }
  0xf7   : > { %v1109_v52 = vadd.f32 %v1075_v4, %v1019_v51  ;;  %2063 = vmatmul.msk.bf16.gmra.mxu3 %vm915_vm12, %v905_v5 }
  0xfa   : > { %v1233_v10 = vpop.f32.mrf.mxu0  ;;  %v1020_v48 = vpop.f32.mrf.mxu1 }
  0xfb   : > { %v1161_v56 = vpop.f32.mrf.mxu3  ;;  %v1021_v54 = vadd.f32 %v1020_v48, %v2747_v39  ;;  %v880_v39 = vor.u32 %v879_v2, %v812_v12 }
  0xfc   : > { %v1195_v53 = vadd.f32 %v1161_v56, %v1109_v52 }
  0xfd   : > { %2072 = vmatmul.msk.bf16.gmra.mxu0 %vm915_vm12, %v906_v44  ;;  %v907_v13 = vsel %vm2790_vm7, %v880_v39, 0 }
  0xfe   : > { %v1077_v62 = vpop.f32.mrf.mxu2  ;;  %v2847_v31 = vadd.f32 %v1233_v10, %v1195_v53 }
  0xff   : > { %v1110_v43 = vadd.f32 %v1077_v62, %v1021_v54  ;;  %v883_v62 = vrot.slane %v829_v29, 1 }
 0x102   : > { %v1235_v61 = vpop.f32.mrf.mxu0  ;;  %v1023_v6 = vpop.f32.mrf.mxu1 }
 0x103   : > { %v1163_v16 = vpop.f32.mrf.mxu3  ;;  %v1024_v9 = vadd.f32 %v1023_v6, %v2765_v37  ;;  %2055 = vmatmul.msk.bf16.gmra.mxu2 %vm915_vm12, %v905_v5 }
 0x104   : > { %v1196_v22 = vadd.f32 %v1163_v16, %v1110_v43 }
 0x105   : > { %2046 = vmatmul.msk.bf16.gmra.mxu1 %vm915_vm12, %v2412_v63 }
 0x106   : > { %v1080_v50 = vpop.f32.mrf.mxu2  ;;  %v2857_v36 = vadd.f32 %v1235_v61, %v1196_v22 }
 0x107   : > { %v1111_v33 = vadd.f32 %v1080_v50, %v1024_v9  ;;  %2064 = vmatmul.msk.bf16.gmra.mxu3 %vm915_vm12, %v906_v44 }
 0x10a   : > { %v1238_v35 = vpop.f32.mrf.mxu0  ;;  %v1025_v37 = vpop.f32.mrf.mxu1 }
 0x10b   : > { %v1166_v23 = vpop.f32.mrf.mxu3  ;;  %v1026_v5 = vadd.f32 %v1025_v37, %v2780_v26  ;;  %v882_v26 = vor.u32 %v881_v40, %v819_v57 }
 0x10c   : > { %v1197_v47 = vadd.f32 %v1166_v23, %v1111_v33  ;;  %v885_v23 = vrot.slane %v836_v32, 1 }
 0x10d   : > { %2073 = vmatmul.msk.bf16.gmra.mxu0 %vm915_vm12, %v907_v13  ;;  %v908_v58 = vsel %vm2790_vm7, %v882_v26, 0 }
 0x10e   : > { %v1082_v41 = vpop.f32.mrf.mxu2  ;;  %v2864_v63 = vadd.f32 %v1238_v35, %v1197_v47 }
 0x10f   : > { %v1112_v12 = vadd.f32 %v1082_v41, %v1026_v5 }
 0x112   : > { %v1240_v59 = vpop.f32.mrf.mxu0  ;;  %v1028_v3 = vpop.f32.mrf.mxu1 }
 0x113   : > { %v1168_v46 = vpop.f32.mrf.mxu3  ;;  %2056 = vmatmul.msk.bf16.gmra.mxu2 %vm915_vm12, %v906_v44  ;;  %v1029_v0 = vadd.f32 %v1028_v3, %v2743_v28 }
 0x114   : > { %v1198_v45 = vadd.f32 %v1168_v46, %v1112_v12 }
 0x115   : > { %2047 = vmatmul.msk.bf16.gmra.mxu1 %vm915_vm12, %v2579_v49 }
 0x116   : > { %v1085_v51 = vpop.f32.mrf.mxu2  ;;  %v2874_v24 = vadd.f32 %v1240_v59, %v1198_v45 }
 0x117   : > { %v1113_v4 = vadd.f32 %v1085_v51, %v1029_v0  ;;  %2065 = vmatmul.msk.bf16.gmra.mxu3 %vm915_vm12, %v907_v13 }
 0x11a   : > { %v1243_v52 = vpop.f32.mrf.mxu0  ;;  %v1030_v10 = vpop.f32.mrf.mxu1 }
 0x11b   : > { %v1171_v44 = vpop.f32.mrf.mxu3  ;;  %v1031_v28 = vadd.f32 %v1030_v10, %v2759_v8  ;;  %v884_v8 = vor.u32 %v883_v62, %v826_v27 }
 0x11c   : > { %v1199_v48 = vadd.f32 %v1171_v44, %v1113_v4 }
 0x11d   : > { %2074 = vmatmul.msk.bf16.gmra.mxu0 %vm915_vm12, %v908_v58  ;;  %v909_v29 = vsel %vm2790_vm7, %v884_v8, 0 }
 0x11e   : > { %v1087_v56 = vpop.f32.mrf.mxu2  ;;  %v2881_v49 = vadd.f32 %v1243_v52, %v1199_v48  ;;  %v887_v52 = vrot.slane %v843_v7, 1 }
 0x11f   : > { %v1114_v57 = vadd.f32 %v1087_v56, %v1031_v28 }
 0x122   : > { %v1245_v54 = vpop.f32.mrf.mxu0  ;;  %v1033_v53 = vpop.f32.mrf.mxu1 }
 0x123   : > { %v1173_v43 = vpop.f32.mrf.mxu3  ;;  %2057 = vmatmul.msk.bf16.gmra.mxu2 %vm915_vm12, %v907_v13  ;;  %v1034_v6 = vadd.f32 %v1033_v53, %v2774_v19 }
 0x124   : > { %v1200_v61 = vadd.f32 %v1173_v43, %v1114_v57 }
 0x125   : > { %2048 = vmatmul.msk.bf16.gmra.mxu1 %vm915_vm12, %v2436_v17 }
 0x126   : > { %v1090_v2 = vpop.f32.mrf.mxu2  ;;  %v2891_v16 = vadd.f32 %v1245_v54, %v1200_v61 }
 0x127   : > { %v1115_v9 = vadd.f32 %v1090_v2, %v1034_v6  ;;  %2066 = vmatmul.msk.bf16.gmra.mxu3 %vm915_vm12, %v908_v58 }
 0x12a   : > { %v1248_v22 = vpop.f32.mrf.mxu0  ;;  %v1035_v39 = vpop.f32.mrf.mxu1 }
 0x12b   : > { %v1176_v50 = vpop.f32.mrf.mxu3  ;;  %v1036_v19 = vadd.f32 %v1035_v39, %v2794_v11  ;;  %v886_v11 = vor.u32 %v885_v23, %v833_v30 }
 0x12c   : > { %v1201_v33 = vadd.f32 %v1176_v50, %v1115_v9 }
 0x12d   : > { %2075 = vmatmul.msk.bf16.gmra.mxu0 %vm915_vm12, %v909_v29  ;;  %v910_v32 = vsel %vm2790_vm7, %v886_v11, 0 }
 0x12e   : > { %v1092_v35 = vpop.f32.mrf.mxu2  ;;  %v2898_v17 = vadd.f32 %v1248_v22, %v1201_v33 }
 0x12f   : > { %v1116_v27 = vadd.f32 %v1092_v35, %v1036_v19 }
 0x132   : > { %v1250_v13 = vpop.f32.mrf.mxu0  ;;  %v1038_v37 = vpop.f32.mrf.mxu1 }
 0x133   : > { %v1178_v5 = vpop.f32.mrf.mxu3  ;;  %2058 = vmatmul.msk.bf16.gmra.mxu2 %vm915_vm12, %v908_v58  ;;  %v1039_v41 = vadd.f32 %v1038_v37, %v2752_v1 }
 0x134   : > { %v1202_v47 = vadd.f32 %v1178_v5, %v1116_v27 }
 0x135   : > { %2049 = vmatmul.msk.bf16.gmra.mxu1 %vm915_vm12, %v2608_v15 }
 0x136   : > { %v1095_v12 = vpop.f32.mrf.mxu2  ;;  %v2908_v59 = vadd.f32 %v1250_v13, %v1202_v47 }
 0x137   : > { %v1117_v3 = vadd.f32 %v1095_v12, %v1039_v41  ;;  %2067 = vmatmul.msk.bf16.gmra.mxu3 %vm915_vm12, %v909_v29 }
 0x13a   : > { %v1253_v40 = vpop.f32.mrf.mxu0  ;;  %v1040_v46 = vpop.f32.mrf.mxu1 }
 0x13b   : > { %v1181_v45 = vpop.f32.mrf.mxu3  ;;  %v1041_v1 = vadd.f32 %v1040_v46, %v2769_v18  ;;  %v888_v18 = vor.u32 %v887_v52, %v840_v60 }
 0x13c   : > { %v1203_v0 = vadd.f32 %v1181_v45, %v1117_v3 }
 0x13d   : > { %2076 = vmatmul.msk.bf16.gmra.mxu0 %vm915_vm12, %v910_v32  ;;  %v911_v7 = vsel %vm2790_vm7, %v888_v18, 0 }
 0x13e   : > { %v1097_v26 = vpop.f32.mrf.mxu2  ;;  %v2915_v15 = vadd.f32 %v1253_v40, %v1203_v0 }
 0x13f   : > { %v1118_v30 = vadd.f32 %v1097_v26, %v1041_v1 }
 0x142   : > { %v1255_v51 = vpop.f32.mrf.mxu0  ;;  %v1043_v4 = vpop.f32.mrf.mxu1 }
 0x143   : > { %v1183_v58 = vpop.f32.mrf.mxu3  ;;  %2059 = vmatmul.msk.bf16.gmra.mxu2 %vm915_vm12, %v909_v29  ;;  %v1044_v44 = vadd.f32 %v1043_v4, %v2782_v21 }
 0x144   : > { %v1204_v10 = vadd.f32 %v1183_v58, %v1118_v30 }
 0x145   : > { %2050 = vmatmul.msk.bf16.gmra.mxu1 %vm915_vm12, %v2741_v20 }
 0x146   : > { %v1100_v48 = vpop.f32.mrf.mxu2  ;;  %v2925_v28 = vadd.f32 %v1255_v51, %v1204_v10 }
 0x147   : > { %v1119_v56 = vadd.f32 %v1100_v48, %v1044_v44  ;;  %2068 = vmatmul.msk.bf16.gmra.mxu3 %vm915_vm12, %v910_v32 }
 0x14a   : > { %v1258_v57 = vpop.f32.mrf.mxu0  ;;  %v1045_v54 = vpop.f32.mrf.mxu1 }
 0x14b   : > { %v1186_v53 = vpop.f32.mrf.mxu3  ;;  %v1046_v21 = vadd.f32 %v1045_v54, %v2802_v38  ;;  %v2940_v38 = vld [vmem:[%s3074_s6] ss:$0 sm:$0xff] }
 0x14c   : > { %v1205_v62 = vadd.f32 %v1186_v53, %v1119_v56 }
 0x14d   : > { %2077 = vmatmul.msk.bf16.gmra.mxu0 %vm915_vm12, %v911_v7 }
 0x14e   : > { %v1102_v43 = vpop.f32.mrf.mxu2  ;;  %v2932_v20 = vadd.f32 %v1258_v57, %v1205_v62 }
 0x14f   : > { %v1120_v60 = vadd.f32 %v1102_v43, %v1046_v21 }
 0x152   : > { %v1260_v61 = vpop.f32.mrf.mxu0  ;;  %v1295_v6 = vpop.f32.mrf.mxu1 }
 0x153   : > { %v1188_v8 = vpop.f32.mrf.mxu3  ;;  %v1335_v9 = vadd.f32 %v1295_v6, %v2815_v55 }
 0x154   : > { %v1206_v2 = vadd.f32 %v1188_v8, %v1120_v60 }
 0x156   : > { %v1389_v25 = vpop.f32.mrf.mxu2  ;;  %v2935_v22 = vadd.f32 %v1260_v61, %v1206_v2 }
 0x157   : > { %v1429_v29 = vadd.f32 %v1389_v25, %v1335_v9 }
 0x15a   : > { %v1535_v39 = vpop.f32.mrf.mxu0  ;;  %v1297_v50 = vpop.f32.mrf.mxu1 }
 0x15b   : > { %v1462_v33 = vpop.f32.mrf.mxu3  ;;  %v1336_v27 = vadd.f32 %v1297_v50, %v2824_v34 }
 0x15c   : > { %v1502_v19 = vadd.f32 %v1462_v33, %v1429_v29 }
 0x15e   : > { %v1575_v35 = vadd.f32 %v1535_v39, %v1502_v19  ;;  %v1391_v13 = vpop.f32.mrf.mxu2 }
 0x15f   : > { %v1430_v55 = vadd.f32 %v1391_v13, %v1336_v27 }
 0x160   : > { %v1595_v37 = vadd.f32 %v2940_v38, %v1575_v35 }
 0x162   : > { %v1611_v23 = vpack.c.bf16 %v1595_v37, %v1595_v37  ;;  %v1537_v5 = vpop.f32.mrf.mxu0  ;;  %v1300_v47 = vpop.f32.mrf.mxu1  ;;  %v1683_v40 = vmul.f32 %v1595_v37, %v1595_v37  ;;  %v1644_v45 = vsel %vm915_vm12, %v1595_v37, 0.0 }
 0x163   : > { %v1464_v41 = vpop.f32.mrf.mxu3  ;;  %v1337_v12 = vadd.f32 %v1300_v47, %v2830_v42 }
 0x164   : > { %1628 = vst.msk [vmem:[%s2949_s19] sm:$0xf] %vm1627_vm8, %v1611_v23  ;;  %v1503_v11 = vadd.f32 %v1464_v41, %v1430_v55  ;;  %v1699_v58 = vsel %vm915_vm12, %v1683_v40, 0.0 }
 0x166   : > { %v1576_v34 = vadd.f32 %v1537_v5, %v1503_v11  ;;  %v1394_v3 = vpop.f32.mrf.mxu2 }
 0x167   : > { %v1431_v46 = vadd.f32 %v1394_v3, %v1337_v12 }
 0x168   : > { %v1596_v32 = vadd.f32 %v2940_v38, %v1576_v34 }
 0x16a   : > { %v1612_v0 = vpack.c.bf16 %v1596_v32, %v1596_v32  ;;  %v1645_v1 = vsel %vm915_vm12, %v1596_v32, 0.0  ;;  %v1684_v26 = vmul.f32 %v1596_v32, %v1596_v32  ;;  %v1540_v30 = vpop.f32.mrf.mxu0  ;;  %v1302_v51 = vpop.f32.mrf.mxu1 }
 0x16b   : > { %v1646_v4 = vadd.f32 %v1645_v1, %v1644_v45  ;;  %v1467_v52 = vpop.f32.mrf.mxu3  ;;  %v1338_v48 = vadd.f32 %v1302_v51, %v2840_v14 }
 0x16c   : > { %1629 = vst.msk [vmem:[%s2949_s19 + $0x4] sm:$0xf] %vm1627_vm8, %v1612_v0  ;;  %v1700_v42 = vsel %vm915_vm12, %v1684_v26, 0.0  ;;  %v1504_v10 = vadd.f32 %v1467_v52, %v1431_v46 }
 0x16d   : > { %v1701_v44 = vadd.f32 %v1700_v42, %v1699_v58 }
 0x16e   : > { %v1577_v18 = vadd.f32 %v1540_v30, %v1504_v10  ;;  %v1396_v56 = vpop.f32.mrf.mxu2 }
 0x16f   : > { %v1432_v7 = vadd.f32 %v1396_v56, %v1338_v48 }
 0x170   : > { %v1597_v57 = vadd.f32 %v2940_v38, %v1577_v18 }
 0x172   : > { %v1613_v54 = vpack.c.bf16 %v1597_v57, %v1597_v57  ;;  %v1647_v53 = vsel %vm915_vm12, %v1597_v57, 0.0  ;;  %v1685_v62 = vmul.f32 %v1597_v57, %v1597_v57  ;;  %v1542_v21 = vpop.f32.mrf.mxu0  ;;  %v1305_v43 = vpop.f32.mrf.mxu1 }
 0x173   : > { %v1648_v60 = vadd.f32 %v1647_v53, %v1646_v4  ;;  %v1469_v61 = vpop.f32.mrf.mxu3  ;;  %v1339_v9 = vadd.f32 %v1305_v43, %v2847_v31 }
 0x174   : > { %1630 = vst.msk [vmem:[%s2949_s19 + $0x8] sm:$0xf] %vm1627_vm8, %v1613_v54  ;;  %v1702_v6 = vsel %vm915_vm12, %v1685_v62, 0.0  ;;  %v1505_v8 = vadd.f32 %v1469_v61, %v1432_v7 }
 0x175   : > { %v1703_v2 = vadd.f32 %v1702_v6, %v1701_v44 }
 0x176   : > { %v1578_v14 = vadd.f32 %v1542_v21, %v1505_v8  ;;  %v1399_v25 = vpop.f32.mrf.mxu2 }
 0x177   : > { %v1433_v39 = vadd.f32 %v1399_v25, %v1339_v9 }
 0x178   : > { %v1598_v29 = vadd.f32 %v2940_v38, %v1578_v14 }
 0x17a   : > { %v1614_v50 = vpack.c.bf16 %v1598_v29, %v1598_v29  ;;  %v1649_v33 = vsel %vm915_vm12, %v1598_v29, 0.0  ;;  %v1686_v19 = vmul.f32 %v1598_v29, %v1598_v29  ;;  %v1545_v35 = vpop.f32.mrf.mxu0  ;;  %v1307_v27 = vpop.f32.mrf.mxu1 }
 0x17b   : > { %v1650_v13 = vadd.f32 %v1649_v33, %v1648_v60  ;;  %v1472_v37 = vpop.f32.mrf.mxu3  ;;  %v1340_v47 = vadd.f32 %v1307_v27, %v2857_v36 }
 0x17c   : > { %1631 = vst.msk [vmem:[%s2949_s19 + $0xc] sm:$0xf] %vm1627_vm8, %v1614_v50  ;;  %v1704_v55 = vsel %vm915_vm12, %v1686_v19, 0.0  ;;  %v1506_v23 = vadd.f32 %v1472_v37, %v1433_v39 }
 0x17d   : > { %v1705_v5 = vadd.f32 %v1704_v55, %v1703_v2 }
 0x17e   : > { %v1579_v31 = vadd.f32 %v1545_v35, %v1506_v23  ;;  %v1401_v41 = vpop.f32.mrf.mxu2 }
 0x17f   : > { %v1434_v34 = vadd.f32 %v1401_v41, %v1340_v47 }
 0x180   : > { %v1599_v11 = vadd.f32 %v2940_v38, %v1579_v31 }
 0x182   : > { %v1615_v12 = vpack.c.bf16 %v1599_v11, %v1599_v11  ;;  %v1651_v3 = vsel %vm915_vm12, %v1599_v11, 0.0  ;;  %v1687_v40 = vmul.f32 %v1599_v11, %v1599_v11  ;;  %v1547_v32 = vpop.f32.mrf.mxu0  ;;  %v1310_v46 = vpop.f32.mrf.mxu1 }
 0x183   : > { %v1652_v45 = vadd.f32 %v1651_v3, %v1650_v13  ;;  %v1474_v0 = vpop.f32.mrf.mxu3  ;;  %v1341_v51 = vadd.f32 %v1310_v46, %v2864_v63 }
 0x184   : > { %1632 = vst.msk [vmem:[%s2949_s19 + $0x10] sm:$0xf] %vm1627_vm8, %v1615_v12  ;;  %v1706_v1 = vsel %vm915_vm12, %v1687_v40, 0.0  ;;  %v1507_v26 = vadd.f32 %v1474_v0, %v1434_v34 }
 0x185   : > { %v1707_v30 = vadd.f32 %v1706_v1, %v1705_v5 }
 0x186   : > { %v1580_v36 = vadd.f32 %v1547_v32, %v1507_v26  ;;  %v1404_v4 = vpop.f32.mrf.mxu2 }
 0x187   : > { %v1435_v58 = vadd.f32 %v1404_v4, %v1341_v51 }
 0x188   : > { %v1600_v52 = vadd.f32 %v2940_v38, %v1580_v36 }
 0x18a   : > { %v1616_v42 = vpack.c.bf16 %v1600_v52, %v1600_v52  ;;  %v1653_v10 = vsel %vm915_vm12, %v1600_v52, 0.0  ;;  %v1688_v44 = vmul.f32 %v1600_v52, %v1600_v52  ;;  %v1550_v18 = vpop.f32.mrf.mxu0  ;;  %v1312_v48 = vpop.f32.mrf.mxu1 }
 0x18b   : > { %v1654_v56 = vadd.f32 %v1653_v10, %v1652_v45  ;;  %v1477_v57 = vpop.f32.mrf.mxu3  ;;  %v1342_v62 = vadd.f32 %v1312_v48, %v2874_v24 }
 0x18c   : > { %1633 = vst.msk [vmem:[%s2949_s19 + $0x14] sm:$0xf] %vm1627_vm8, %v1616_v42  ;;  %v1708_v7 = vsel %vm915_vm12, %v1688_v44, 0.0  ;;  %v1508_v54 = vadd.f32 %v1477_v57, %v1435_v58 }
 0x18d   : > { %v1709_v53 = vadd.f32 %v1708_v7, %v1707_v30 }
 0x18e   : > { %v1581_v63 = vadd.f32 %v1550_v18, %v1508_v54  ;;  %v1406_v21 = vpop.f32.mrf.mxu2 }
 0x18f   : > { %v1436_v60 = vadd.f32 %v1406_v21, %v1342_v62 }
 0x190   : > { %v1601_v43 = vadd.f32 %v2940_v38, %v1581_v63 }
 0x192   : > { %v1617_v61 = vpack.c.bf16 %v1601_v43, %v1601_v43  ;;  %v1655_v6 = vsel %vm915_vm12, %v1601_v43, 0.0  ;;  %v1689_v8 = vmul.f32 %v1601_v43, %v1601_v43  ;;  %v1552_v2 = vpop.f32.mrf.mxu0  ;;  %v1315_v14 = vpop.f32.mrf.mxu1 }
 0x193   : > { %v1656_v9 = vadd.f32 %v1655_v6, %v1654_v56  ;;  %v1479_v25 = vpop.f32.mrf.mxu3  ;;  %v1343_v33 = vadd.f32 %v1315_v14, %v2881_v49 }
 0x194   : > { %1634 = vst.msk [vmem:[%s2949_s19 + $0x18] sm:$0xf] %vm1627_vm8, %v1617_v61  ;;  %v1710_v29 = vsel %vm915_vm12, %v1689_v8, 0.0  ;;  %v1509_v39 = vadd.f32 %v1479_v25, %v1436_v60 }
 0x195   : > { %v1711_v50 = vadd.f32 %v1710_v29, %v1709_v53 }
 0x196   : > { %v1582_v24 = vadd.f32 %v1552_v2, %v1509_v39  ;;  %v1409_v19 = vpop.f32.mrf.mxu2 }
 0x197   : > { %v1437_v27 = vadd.f32 %v1409_v19, %v1343_v33 }
 0x198   : > { %v1602_v35 = vadd.f32 %v2940_v38, %v1582_v24 }
 0x19a   : > { %v1618_v13 = vpack.c.bf16 %v1602_v35, %v1602_v35  ;;  %v1657_v37 = vsel %vm915_vm12, %v1602_v35, 0.0  ;;  %v1690_v55 = vmul.f32 %v1602_v35, %v1602_v35  ;;  %v1555_v23 = vpop.f32.mrf.mxu0  ;;  %v1317_v5 = vpop.f32.mrf.mxu1 }
 0x19b   : > { %v1658_v31 = vadd.f32 %v1657_v37, %v1656_v9  ;;  %v1482_v47 = vpop.f32.mrf.mxu3  ;;  %v1344_v12 = vadd.f32 %v1317_v5, %v2891_v16 }
 0x19c   : > { %1635 = vst.msk [vmem:[%s2949_s19 + $0x1c] sm:$0xf] %vm1627_vm8, %v1618_v13  ;;  %v1712_v41 = vsel %vm915_vm12, %v1690_v55, 0.0  ;;  %v1510_v11 = vadd.f32 %v1482_v47, %v1437_v27 }
 0x19d   : > { %v1713_v34 = vadd.f32 %v1712_v41, %v1711_v50 }
 0x19e   : > { %v1583_v49 = vadd.f32 %v1555_v23, %v1510_v11  ;;  %v1411_v3 = vpop.f32.mrf.mxu2 }
 0x19f   : > { %v1438_v32 = vadd.f32 %v1411_v3, %v1344_v12 }
 0x1a0   : > { %v1603_v40 = vadd.f32 %v2940_v38, %v1583_v49 }
 0x1a2   : > { %v1619_v46 = vpack.c.bf16 %v1603_v40, %v1603_v40  ;;  %v1659_v45 = vsel %vm915_vm12, %v1603_v40, 0.0  ;;  %v1691_v0 = vmul.f32 %v1603_v40, %v1603_v40  ;;  %v1557_v1 = vpop.f32.mrf.mxu0  ;;  %v1320_v26 = vpop.f32.mrf.mxu1 }
 0x1a3   : > { %v1660_v30 = vadd.f32 %v1659_v45, %v1658_v31  ;;  %v1484_v36 = vpop.f32.mrf.mxu3  ;;  %v1345_v58 = vadd.f32 %v1320_v26, %v2898_v17 }
 0x1a4   : > { %1636 = vst.msk [vmem:[%s2949_s19 + $0x20] sm:$0xf] %vm1627_vm8, %v1619_v46  ;;  %v1714_v51 = vsel %vm915_vm12, %v1691_v0, 0.0  ;;  %v1511_v4 = vadd.f32 %v1484_v36, %v1438_v32 }
 0x1a5   : > { %v1715_v52 = vadd.f32 %v1714_v51, %v1713_v34 }
 0x1a6   : > { %v1584_v16 = vadd.f32 %v1557_v1, %v1511_v4  ;;  %v1414_v42 = vpop.f32.mrf.mxu2 }
 0x1a7   : > { %v1439_v44 = vadd.f32 %v1414_v42, %v1345_v58 }
 0x1a8   : > { %v1604_v10 = vadd.f32 %v2940_v38, %v1584_v16 }
 0x1aa   : > { %v1620_v18 = vpack.c.bf16 %v1604_v10, %v1604_v10  ;;  %v1661_v48 = vsel %vm915_vm12, %v1604_v10, 0.0  ;;  %v1692_v56 = vmul.f32 %v1604_v10, %v1604_v10  ;;  %v1560_v57 = vpop.f32.mrf.mxu0  ;;  %v1322_v7 = vpop.f32.mrf.mxu1 }
 0x1ab   : > { %v1662_v54 = vadd.f32 %v1661_v48, %v1660_v30  ;;  %v1487_v53 = vpop.f32.mrf.mxu3  ;;  %v1346_v43 = vadd.f32 %v1322_v7, %v2908_v59 }
 0x1ac   : > { %1637 = vst.msk [vmem:[%s2949_s19 + $0x24] sm:$0xf] %vm1627_vm8, %v1620_v18  ;;  %v1716_v63 = vsel %vm915_vm12, %v1692_v56, 0.0  ;;  %v1512_v62 = vadd.f32 %v1487_v53, %v1439_v44 }
 0x1ad   : > { %v1717_v21 = vadd.f32 %v1716_v63, %v1715_v52 }
 0x1ae   : > { %v1585_v17 = vadd.f32 %v1560_v57, %v1512_v62  ;;  %v1416_v60 = vpop.f32.mrf.mxu2 }
 0x1af   : > { %v1440_v6 = vadd.f32 %v1416_v60, %v1346_v43 }
 0x1b0   : > { %v1605_v61 = vadd.f32 %v2940_v38, %v1585_v17 }
 0x1b2   : > { %v1621_v8 = vpack.c.bf16 %v1605_v61, %v1605_v61  ;;  %v1663_v2 = vsel %vm915_vm12, %v1605_v61, 0.0  ;;  %v1693_v14 = vmul.f32 %v1605_v61, %v1605_v61  ;;  %v1562_v9 = vpop.f32.mrf.mxu0  ;;  %v1325_v25 = vpop.f32.mrf.mxu1 }
 0x1b3   : > { %v1664_v29 = vadd.f32 %v1663_v2, %v1662_v54  ;;  %v1489_v39 = vpop.f32.mrf.mxu3  ;;  %v1347_v19 = vadd.f32 %v1325_v25, %v2915_v15 }
 0x1b4   : > { %1638 = vst.msk [vmem:[%s2949_s19 + $0x28] sm:$0xf] %vm1627_vm8, %v1621_v8  ;;  %v1718_v50 = vsel %vm915_vm12, %v1693_v14, 0.0  ;;  %v1513_v24 = vadd.f32 %v1489_v39, %v1440_v6 }
 0x1b5   : > { %v1719_v33 = vadd.f32 %v1718_v50, %v1717_v21 }
 0x1b6   : > { %v1586_v59 = vadd.f32 %v1562_v9, %v1513_v24  ;;  %v1419_v35 = vpop.f32.mrf.mxu2 }
 0x1b7   : > { %v1441_v13 = vadd.f32 %v1419_v35, %v1347_v19 }
 0x1b8   : > { %v1606_v27 = vadd.f32 %v2940_v38, %v1586_v59 }
 0x1ba   : > { %v1622_v37 = vpack.c.bf16 %v1606_v27, %v1606_v27  ;;  %v1665_v55 = vsel %vm915_vm12, %v1606_v27, 0.0  ;;  %v1694_v23 = vmul.f32 %v1606_v27, %v1606_v27  ;;  %v1565_v5 = vpop.f32.mrf.mxu0  ;;  %v1327_v31 = vpop.f32.mrf.mxu1 }
 0x1bb   : > { %v1666_v47 = vadd.f32 %v1665_v55, %v1664_v29  ;;  %v1492_v41 = vpop.f32.mrf.mxu3  ;;  %v1348_v12 = vadd.f32 %v1327_v31, %v2925_v28 }
 0x1bc   : > { %1639 = vst.msk [vmem:[%s2949_s19 + $0x2c] sm:$0xf] %vm1627_vm8, %v1622_v37  ;;  %v1720_v11 = vsel %vm915_vm12, %v1694_v23, 0.0  ;;  %v1514_v34 = vadd.f32 %v1492_v41, %v1441_v13 }
 0x1bd   : > { %v1721_v49 = vadd.f32 %v1720_v11, %v1719_v33 }
 0x1be   : > { %v1587_v15 = vadd.f32 %v1565_v5, %v1514_v34  ;;  %v1421_v3 = vpop.f32.mrf.mxu2 }
 0x1bf   : > { %v1442_v32 = vadd.f32 %v1421_v3, %v1348_v12 }
 0x1c0   : > { %v1607_v40 = vadd.f32 %v2940_v38, %v1587_v15 }
 0x1c2   : > { %v1623_v46 = vpack.c.bf16 %v1607_v40, %v1607_v40  ;;  %v1667_v45 = vsel %vm915_vm12, %v1607_v40, 0.0  ;;  %v1695_v0 = vmul.f32 %v1607_v40, %v1607_v40  ;;  %v1567_v1 = vpop.f32.mrf.mxu0  ;;  %v1330_v26 = vpop.f32.mrf.mxu1 }
 0x1c3   : > { %v1668_v30 = vadd.f32 %v1667_v45, %v1666_v47  ;;  %v1494_v36 = vpop.f32.mrf.mxu3  ;;  %v1349_v16 = vadd.f32 %v1330_v26, %v2932_v20 }
 0x1c4   : > { %1640 = vst.msk [vmem:[%s2949_s19 + $0x30] sm:$0xf] %vm1627_vm8, %v1623_v46  ;;  %v1722_v51 = vsel %vm915_vm12, %v1695_v0, 0.0  ;;  %v1515_v4 = vadd.f32 %v1494_v36, %v1442_v32 }
 0x1c5   : > { %v1723_v52 = vadd.f32 %v1722_v51, %v1721_v49 }
 0x1c6   : > { %v1588_v28 = vadd.f32 %v1567_v1, %v1515_v4  ;;  %v1424_v58 = vpop.f32.mrf.mxu2 }
 0x1c7   : > { %v1443_v10 = vadd.f32 %v1424_v58, %v1349_v16 }
 0x1c8   : > { %v1608_v42 = vadd.f32 %v2940_v38, %v1588_v28 }
 0x1ca   : > { %v1624_v44 = vpack.c.bf16 %v1608_v42, %v1608_v42  ;;  %v1669_v18 = vsel %vm915_vm12, %v1608_v42, 0.0  ;;  %v1696_v48 = vmul.f32 %v1608_v42, %v1608_v42  ;;  %v1570_v56 = vpop.f32.mrf.mxu0  ;;  %v1332_v54 = vpop.f32.mrf.mxu1 }
 0x1cb   : > { %v1670_v57 = vadd.f32 %v1669_v18, %v1668_v30  ;;  %v1497_v7 = vpop.f32.mrf.mxu3  ;;  %v1350_v21 = vadd.f32 %v1332_v54, %v2935_v22 }
 0x1cc   : > { %1641 = vst.msk [vmem:[%s2949_s19 + $0x34] sm:$0xf] %vm1627_vm8, %v1624_v44  ;;  %v1724_v53 = vsel %vm915_vm12, %v1696_v48, 0.0  ;;  %v1516_v63 = vadd.f32 %v1497_v7, %v1443_v10 }
 0x1cd   : > { %v1725_v62 = vadd.f32 %v1724_v53, %v1723_v52 }
 0x1ce   : > { %v1589_v20 = vadd.f32 %v1570_v56, %v1516_v63  ;;  %v1426_v17 = vpop.f32.mrf.mxu2 }
 0x1cf   : > { %v1444_v60 = vadd.f32 %v1426_v17, %v1350_v21 }
 0x1d0   : > { %v1609_v43 = vadd.f32 %v2940_v38, %v1589_v20 }
 0x1d2   : > { %v1625_v61 = vpack.c.bf16 %v1609_v43, %v1609_v43  ;;  %v1671_v6 = vsel %vm915_vm12, %v1609_v43, 0.0  ;;  %v1697_v8 = vmul.f32 %v1609_v43, %v1609_v43  ;;  %v1572_v22 = vpop.f32.mrf.mxu0 }
 0x1d3   : > { %v1672_v2 = vadd.f32 %v1671_v6, %v1670_v57  ;;  %v1499_v14 = vpop.f32.mrf.mxu3 }
 0x1d4   : > { %1642 = vst.msk [vmem:[%s2949_s19 + $0x38] sm:$0xf] %vm1627_vm8, %v1625_v61  ;;  %v1726_v9 = vsel %vm915_vm12, %v1697_v8, 0.0  ;;  %v1517_v25 = vadd.f32 %v1499_v14, %v1444_v60 }
 0x1d5   : > { %v1727_v29 = vadd.f32 %v1726_v9, %v1725_v62 }
 0x1d6   : > { %v1590_v39 = vadd.f32 %v1572_v22, %v1517_v25 }
 0x1d8   : > { %v1610_v50 = vadd.f32 %v2940_v38, %v1590_v39 }
 0x1da   : > { %v1626_v24 = vpack.c.bf16 %v1610_v50, %v1610_v50  ;;  %v1673_v33 = vsel %vm915_vm12, %v1610_v50, 0.0  ;;  %v1698_v59 = vmul.f32 %v1610_v50, %v1610_v50 }
 0x1db   : > { %v1674_v19 = vadd.f32 %v1673_v33, %v1672_v2 }
 0x1dc   : > { %1643 = vst.msk [vmem:[%s2949_s19 + $0x3c] sm:$0xf] %vm1627_vm8, %v1626_v24  ;;  %v1728_v35 = vsel %vm915_vm12, %v1698_v59, 0.0 }
 0x1dd   : > { %v1675_v27 = vrot.slane %v1674_v19, 4  ;;  %v1729_v13 = vadd.f32 %v1728_v35, %v1727_v29 }
 0x1df   : > { %v1676_v37 = vadd.f32 %v1675_v27, %v1674_v19  ;;  %v1730_v55 = vrot.slane %v1729_v13, 4 }
 0x1e1   : > { %v1677_v23 = vrot.slane %v1676_v37, 2  ;;  %v1731_v5 = vadd.f32 %v1730_v55, %v1729_v13 }
 0x1e3   : > { %v1678_v38 = vadd.f32 %v1677_v23, %v1676_v37  ;;  %v1732_v31 = vrot.slane %v1731_v5, 2 }
 0x1e5   : > { %v1679_v47 = vrot.slane %v1678_v38, 1  ;;  %v1733_v41 = vadd.f32 %v1732_v31, %v1731_v5 }
 0x1e7   : > { %v1680_v11 = vadd.f32 %v1679_v47, %v1678_v38  ;;  %v1734_v34 = vrot.slane %v1733_v41, 1 }
 0x1e9   : > { %1682 = vst.msk [vmem:[%s530_s22] sm:$0x1] %vm1681_vm9, %v1680_v11  ;;  %v1735_v49 = vadd.f32 %v1734_v34, %v1733_v41 }
 0x1eb   : > { %1736 = vst.msk [vmem:[%s537_s27] sm:$0x1] %vm1681_vm9, %v1735_v49 }
 0x1ec PF: > { %s20_s13 = sadd.s32 1, %s2219_s13   ;;  %s3099_s30 = smov %s2211_s11 }
 0x1ed   : > { %p17_p13 = scmp.ge.s32.totalorder %s20_s13, 6   ;;  %s3100_s10 = smov %s2215_s12 }
 0x1ee   : > { %s3101_s11 = smov %s3104_s14  ;;  %s3102_s12 = smov %s3108_s15 }
 0x1ef   :  { %19 = sbr.rel (!%p17_p13) target bundleno = 3 (0x3), region = 116 }

</bundles_post_ra>
